<compile_context>
chip_gen: v6e
topology: v6e:2x2x1
jax: 0.10.0
libtpu: 0.0.40
codegen_flags: <defaults>
</compile_context>

<pallas_src>
import math
import functools

import jax
import jax.numpy as jnp
from jax.experimental import pallas as pl
from jax.experimental.pallas import tpu as pltpu


# ---------------- model config (synthetic, scaled-down SVTR) -----------------
NUM_CLASSES = 40          # synthetic Lao dictionary size (dict file not loaded)
D1, D = 32, 64            # patch-embed dims
HEADS = 4
DEPTH = 2
MLP_RATIO = 2
ENC_OUT = 192             # matches SVTRDecoder(in_channels=192)
LN_EPS = 1e-5             # PyTorch nn.LayerNorm default
LANE = 128


def pad_lanes(x, mult=LANE):
    """Zero-pad the last (lane) dim up to a multiple of `mult`."""
    k = x.shape[-1]
    padn = (-k) % mult
    if padn:
        x = jnp.pad(x, [(0, 0)] * (x.ndim - 1) + [(0, padn)])
    return x


# -----------------------------------------------------------------------------
# Fused matmul + bias + activation kernel (used for conv-as-matmul stages)
# -----------------------------------------------------------------------------
def _matmul_kernel(x_ref, w_ref, b_ref, o_ref, *, activation):
    x = x_ref[...].astype(jnp.bfloat16)                      # bf16 in, f32 acc
    acc = jnp.dot(x, w_ref[...], preferred_element_type=jnp.float32) + b_ref[...]
    if activation == "relu":
        acc = jnp.maximum(acc, 0.0)
    elif activation == "gelu":
        acc = jax.nn.gelu(acc)   # tanh approx (erf not used; minor drift vs torch)
    o_ref[...] = acc.astype(o_ref.dtype)


def pallas_linear(x, w, b, activation=None, block_m=128):
    """x: [M, K] f32, w: [K, N] bf16, b: [N] f32 -> [M, N] f32 (bias+act fused)."""
    M, K = x.shape
    K2, N = w.shape
    assert K == K2, (K, K2)
    if M % block_m != 0:
        block_m = M
    kern = functools.partial(_matmul_kernel, activation=activation)
    return pl.pallas_call(
        kern,
        out_shape=jax.ShapeDtypeStruct((M, N), jnp.float32),
        grid=(M // block_m,),
        in_specs=[
            pl.BlockSpec((block_m, K), lambda i: (i, 0)),
            pl.BlockSpec((K, N), lambda i: (0, 0)),
            pl.BlockSpec((1, N), lambda i: (0, 0)),
        ],
        out_specs=pl.BlockSpec((block_m, N), lambda i: (i, 0)),
        compiler_params=pltpu.CompilerParams(dimension_semantics=("parallel",)),
    )(x, w, b.reshape(1, N))


# -----------------------------------------------------------------------------
# STN head: fc1(relu) + fc2 fused into a single tiny kernel
# -----------------------------------------------------------------------------
def _stn_head_kernel(f_ref, w1_ref, b1_ref, w2_ref, b2_ref, o_ref):
    f = f_ref[...].astype(jnp.bfloat16)
    h = jnp.dot(f, w1_ref[...], preferred_element_type=jnp.float32) + b1_ref[...]
    h = jnp.maximum(h, 0.0)
    theta = jnp.dot(h.astype(jnp.bfloat16), w2_ref[...],
                    preferred_element_type=jnp.float32) + b2_ref[...]
    o_ref[...] = theta


def pallas_stn_head(f, w1, b1, w2, b2):
    B, K = f.shape
    H = w1.shape[1]
    O = w2.shape[1]
    return pl.pallas_call(
        _stn_head_kernel,
        out_shape=jax.ShapeDtypeStruct((B, O), jnp.float32),
        grid=(1,),
        in_specs=[
            pl.BlockSpec((B, K), lambda i: (0, 0)),
            pl.BlockSpec((K, H), lambda i: (0, 0)),
            pl.BlockSpec((1, H), lambda i: (0, 0)),
            pl.BlockSpec((H, O), lambda i: (0, 0)),
            pl.BlockSpec((1, O), lambda i: (0, 0)),
        ],
        out_specs=pl.BlockSpec((B, O), lambda i: (0, 0)),
    )(f, w1, b1.reshape(1, H), w2, b2.reshape(1, O))


# -----------------------------------------------------------------------------
# Fused encoder + decoder mega-kernel (one grid step per batch element)
# -----------------------------------------------------------------------------
def _layernorm(x, g, b, eps):
    mu = jnp.mean(x, axis=-1, keepdims=True)
    var = jnp.mean(jnp.square(x - mu), axis=-1, keepdims=True)
    return (x - mu) * jax.lax.rsqrt(var + eps) * g + b


def _enc_dec_kernel(patches_ref, pe2w_ref, pe2b_ref, pos_ref,
                    ln1g_ref, ln1b_ref, qkvw_ref, qkvb_ref,
                    projw_ref, projb_ref, ln2g_ref, ln2b_ref,
                    fc1w_ref, fc1b_ref, fc2w_ref, fc2b_ref,
                    encg_ref, encb_ref, combw_ref, combb_ref,
                    decw_ref, decb_ref, o_ref,
                    *, depth, heads, hp, wp, eps):
    L, d = pos_ref.shape[1], pos_ref.shape[2]
    dh = d // heads
    scale = 1.0 / math.sqrt(dh)

    # ---- patch-embed stage 2 (conv as matmul over pre-extracted patches) ----
    t = jnp.dot(patches_ref[0].astype(jnp.bfloat16), pe2w_ref[...],
                preferred_element_type=jnp.float32) + pe2b_ref[...]
    t = t + pos_ref[0]                                               # [L, d]

    # ---- transformer blocks (global-mixing MHSA + MLP), VMEM-resident ----
    for blk in range(depth):
        h = _layernorm(t, ln1g_ref[blk], ln1b_ref[blk], eps)
        qkv = jnp.dot(h.astype(jnp.bfloat16), qkvw_ref[blk],
                      preferred_element_type=jnp.float32) + qkvb_ref[blk]  # [L, 3d]
        heads_out = []
        for hd in range(heads):
            q = qkv[:, hd * dh:(hd + 1) * dh]
            k = qkv[:, d + hd * dh:d + (hd + 1) * dh]
            v = qkv[:, 2 * d + hd * dh:2 * d + (hd + 1) * dh]
            # contract last dims directly (no k.T / XLU transpose)
            s = jax.lax.dot_general(q, k, (((1,), (1,)), ((), ())),
                                    preferred_element_type=jnp.float32) * scale
            s = s - jnp.max(s, axis=-1, keepdims=True)
            e = jnp.exp(s)
            p = e * pl.reciprocal(jnp.sum(e, axis=-1, keepdims=True), approx=True)
            heads_out.append(jnp.dot(p, v, preferred_element_type=jnp.float32))
        attn = jnp.concatenate(heads_out, axis=-1)                   # [L, d]
        attn = jnp.dot(attn.astype(jnp.bfloat16), projw_ref[blk],
                       preferred_element_type=jnp.float32) + projb_ref[blk]
        t = t + attn
        h = _layernorm(t, ln2g_ref[blk], ln2b_ref[blk], eps)
        h = jax.nn.gelu(jnp.dot(h.astype(jnp.bfloat16), fc1w_ref[blk],
                                preferred_element_type=jnp.float32) + fc1b_ref[blk])
        h = jnp.dot(h.astype(jnp.bfloat16), fc2w_ref[blk],
                    preferred_element_type=jnp.float32) + fc2b_ref[blk]
        t = t + h

    # ---- final LN + height pool + combining projection + decoder ----
    t = _layernorm(t, encg_ref[...], encb_ref[...], eps)             # [L, d]
    pooled = t[0:wp]
    for r in range(1, hp):                                           # mean over height
        pooled = pooled + t[r * wp:(r + 1) * wp]
    pooled = pooled * (1.0 / hp)                                     # [Wp, d]
    comb = jnp.dot(pooled.astype(jnp.bfloat16), combw_ref[...],
                   preferred_element_type=jnp.float32) + combb_ref[...]
    comb = comb * jnp.clip(comb + 3.0, 0.0, 6.0) * (1.0 / 6.0)       # hardswish
    logits = jnp.dot(comb.astype(jnp.bfloat16), decw_ref[...],
                     preferred_element_type=jnp.float32) + decb_ref[...]
    logits = logits - jnp.max(logits, axis=-1, keepdims=True)
    e = jnp.exp(logits)
    o_ref[0] = (e / jnp.sum(e, axis=-1, keepdims=True)).astype(o_ref.dtype)


# -----------------------------------------------------------------------------
# Conv (im2col glue + fused Pallas matmul)
# -----------------------------------------------------------------------------
def im2col(x, k, stride, pad):
    B, H, W, C = x.shape
    xp = jnp.pad(x, ((0, 0), (pad, pad), (pad, pad), (0, 0)))
    Ho = (H + 2 * pad - k) // stride + 1
    Wo = (W + 2 * pad - k) // stride + 1
    cols = []
    for di in range(k):
        for dj in range(k):
            cols.append(
                xp[:, di:di + (Ho - 1) * stride + 1:stride,
                   dj:dj + (Wo - 1) * stride + 1:stride, :]
            )
    return jnp.concatenate(cols, axis=-1), Ho, Wo


def conv2d(x, w, b, k, stride, pad, activation=None):
    """x: NHWC f32; w: [kh*kw*Cin, Cout] bf16; b: [Cout] f32."""
    patches, Ho, Wo = im2col(x, k, stride, pad)
    B = x.shape[0]
    K = patches.shape[-1]
    patches = pad_lanes(patches.reshape(B * Ho * Wo, K))   # K -> multiple of 128
    w = jnp.pad(w, ((0, patches.shape[-1] - K), (0, 0)))   # zero rows: arithmetic no-op
    y = pallas_linear(patches, w, b, activation=activation)
    return y.reshape(B, Ho, Wo, -1)


# -----------------------------------------------------------------------------
# STN grid sample (glue)
# -----------------------------------------------------------------------------
def affine_grid_sample(x, theta, out_h, out_w):
    # TODO(synk): bilinear grid_sample is a data-dependent gather; kept in plain JAX.
    B, H, W, C = x.shape
    ys = jnp.linspace(-1.0, 1.0, out_h)
    xs = jnp.linspace(-1.0, 1.0, out_w)
    gy, gx = jnp.meshgrid(ys, xs, indexing="ij")
    base = jnp.stack([gx, gy, jnp.ones_like(gx)], axis=-1)          # (out_h, out_w, 3)
    th = theta.reshape(B, 2, 3)
    src = jnp.einsum("hwk,bjk->bhwj", base, th)                     # (B, out_h, out_w, 2)
    sx = (src[..., 0] + 1.0) * 0.5 * (W - 1)
    sy = (src[..., 1] + 1.0) * 0.5 * (H - 1)
    x0 = jnp.floor(sx)
    y0 = jnp.floor(sy)
    wx1 = sx - x0
    wx0 = 1.0 - wx1
    wy1 = sy - y0
    wy0 = 1.0 - wy1

    def clipi(v, hi):
        return jnp.clip(v, 0, hi).astype(jnp.int32)

    x0i, x1i = clipi(x0, W - 1), clipi(x0 + 1.0, W - 1)
    y0i, y1i = clipi(y0, H - 1), clipi(y0 + 1.0, H - 1)
    flat = x.reshape(B, H * W, C)

    def gather(yi, xi):
        idx = (yi * W + xi).reshape(B, -1, 1)
        return jnp.take_along_axis(flat, idx, axis=1).reshape(B, out_h, out_w, C)

    out = (gather(y0i, x0i) * (wy0 * wx0)[..., None]
           + gather(y0i, x1i) * (wy0 * wx1)[..., None]
           + gather(y1i, x0i) * (wy1 * wx0)[..., None]
           + gather(y1i, x1i) * (wy1 * wx1)[..., None])
    return out


# -----------------------------------------------------------------------------
# Deterministic parameter initialization (synthetic; no checkpoint loading)
# -----------------------------------------------------------------------------
def init_params(key):
    def dense(k, kin, kout, scale=0.02):
        # matmul weights stored in bf16 (MXU operands); biases/LN kept f32
        return (jax.random.normal(k, (kin, kout), jnp.float32) * scale).astype(jnp.bfloat16)

    keys = iter(jax.random.split(key, 64))
    p = {}
    # ---- STN localization network ----
    p["stn_conv1_w"] = dense(next(keys), 3 * 3 * 3, 8)
    p["stn_conv1_b"] = jnp.zeros((8,), jnp.float32)
    p["stn_conv2_w"] = dense(next(keys), 3 * 3 * 8, 16)
    p["stn_conv2_b"] = jnp.zeros((16,), jnp.float32)
    p["stn_fc1_w"] = dense(next(keys), 4 * 8 * 16, 32)
    p["stn_fc1_b"] = jnp.zeros((32,), jnp.float32)
    p["stn_fc2_w"] = jnp.zeros((32, 6), jnp.bfloat16)                # identity-affine init
    p["stn_fc2_b"] = jnp.array([1.0, 0.0, 0.0, 0.0, 1.0, 0.0], jnp.float32)
    # ---- SVTR encoder ----
    p["pe1_w"] = dense(next(keys), 3 * 3 * 3, D1)
    p["pe1_b"] = jnp.zeros((D1,), jnp.float32)
    p["pe2_w"] = dense(next(keys), 3 * 3 * D1, D)
    p["pe2_b"] = jnp.zeros((1, D), jnp.float32)
    p["pos"] = jax.random.normal(next(keys), (1, 32, D), jnp.float32) * 0.02
    # transformer blocks stacked along a leading depth axis (indexed in-kernel)
    p["ln1_g"] = jnp.ones((DEPTH, 1, D), jnp.float32)
    p["ln1_b"] = jnp.zeros((DEPTH, 1, D), jnp.float32)
    p["qkv_w"] = jnp.stack([dense(next(keys), D, 3 * D) for _ in range(DEPTH)])
    p["qkv_b"] = jnp.zeros((DEPTH, 1, 3 * D), jnp.float32)
    p["proj_w"] = jnp.stack([dense(next(keys), D, D) for _ in range(DEPTH)])
    p["proj_b"] = jnp.zeros((DEPTH, 1, D), jnp.float32)
    p["ln2_g"] = jnp.ones((DEPTH, 1, D), jnp.float32)
    p["ln2_b"] = jnp.zeros((DEPTH, 1, D), jnp.float32)
    p["fc1_w"] = jnp.stack([dense(next(keys), D, D * MLP_RATIO) for _ in range(DEPTH)])
    p["fc1_b"] = jnp.zeros((DEPTH, 1, D * MLP_RATIO), jnp.float32)
    p["fc2_w"] = jnp.stack([dense(next(keys), D * MLP_RATIO, D) for _ in range(DEPTH)])
    p["fc2_b"] = jnp.zeros((DEPTH, 1, D), jnp.float32)
    p["enc_ln_g"] = jnp.ones((1, D), jnp.float32)
    p["enc_ln_b"] = jnp.zeros((1, D), jnp.float32)
    p["comb_w"] = dense(next(keys), D, ENC_OUT)
    p["comb_b"] = jnp.zeros((1, ENC_OUT), jnp.float32)
    # ---- SVTR decoder ----
    p["dec_w"] = dense(next(keys), ENC_OUT, NUM_CLASSES)
    p["dec_b"] = jnp.zeros((1, NUM_CLASSES), jnp.float32)
    return p


# -----------------------------------------------------------------------------
# Forward pass (preprocessor -> encoder -> decoder), mirroring SVTRModel.forward
# -----------------------------------------------------------------------------
def stn_forward(p, x):
    # x: NHWC [B, 16, 32, 3]
    f = conv2d(x, p["stn_conv1_w"], p["stn_conv1_b"], k=3, stride=2, pad=1, activation="relu")
    f = conv2d(f, p["stn_conv2_w"], p["stn_conv2_b"], k=3, stride=2, pad=1, activation="relu")
    B = x.shape[0]
    f = f.reshape(B, -1)                                             # [B, 512]
    theta = pallas_stn_head(f, p["stn_fc1_w"], p["stn_fc1_b"],
                            p["stn_fc2_w"], p["stn_fc2_b"])
    return affine_grid_sample(x, theta, x.shape[1], x.shape[2])


def encoder_decoder_forward(p, x):
    B = x.shape[0]
    # patch-embed stage 1 (conv + GELU) via Pallas matmul
    f = conv2d(x, p["pe1_w"], p["pe1_b"], k=3, stride=2, pad=1, activation="gelu")
    # patch-embed stage 2 patches (im2col glue); the conv itself is fused into
    # the encoder mega-kernel so its narrow (d=64) output never hits HBM.
    patches, Hp, Wp = im2col(f, 3, 2, 1)
    L = Hp * Wp
    assert L == p["pos"].shape[1], (L, p["pos"].shape)
    K2 = patches.shape[-1]
    patches = pad_lanes(patches.reshape(B, L, K2))                   # K -> 128-multiple
    Kp = patches.shape[-1]
    pe2_w = jnp.pad(p["pe2_w"], ((0, Kp - K2), (0, 0)))

    weight_args = (pe2_w, p["pe2_b"], p["pos"],
                   p["ln1_g"], p["ln1_b"], p["qkv_w"], p["qkv_b"],
                   p["proj_w"], p["proj_b"], p["ln2_g"], p["ln2_b"],
                   p["fc1_w"], p["fc1_b"], p["fc2_w"], p["fc2_b"],
                   p["enc_ln_g"], p["enc_ln_b"], p["comb_w"], p["comb_b"],
                   p["dec_w"], p["dec_b"])

    def _const_spec(a):
        nd = a.ndim
        return pl.BlockSpec(a.shape, lambda b, _nd=nd: (0,) * _nd)

    kern = functools.partial(_enc_dec_kernel, depth=DEPTH, heads=HEADS,
                             hp=Hp, wp=Wp, eps=LN_EPS)
    return pl.pallas_call(
        kern,
        out_shape=jax.ShapeDtypeStruct((B, Wp, NUM_CLASSES), jnp.float32),
        grid=(B,),
        in_specs=[pl.BlockSpec((1, L, Kp), lambda b: (b, 0, 0))]
                 + [_const_spec(a) for a in weight_args],
        out_specs=pl.BlockSpec((1, Wp, NUM_CLASSES), lambda b: (b, 0, 0)),
        compiler_params=pltpu.CompilerParams(dimension_semantics=("parallel",)),
    )(patches, *weight_args)


@jax.jit
def svtr_forward(p, x_nchw):
    x = jnp.transpose(x_nchw, (0, 2, 3, 1))                          # NCHW -> NHWC
    x = stn_forward(p, x)
    return encoder_decoder_forward(p, x)                             # [B, T, num_classes]


if __name__ == "__main__":
    key = jax.random.PRNGKey(0)
    pkey, xkey = jax.random.split(key)
    params = init_params(pkey)
    # PyTorch-style NCHW text-image batch: [batch=2, channels=3, H=16, W=32]
    x = jax.random.normal(xkey, (2, 3, 16, 32), jnp.float32)
    out = svtr_forward(params, x)
    out = jax.block_until_ready(out)
    assert out.shape == (2, 8, NUM_CLASSES), out.shape
    assert bool(jnp.all(jnp.isfinite(out)))
    print("KERNEL_OK")
</pallas_src>

<mosaic_0001>
module attributes {stable_mosaic.version = 11 : i64} {
  func.func @_matmul_kernel(%arg0: i32, %arg1: memref<128x128xf32, #tpu.memory_space<vmem>>, %arg2: memref<128x8xbf16, #tpu.memory_space<vmem>>, %arg3: memref<1x8xf32, #tpu.memory_space<vmem>>, %arg4: memref<128x8xf32, #tpu.memory_space<vmem>>) attributes {dimension_semantics = [#tpu.dimension_semantics<parallel>], iteration_bounds = array<i64: 2>, scalar_prefetch = 0 : i64, scratch_operands = 0 : i64, tpu.core_type = #tpu.core_type<tc>, window_params = [{transform_indices = @transform_0, window_bounds = array<i64: 128, 128>}, {pipeline_mode = #tpu.pipeline_mode<synchronous>, transform_indices = @transform_1, window_bounds = array<i64: 128, 8>}, {pipeline_mode = #tpu.pipeline_mode<synchronous>, transform_indices = @transform_2, window_bounds = array<i64: 1, 8>}, {transform_indices = @transform_3, window_bounds = array<i64: 128, 8>}]} {
    %c0 = arith.constant 0 : index
    %c0_0 = arith.constant 0 : index
    %0 = vector.load %arg1[%c0, %c0_0] : memref<128x128xf32, #tpu.memory_space<vmem>>, vector<128x128xf32>
    %1 = arith.truncf %0 : vector<128x128xf32> to vector<128x128xbf16>
    %c0_1 = arith.constant 0 : index
    %c0_2 = arith.constant 0 : index
    %2 = vector.load %arg2[%c0_1, %c0_2] : memref<128x8xbf16, #tpu.memory_space<vmem>>, vector<128x8xbf16>
    %cst = arith.constant dense<0.000000e+00> : vector<128x8xf32>
    %3 = tpu.matmul %1, %2, %cst {dimension_numbers = #tpu.dot_dimension_numbers<[1], [0], [0], [1], [0, 0, 1, 1], [], []>} : vector<128x128xbf16>, vector<128x8xbf16>, vector<128x8xf32> -> vector<128x8xf32>
    %c0_3 = arith.constant 0 : index
    %c0_4 = arith.constant 0 : index
    %4 = vector.load %arg3[%c0_3, %c0_4] : memref<1x8xf32, #tpu.memory_space<vmem>>, vector<1x8xf32>
    %5 = vector.broadcast %4 : vector<1x8xf32> to vector<128x8xf32>
    %6 = arith.addf %3, %5 : vector<128x8xf32>
    %cst_5 = arith.constant 0.000000e+00 : f32
    %7 = vector.broadcast %cst_5 : f32 to vector<128x8xf32>
    %8 = arith.maximumf %6, %7 : vector<128x8xf32>
    %c0_6 = arith.constant 0 : index
    %c0_7 = arith.constant 0 : index
    %9 = vector.load %arg4[%c0_6, %c0_7] : memref<128x8xf32, #tpu.memory_space<vmem>>, vector<128x8xf32>
    tpu.vector_store %arg4[%c0_6, %c0_7], %8 {strides = array<i32>} : memref<128x8xf32, #tpu.memory_space<vmem>>, vector<128x8xf32>,
    return
  }
  func.func @transform_0(%arg0: i32) -> (i32, i32) {
    %c0_i32 = arith.constant 0 : i32
    %c0_i32_0 = arith.constant 0 : i32
    return %arg0, %c0_i32 : i32, i32
  }
  func.func @transform_1(%arg0: i32) -> (i32, i32) {
    %c0_i32 = arith.constant 0 : i32
    %c0_i32_0 = arith.constant 0 : i32
    %c0_i32_1 = arith.constant 0 : i32
    return %c0_i32, %c0_i32_0 : i32, i32
  }
  func.func @transform_2(%arg0: i32) -> (i32, i32) {
    %c0_i32 = arith.constant 0 : i32
    %c0_i32_0 = arith.constant 0 : i32
    %c0_i32_1 = arith.constant 0 : i32
    return %c0_i32, %c0_i32_0 : i32, i32
  }
  func.func @transform_3(%arg0: i32) -> (i32, i32) {
    %c0_i32 = arith.constant 0 : i32
    %c0_i32_0 = arith.constant 0 : i32
    return %arg0, %c0_i32 : i32, i32
  }
}

module attributes {stable_mosaic.version = 11 : i64} {
  func.func @_matmul_kernel(%arg0: i32, %arg1: memref<64x128xf32, #tpu.memory_space<vmem>>, %arg2: memref<128x16xbf16, #tpu.memory_space<vmem>>, %arg3: memref<1x16xf32, #tpu.memory_space<vmem>>, %arg4: memref<64x16xf32, #tpu.memory_space<vmem>>) attributes {dimension_semantics = [#tpu.dimension_semantics<parallel>], iteration_bounds = array<i64: 1>, scalar_prefetch = 0 : i64, scratch_operands = 0 : i64, tpu.core_type = #tpu.core_type<tc>, window_params = [{transform_indices = @transform_0, window_bounds = array<i64: 64, 128>}, {pipeline_mode = #tpu.pipeline_mode<synchronous>, transform_indices = @transform_1, window_bounds = array<i64: 128, 16>}, {pipeline_mode = #tpu.pipeline_mode<synchronous>, transform_indices = @transform_2, window_bounds = array<i64: 1, 16>}, {transform_indices = @transform_3, window_bounds = array<i64: 64, 16>}]} {
    %c0 = arith.constant 0 : index
    %c0_0 = arith.constant 0 : index
    %0 = vector.load %arg1[%c0, %c0_0] : memref<64x128xf32, #tpu.memory_space<vmem>>, vector<64x128xf32>
    %1 = arith.truncf %0 : vector<64x128xf32> to vector<64x128xbf16>
    %c0_1 = arith.constant 0 : index
    %c0_2 = arith.constant 0 : index
    %2 = vector.load %arg2[%c0_1, %c0_2] : memref<128x16xbf16, #tpu.memory_space<vmem>>, vector<128x16xbf16>
    %cst = arith.constant dense<0.000000e+00> : vector<64x16xf32>
    %3 = tpu.matmul %1, %2, %cst {dimension_numbers = #tpu.dot_dimension_numbers<[1], [0], [0], [1], [0, 0, 1, 1], [], []>} : vector<64x128xbf16>, vector<128x16xbf16>, vector<64x16xf32> -> vector<64x16xf32>
    %c0_3 = arith.constant 0 : index
    %c0_4 = arith.constant 0 : index
    %4 = vector.load %arg3[%c0_3, %c0_4] : memref<1x16xf32, #tpu.memory_space<vmem>>, vector<1x16xf32>
    %5 = vector.broadcast %4 : vector<1x16xf32> to vector<64x16xf32>
    %6 = arith.addf %3, %5 : vector<64x16xf32>
    %cst_5 = arith.constant 0.000000e+00 : f32
    %7 = vector.broadcast %cst_5 : f32 to vector<64x16xf32>
    %8 = arith.maximumf %6, %7 : vector<64x16xf32>
    %c0_6 = arith.constant 0 : index
    %c0_7 = arith.constant 0 : index
    %9 = vector.load %arg4[%c0_6, %c0_7] : memref<64x16xf32, #tpu.memory_space<vmem>>, vector<64x16xf32>
    tpu.vector_store %arg4[%c0_6, %c0_7], %8 {strides = array<i32>} : memref<64x16xf32, #tpu.memory_space<vmem>>, vector<64x16xf32>,
    return
  }
  func.func @transform_0(%arg0: i32) -> (i32, i32) {
    %c0_i32 = arith.constant 0 : i32
    %c0_i32_0 = arith.constant 0 : i32
    return %arg0, %c0_i32 : i32, i32
  }
  func.func @transform_1(%arg0: i32) -> (i32, i32) {
    %c0_i32 = arith.constant 0 : i32
    %c0_i32_0 = arith.constant 0 : i32
    %c0_i32_1 = arith.constant 0 : i32
    return %c0_i32, %c0_i32_0 : i32, i32
  }
  func.func @transform_2(%arg0: i32) -> (i32, i32) {
    %c0_i32 = arith.constant 0 : i32
    %c0_i32_0 = arith.constant 0 : i32
    %c0_i32_1 = arith.constant 0 : i32
    return %c0_i32, %c0_i32_0 : i32, i32
  }
  func.func @transform_3(%arg0: i32) -> (i32, i32) {
    %c0_i32 = arith.constant 0 : i32
    %c0_i32_0 = arith.constant 0 : i32
    return %arg0, %c0_i32 : i32, i32
  }
}

module attributes {stable_mosaic.version = 11 : i64} {
  func.func @_stn_head_kernel(%arg0: i32, %arg1: memref<2x512xf32, #tpu.memory_space<vmem>>, %arg2: memref<512x32xbf16, #tpu.memory_space<vmem>>, %arg3: memref<1x32xf32, #tpu.memory_space<vmem>>, %arg4: memref<32x6xbf16, #tpu.memory_space<vmem>>, %arg5: memref<1x6xf32, #tpu.memory_space<vmem>>, %arg6: memref<2x6xf32, #tpu.memory_space<vmem>>) attributes {dimension_semantics = [#tpu.dimension_semantics<arbitrary>], iteration_bounds = array<i64: 1>, scalar_prefetch = 0 : i64, scratch_operands = 0 : i64, tpu.core_type = #tpu.core_type<tc>, window_params = [{pipeline_mode = #tpu.pipeline_mode<synchronous>, transform_indices = @transform_0, window_bounds = array<i64: 2, 512>}, {pipeline_mode = #tpu.pipeline_mode<synchronous>, transform_indices = @transform_1, window_bounds = array<i64: 512, 32>}, {pipeline_mode = #tpu.pipeline_mode<synchronous>, transform_indices = @transform_2, window_bounds = array<i64: 1, 32>}, {pipeline_mode = #tpu.pipeline_mode<synchronous>, transform_indices = @transform_3, window_bounds = array<i64: 32, 6>}, {pipeline_mode = #tpu.pipeline_mode<synchronous>, transform_indices = @transform_4, window_bounds = array<i64: 1, 6>}, {pipeline_mode = #tpu.pipeline_mode<synchronous>, transform_indices = @transform_5, window_bounds = array<i64: 2, 6>}]} {
    %c0 = arith.constant 0 : index
    %c0_0 = arith.constant 0 : index
    %0 = vector.load %arg1[%c0, %c0_0] : memref<2x512xf32, #tpu.memory_space<vmem>>, vector<2x512xf32>
    %1 = arith.truncf %0 : vector<2x512xf32> to vector<2x512xbf16>
    %c0_1 = arith.constant 0 : index
    %c0_2 = arith.constant 0 : index
    %2 = vector.load %arg2[%c0_1, %c0_2] : memref<512x32xbf16, #tpu.memory_space<vmem>>, vector<512x32xbf16>
    %cst = arith.constant dense<0.000000e+00> : vector<2x32xf32>
    %3 = tpu.matmul %1, %2, %cst {dimension_numbers = #tpu.dot_dimension_numbers<[1], [0], [0], [1], [0, 0, 1, 1], [], []>} : vector<2x512xbf16>, vector<512x32xbf16>, vector<2x32xf32> -> vector<2x32xf32>
    %c0_3 = arith.constant 0 : index
    %c0_4 = arith.constant 0 : index
    %4 = vector.load %arg3[%c0_3, %c0_4] : memref<1x32xf32, #tpu.memory_space<vmem>>, vector<1x32xf32>
    %5 = vector.broadcast %4 : vector<1x32xf32> to vector<2x32xf32>
    %6 = arith.addf %3, %5 : vector<2x32xf32>
    %cst_5 = arith.constant 0.000000e+00 : f32
    %7 = vector.broadcast %cst_5 : f32 to vector<2x32xf32>
    %8 = arith.maximumf %6, %7 : vector<2x32xf32>
    %9 = arith.truncf %8 : vector<2x32xf32> to vector<2x32xbf16>
    %c0_6 = arith.constant 0 : index
    %c0_7 = arith.constant 0 : index
    %10 = vector.load %arg4[%c0_6, %c0_7] : memref<32x6xbf16, #tpu.memory_space<vmem>>, vector<32x6xbf16>
    %cst_8 = arith.constant dense<0.000000e+00> : vector<2x6xf32>
    %11 = tpu.matmul %9, %10, %cst_8 {dimension_numbers = #tpu.dot_dimension_numbers<[1], [0], [0], [1], [0, 0, 1, 1], [], []>} : vector<2x32xbf16>, vector<32x6xbf16>, vector<2x6xf32> -> vector<2x6xf32>
    %c0_9 = arith.constant 0 : index
    %c0_10 = arith.constant 0 : index
    %12 = vector.load %arg5[%c0_9, %c0_10] : memref<1x6xf32, #tpu.memory_space<vmem>>, vector<1x6xf32>
    %13 = vector.broadcast %12 : vector<1x6xf32> to vector<2x6xf32>
    %14 = arith.addf %11, %13 : vector<2x6xf32>
    %c0_11 = arith.constant 0 : index
    %c0_12 = arith.constant 0 : index
    %15 = vector.load %arg6[%c0_11, %c0_12] : memref<2x6xf32, #tpu.memory_space<vmem>>, vector<2x6xf32>
    tpu.vector_store %arg6[%c0_11, %c0_12], %14 {strides = array<i32>} : memref<2x6xf32, #tpu.memory_space<vmem>>, vector<2x6xf32>,
    return
  }
  func.func @transform_0(%arg0: i32) -> (i32, i32) {
    %c0_i32 = arith.constant 0 : i32
    %c0_i32_0 = arith.constant 0 : i32
    %c0_i32_1 = arith.constant 0 : i32
    return %c0_i32, %c0_i32_0 : i32, i32
  }
  func.func @transform_1(%arg0: i32) -> (i32, i32) {
    %c0_i32 = arith.constant 0 : i32
    %c0_i32_0 = arith.constant 0 : i32
    %c0_i32_1 = arith.constant 0 : i32
    return %c0_i32, %c0_i32_0 : i32, i32
  }
  func.func @transform_2(%arg0: i32) -> (i32, i32) {
    %c0_i32 = arith.constant 0 : i32
    %c0_i32_0 = arith.constant 0 : i32
    %c0_i32_1 = arith.constant 0 : i32
    return %c0_i32, %c0_i32_0 : i32, i32
  }
  func.func @transform_3(%arg0: i32) -> (i32, i32) {
    %c0_i32 = arith.constant 0 : i32
    %c0_i32_0 = arith.constant 0 : i32
    %c0_i32_1 = arith.constant 0 : i32
    return %c0_i32, %c0_i32_0 : i32, i32
  }
  func.func @transform_4(%arg0: i32) -> (i32, i32) {
    %c0_i32 = arith.constant 0 : i32
    %c0_i32_0 = arith.constant 0 : i32
    %c0_i32_1 = arith.constant 0 : i32
    return %c0_i32, %c0_i32_0 : i32, i32
  }
  func.func @transform_5(%arg0: i32) -> (i32, i32) {
    %c0_i32 = arith.constant 0 : i32
    %c0_i32_0 = arith.constant 0 : i32
    %c0_i32_1 = arith.constant 0 : i32
    return %c0_i32, %c0_i32_0 : i32, i32
  }
}

module attributes {stable_mosaic.version = 11 : i64} {
  func.func @_matmul_kernel(%arg0: i32, %arg1: memref<128x128xf32, #tpu.memory_space<vmem>>, %arg2: memref<128x32xbf16, #tpu.memory_space<vmem>>, %arg3: memref<1x32xf32, #tpu.memory_space<vmem>>, %arg4: memref<128x32xf32, #tpu.memory_space<vmem>>) attributes {dimension_semantics = [#tpu.dimension_semantics<parallel>], iteration_bounds = array<i64: 2>, scalar_prefetch = 0 : i64, scratch_operands = 0 : i64, tpu.core_type = #tpu.core_type<tc>, window_params = [{transform_indices = @transform_0, window_bounds = array<i64: 128, 128>}, {pipeline_mode = #tpu.pipeline_mode<synchronous>, transform_indices = @transform_1, window_bounds = array<i64: 128, 32>}, {pipeline_mode = #tpu.pipeline_mode<synchronous>, transform_indices = @transform_2, window_bounds = array<i64: 1, 32>}, {transform_indices = @transform_3, window_bounds = array<i64: 128, 32>}]} {
    %c0 = arith.constant 0 : index
    %c0_0 = arith.constant 0 : index
    %0 = vector.load %arg1[%c0, %c0_0] : memref<128x128xf32, #tpu.memory_space<vmem>>, vector<128x128xf32>
    %1 = arith.truncf %0 : vector<128x128xf32> to vector<128x128xbf16>
    %c0_1 = arith.constant 0 : index
    %c0_2 = arith.constant 0 : index
    %2 = vector.load %arg2[%c0_1, %c0_2] : memref<128x32xbf16, #tpu.memory_space<vmem>>, vector<128x32xbf16>
    %cst = arith.constant dense<0.000000e+00> : vector<128x32xf32>
    %3 = tpu.matmul %1, %2, %cst {dimension_numbers = #tpu.dot_dimension_numbers<[1], [0], [0], [1], [0, 0, 1, 1], [], []>} : vector<128x128xbf16>, vector<128x32xbf16>, vector<128x32xf32> -> vector<128x32xf32>
    %c0_3 = arith.constant 0 : index
    %c0_4 = arith.constant 0 : index
    %4 = vector.load %arg3[%c0_3, %c0_4] : memref<1x32xf32, #tpu.memory_space<vmem>>, vector<1x32xf32>
    %5 = vector.broadcast %4 : vector<1x32xf32> to vector<128x32xf32>
    %6 = arith.addf %3, %5 : vector<128x32xf32>
    %7 = arith.mulf %6, %6 : vector<128x32xf32>
    %8 = arith.mulf %6, %7 : vector<128x32xf32>
    %cst_5 = arith.constant 4.471500e-02 : f32
    %9 = vector.broadcast %cst_5 : f32 to vector<128x32xf32>
    %10 = arith.mulf %9, %8 : vector<128x32xf32>
    %11 = arith.addf %6, %10 : vector<128x32xf32>
    %cst_6 = arith.constant 0.797884583 : f32
    %12 = vector.broadcast %cst_6 : f32 to vector<128x32xf32>
    %13 = arith.mulf %12, %11 : vector<128x32xf32>
    %14 = math.tanh %13 : vector<128x32xf32>
    %cst_7 = arith.constant 1.000000e+00 : f32
    %15 = vector.broadcast %cst_7 : f32 to vector<128x32xf32>
    %16 = arith.addf %15, %14 : vector<128x32xf32>
    %cst_8 = arith.constant 5.000000e-01 : f32
    %17 = vector.broadcast %cst_8 : f32 to vector<128x32xf32>
    %18 = arith.mulf %17, %16 : vector<128x32xf32>
    %19 = arith.mulf %6, %18 : vector<128x32xf32>
    %c0_9 = arith.constant 0 : index
    %c0_10 = arith.constant 0 : index
    %20 = vector.load %arg4[%c0_9, %c0_10] : memref<128x32xf32, #tpu.memory_space<vmem>>, vector<128x32xf32>
    tpu.vector_store %arg4[%c0_9, %c0_10], %19 {strides = array<i32>} : memref<128x32xf32, #tpu.memory_space<vmem>>, vector<128x32xf32>,
    return
  }
  func.func @transform_0(%arg0: i32) -> (i32, i32) {
    %c0_i32 = arith.constant 0 : i32
    %c0_i32_0 = arith.constant 0 : i32
    return %arg0, %c0_i32 : i32, i32
  }
  func.func @transform_1(%arg0: i32) -> (i32, i32) {
    %c0_i32 = arith.constant 0 : i32
    %c0_i32_0 = arith.constant 0 : i32
    %c0_i32_1 = arith.constant 0 : i32
    return %c0_i32, %c0_i32_0 : i32, i32
  }
  func.func @transform_2(%arg0: i32) -> (i32, i32) {
    %c0_i32 = arith.constant 0 : i32
    %c0_i32_0 = arith.constant 0 : i32
    %c0_i32_1 = arith.constant 0 : i32
    return %c0_i32, %c0_i32_0 : i32, i32
  }
  func.func @transform_3(%arg0: i32) -> (i32, i32) {
    %c0_i32 = arith.constant 0 : i32
    %c0_i32_0 = arith.constant 0 : i32
    return %arg0, %c0_i32 : i32, i32
  }
}

module attributes {stable_mosaic.version = 11 : i64} {
  func.func @_enc_dec_kernel(%arg0: i32, %arg1: memref<1x32x384xf32, #tpu.memory_space<vmem>>, %arg2: memref<384x64xbf16, #tpu.memory_space<vmem>>, %arg3: memref<1x64xf32, #tpu.memory_space<vmem>>, %arg4: memref<1x32x64xf32, #tpu.memory_space<vmem>>, %arg5: memref<2x1x64xf32, #tpu.memory_space<vmem>>, %arg6: memref<2x1x64xf32, #tpu.memory_space<vmem>>, %arg7: memref<2x64x192xbf16, #tpu.memory_space<vmem>>, %arg8: memref<2x1x192xf32, #tpu.memory_space<vmem>>, %arg9: memref<2x64x64xbf16, #tpu.memory_space<vmem>>, %arg10: memref<2x1x64xf32, #tpu.memory_space<vmem>>, %arg11: memref<2x1x64xf32, #tpu.memory_space<vmem>>, %arg12: memref<2x1x64xf32, #tpu.memory_space<vmem>>, %arg13: memref<2x64x128xbf16, #tpu.memory_space<vmem>>, %arg14: memref<2x1x128xf32, #tpu.memory_space<vmem>>, %arg15: memref<2x128x64xbf16, #tpu.memory_space<vmem>>, %arg16: memref<2x1x64xf32, #tpu.memory_space<vmem>>, %arg17: memref<1x64xf32, #tpu.memory_space<vmem>>, %arg18: memref<1x64xf32, #tpu.memory_space<vmem>>, %arg19: memref<64x192xbf16, #tpu.memory_space<vmem>>, %arg20: memref<1x192xf32, #tpu.memory_space<vmem>>, %arg21: memref<192x40xbf16, #tpu.memory_space<vmem>>, %arg22: memref<1x40xf32, #tpu.memory_space<vmem>>, %arg23: memref<1x8x40xf32, #tpu.memory_space<vmem>>) attributes {dimension_semantics = [#tpu.dimension_semantics<parallel>], iteration_bounds = array<i64: 2>, scalar_prefetch = 0 : i64, scratch_operands = 0 : i64, tpu.core_type = #tpu.core_type<tc>, window_params = [{transform_indices = @transform_0, window_bounds = array<i64: 1, 32, 384>}, {pipeline_mode = #tpu.pipeline_mode<synchronous>, transform_indices = @transform_1, window_bounds = array<i64: 384, 64>}, {pipeline_mode = #tpu.pipeline_mode<synchronous>, transform_indices = @transform_2, window_bounds = array<i64: 1, 64>}, {pipeline_mode = #tpu.pipeline_mode<synchronous>, transform_indices = @transform_3, window_bounds = array<i64: 1, 32, 64>}, {pipeline_mode = #tpu.pipeline_mode<synchronous>, transform_indices = @transform_4, window_bounds = array<i64: 2, 1, 64>}, {pipeline_mode = #tpu.pipeline_mode<synchronous>, transform_indices = @transform_5, window_bounds = array<i64: 2, 1, 64>}, {pipeline_mode = #tpu.pipeline_mode<synchronous>, transform_indices = @transform_6, window_bounds = array<i64: 2, 64, 192>}, {pipeline_mode = #tpu.pipeline_mode<synchronous>, transform_indices = @transform_7, window_bounds = array<i64: 2, 1, 192>}, {pipeline_mode = #tpu.pipeline_mode<synchronous>, transform_indices = @transform_8, window_bounds = array<i64: 2, 64, 64>}, {pipeline_mode = #tpu.pipeline_mode<synchronous>, transform_indices = @transform_9, window_bounds = array<i64: 2, 1, 64>}, {pipeline_mode = #tpu.pipeline_mode<synchronous>, transform_indices = @transform_10, window_bounds = array<i64: 2, 1, 64>}, {pipeline_mode = #tpu.pipeline_mode<synchronous>, transform_indices = @transform_11, window_bounds = array<i64: 2, 1, 64>}, {pipeline_mode = #tpu.pipeline_mode<synchronous>, transform_indices = @transform_12, window_bounds = array<i64: 2, 64, 128>}, {pipeline_mode = #tpu.pipeline_mode<synchronous>, transform_indices = @transform_13, window_bounds = array<i64: 2, 1, 128>}, {pipeline_mode = #tpu.pipeline_mode<synchronous>, transform_indices = @transform_14, window_bounds = array<i64: 2, 128, 64>}, {pipeline_mode = #tpu.pipeline_mode<synchronous>, transform_indices = @transform_15, window_bounds = array<i64: 2, 1, 64>}, {pipeline_mode = #tpu.pipeline_mode<synchronous>, transform_indices = @transform_16, window_bounds = array<i64: 1, 64>}, {pipeline_mode = #tpu.pipeline_mode<synchronous>, transform_indices = @transform_17, window_bounds = array<i64: 1, 64>}, {pipeline_mode = #tpu.pipeline_mode<synchronous>, transform_indices = @transform_18, window_bounds = array<i64: 64, 192>}, {pipeline_mode = #tpu.pipeline_mode<synchronous>, transform_indices = @transform_19, window_bounds = array<i64: 1, 192>}, {pipeline_mode = #tpu.pipeline_mode<synchronous>, transform_indices = @transform_20, window_bounds = array<i64: 192, 40>}, {pipeline_mode = #tpu.pipeline_mode<synchronous>, transform_indices = @transform_21, window_bounds = array<i64: 1, 40>}, {transform_indices = @transform_22, window_bounds = array<i64: 1, 8, 40>}]} {
    %c0 = arith.constant 0 : index
    %c0_0 = arith.constant 0 : index
    %c0_1 = arith.constant 0 : index
    %0 = vector.load %arg1[%c0, %c0_0, %c0_1] : memref<1x32x384xf32, #tpu.memory_space<vmem>>, vector<1x32x384xf32>
    %1 = vector.shape_cast %0 : vector<1x32x384xf32> to vector<32x384xf32>
    %2 = arith.truncf %1 : vector<32x384xf32> to vector<32x384xbf16>
    %c0_2 = arith.constant 0 : index
    %c0_3 = arith.constant 0 : index
    %3 = vector.load %arg2[%c0_2, %c0_3] : memref<384x64xbf16, #tpu.memory_space<vmem>>, vector<384x64xbf16>
    %cst = arith.constant dense<0.000000e+00> : vector<32x64xf32>
    %4 = tpu.matmul %2, %3, %cst {dimension_numbers = #tpu.dot_dimension_numbers<[1], [0], [0], [1], [0, 0, 1, 1], [], []>} : vector<32x384xbf16>, vector<384x64xbf16>, vector<32x64xf32> -> vector<32x64xf32>
    %c0_4 = arith.constant 0 : index
    %c0_5 = arith.constant 0 : index
    %5 = vector.load %arg3[%c0_4, %c0_5] : memref<1x64xf32, #tpu.memory_space<vmem>>, vector<1x64xf32>
    %6 = vector.broadcast %5 : vector<1x64xf32> to vector<32x64xf32>
    %7 = arith.addf %4, %6 : vector<32x64xf32>
    %c0_6 = arith.constant 0 : index
    %c0_7 = arith.constant 0 : index
    %c0_8 = arith.constant 0 : index
    %8 = vector.load %arg4[%c0_6, %c0_7, %c0_8] : memref<1x32x64xf32, #tpu.memory_space<vmem>>, vector<1x32x64xf32>
    %9 = vector.shape_cast %8 : vector<1x32x64xf32> to vector<32x64xf32>
    %10 = arith.addf %7, %9 : vector<32x64xf32>
    %c0_9 = arith.constant 0 : index
    %c0_10 = arith.constant 0 : index
    %c0_11 = arith.constant 0 : index
    %11 = vector.load %arg5[%c0_9, %c0_10, %c0_11] : memref<2x1x64xf32, #tpu.memory_space<vmem>>, vector<1x1x64xf32>
    %12 = vector.shape_cast %11 : vector<1x1x64xf32> to vector<1x64xf32>
    %c0_12 = arith.constant 0 : index
    %c0_13 = arith.constant 0 : index
    %c0_14 = arith.constant 0 : index
    %13 = vector.load %arg6[%c0_12, %c0_13, %c0_14] : memref<2x1x64xf32, #tpu.memory_space<vmem>>, vector<1x1x64xf32>
    %14 = vector.shape_cast %13 : vector<1x1x64xf32> to vector<1x64xf32>
    %cst_15 = arith.constant dense<0.000000e+00> : vector<32xf32>
    %15 = vector.multi_reduction <add>, %10, %cst_15 [1] : vector<32x64xf32> to vector<32xf32>
    %16 = vector.shape_cast %15 : vector<32xf32> to vector<32x1xf32>
    %cst_16 = arith.constant 6.400000e+01 : f32
    %17 = vector.broadcast %cst_16 : f32 to vector<32x1xf32>
    %18 = arith.divf %16, %17 : vector<32x1xf32>
    %19 = vector.broadcast %18 : vector<32x1xf32> to vector<32x64xf32>
    %20 = arith.subf %10, %19 : vector<32x64xf32>
    %21 = arith.mulf %20, %20 : vector<32x64xf32>
    %cst_17 = arith.constant dense<0.000000e+00> : vector<32xf32>
    %22 = vector.multi_reduction <add>, %21, %cst_17 [1] : vector<32x64xf32> to vector<32xf32>
    %23 = vector.shape_cast %22 : vector<32xf32> to vector<32x1xf32>
    %cst_18 = arith.constant 6.400000e+01 : f32
    %24 = vector.broadcast %cst_18 : f32 to vector<32x1xf32>
    %25 = arith.divf %23, %24 : vector<32x1xf32>
    %26 = vector.broadcast %18 : vector<32x1xf32> to vector<32x64xf32>
    %27 = arith.subf %10, %26 : vector<32x64xf32>
    %cst_19 = arith.constant 9.99999974E-6 : f32
    %28 = vector.broadcast %cst_19 : f32 to vector<32x1xf32>
    %29 = arith.addf %25, %28 : vector<32x1xf32>
    %30 = math.rsqrt %29 : vector<32x1xf32>
    %31 = vector.broadcast %30 : vector<32x1xf32> to vector<32x64xf32>
    %32 = arith.mulf %27, %31 : vector<32x64xf32>
    %33 = vector.broadcast %12 : vector<1x64xf32> to vector<32x64xf32>
    %34 = arith.mulf %32, %33 : vector<32x64xf32>
    %35 = vector.broadcast %14 : vector<1x64xf32> to vector<32x64xf32>
    %36 = arith.addf %34, %35 : vector<32x64xf32>
    %37 = arith.truncf %36 : vector<32x64xf32> to vector<32x64xbf16>
    %c0_20 = arith.constant 0 : index
    %c0_21 = arith.constant 0 : index
    %c0_22 = arith.constant 0 : index
    %38 = vector.load %arg7[%c0_20, %c0_21, %c0_22] : memref<2x64x192xbf16, #tpu.memory_space<vmem>>, vector<1x64x192xbf16>
    %39 = vector.shape_cast %38 : vector<1x64x192xbf16> to vector<64x192xbf16>
    %cst_23 = arith.constant dense<0.000000e+00> : vector<32x192xf32>
    %40 = tpu.matmul %37, %39, %cst_23 {dimension_numbers = #tpu.dot_dimension_numbers<[1], [0], [0], [1], [0, 0, 1, 1], [], []>} : vector<32x64xbf16>, vector<64x192xbf16>, vector<32x192xf32> -> vector<32x192xf32>
    %c0_24 = arith.constant 0 : index
    %c0_25 = arith.constant 0 : index
    %c0_26 = arith.constant 0 : index
    %41 = vector.load %arg8[%c0_24, %c0_25, %c0_26] : memref<2x1x192xf32, #tpu.memory_space<vmem>>, vector<1x1x192xf32>
    %42 = vector.shape_cast %41 : vector<1x1x192xf32> to vector<1x192xf32>
    %43 = vector.broadcast %42 : vector<1x192xf32> to vector<32x192xf32>
    %44 = arith.addf %40, %43 : vector<32x192xf32>
    %45 = vector.extract_strided_slice %44 {offsets = [0, 0], sizes = [32, 16], strides = [1, 1]} : vector<32x192xf32> to vector<32x16xf32>
    %46 = vector.extract_strided_slice %44 {offsets = [0, 64], sizes = [32, 16], strides = [1, 1]} : vector<32x192xf32> to vector<32x16xf32>
    %47 = vector.extract_strided_slice %44 {offsets = [0, 128], sizes = [32, 16], strides = [1, 1]} : vector<32x192xf32> to vector<32x16xf32>
    %cst_27 = arith.constant dense<0.000000e+00> : vector<32x32xf32>
    %48 = tpu.matmul %45, %46, %cst_27 {dimension_numbers = #tpu.dot_dimension_numbers<[1], [1], [0], [0], [0, 0, 1, 0], [], []>} : vector<32x16xf32>, vector<32x16xf32>, vector<32x32xf32> -> vector<32x32xf32>
    %cst_28 = arith.constant 2.500000e-01 : f32
    %49 = vector.broadcast %cst_28 : f32 to vector<32x32xf32>
    %50 = arith.mulf %48, %49 : vector<32x32xf32>
    %cst_29 = arith.constant dense<0xFF800000> : vector<32xf32>
    %51 = vector.multi_reduction <maximumf>, %50, %cst_29 [1] : vector<32x32xf32> to vector<32xf32>
    %52 = vector.shape_cast %51 : vector<32xf32> to vector<32x1xf32>
    %53 = vector.broadcast %52 : vector<32x1xf32> to vector<32x32xf32>
    %54 = arith.subf %50, %53 : vector<32x32xf32>
    %55 = math.exp %54 : vector<32x32xf32>
    %cst_30 = arith.constant dense<0.000000e+00> : vector<32xf32>
    %56 = vector.multi_reduction <add>, %55, %cst_30 [1] : vector<32x32xf32> to vector<32xf32>
    %57 = vector.shape_cast %56 : vector<32xf32> to vector<32x1xf32>
    %58 = tpu.reciprocal %57 {approx = true} : vector<32x1xf32> -> vector<32x1xf32>
    %59 = vector.broadcast %58 : vector<32x1xf32> to vector<32x32xf32>
    %60 = arith.mulf %55, %59 : vector<32x32xf32>
    %cst_31 = arith.constant dense<0.000000e+00> : vector<32x16xf32>
    %61 = tpu.matmul %60, %47, %cst_31 {dimension_numbers = #tpu.dot_dimension_numbers<[1], [0], [0], [1], [0, 0, 1, 1], [], []>} : vector<32x32xf32>, vector<32x16xf32>, vector<32x16xf32> -> vector<32x16xf32>
    %62 = vector.extract_strided_slice %44 {offsets = [0, 16], sizes = [32, 16], strides = [1, 1]} : vector<32x192xf32> to vector<32x16xf32>
    %63 = vector.extract_strided_slice %44 {offsets = [0, 80], sizes = [32, 16], strides = [1, 1]} : vector<32x192xf32> to vector<32x16xf32>
    %64 = vector.extract_strided_slice %44 {offsets = [0, 144], sizes = [32, 16], strides = [1, 1]} : vector<32x192xf32> to vector<32x16xf32>
    %cst_32 = arith.constant dense<0.000000e+00> : vector<32x32xf32>
    %65 = tpu.matmul %62, %63, %cst_32 {dimension_numbers = #tpu.dot_dimension_numbers<[1], [1], [0], [0], [0, 0, 1, 0], [], []>} : vector<32x16xf32>, vector<32x16xf32>, vector<32x32xf32> -> vector<32x32xf32>
    %cst_33 = arith.constant 2.500000e-01 : f32
    %66 = vector.broadcast %cst_33 : f32 to vector<32x32xf32>
    %67 = arith.mulf %65, %66 : vector<32x32xf32>
    %cst_34 = arith.constant dense<0xFF800000> : vector<32xf32>
    %68 = vector.multi_reduction <maximumf>, %67, %cst_34 [1] : vector<32x32xf32> to vector<32xf32>
    %69 = vector.shape_cast %68 : vector<32xf32> to vector<32x1xf32>
    %70 = vector.broadcast %69 : vector<32x1xf32> to vector<32x32xf32>
    %71 = arith.subf %67, %70 : vector<32x32xf32>
    %72 = math.exp %71 : vector<32x32xf32>
    %cst_35 = arith.constant dense<0.000000e+00> : vector<32xf32>
    %73 = vector.multi_reduction <add>, %72, %cst_35 [1] : vector<32x32xf32> to vector<32xf32>
    %74 = vector.shape_cast %73 : vector<32xf32> to vector<32x1xf32>
    %75 = tpu.reciprocal %74 {approx = true} : vector<32x1xf32> -> vector<32x1xf32>
    %76 = vector.broadcast %75 : vector<32x1xf32> to vector<32x32xf32>
    %77 = arith.mulf %72, %76 : vector<32x32xf32>
    %cst_36 = arith.constant dense<0.000000e+00> : vector<32x16xf32>
    %78 = tpu.matmul %77, %64, %cst_36 {dimension_numbers = #tpu.dot_dimension_numbers<[1], [0], [0], [1], [0, 0, 1, 1], [], []>} : vector<32x32xf32>, vector<32x16xf32>, vector<32x16xf32> -> vector<32x16xf32>
    %79 = vector.extract_strided_slice %44 {offsets = [0, 32], sizes = [32, 16], strides = [1, 1]} : vector<32x192xf32> to vector<32x16xf32>
    %80 = vector.extract_strided_slice %44 {offsets = [0, 96], sizes = [32, 16], strides = [1, 1]} : vector<32x192xf32> to vector<32x16xf32>
    %81 = vector.extract_strided_slice %44 {offsets = [0, 160], sizes = [32, 16], strides = [1, 1]} : vector<32x192xf32> to vector<32x16xf32>
    %cst_37 = arith.constant dense<0.000000e+00> : vector<32x32xf32>
    %82 = tpu.matmul %79, %80, %cst_37 {dimension_numbers = #tpu.dot_dimension_numbers<[1], [1], [0], [0], [0, 0, 1, 0], [], []>} : vector<32x16xf32>, vector<32x16xf32>, vector<32x32xf32> -> vector<32x32xf32>
    %cst_38 = arith.constant 2.500000e-01 : f32
    %83 = vector.broadcast %cst_38 : f32 to vector<32x32xf32>
    %84 = arith.mulf %82, %83 : vector<32x32xf32>
    %cst_39 = arith.constant dense<0xFF800000> : vector<32xf32>
    %85 = vector.multi_reduction <maximumf>, %84, %cst_39 [1] : vector<32x32xf32> to vector<32xf32>
    %86 = vector.shape_cast %85 : vector<32xf32> to vector<32x1xf32>
    %87 = vector.broadcast %86 : vector<32x1xf32> to vector<32x32xf32>
    %88 = arith.subf %84, %87 : vector<32x32xf32>
    %89 = math.exp %88 : vector<32x32xf32>
    %cst_40 = arith.constant dense<0.000000e+00> : vector<32xf32>
    %90 = vector.multi_reduction <add>, %89, %cst_40 [1] : vector<32x32xf32> to vector<32xf32>
    %91 = vector.shape_cast %90 : vector<32xf32> to vector<32x1xf32>
    %92 = tpu.reciprocal %91 {approx = true} : vector<32x1xf32> -> vector<32x1xf32>
    %93 = vector.broadcast %92 : vector<32x1xf32> to vector<32x32xf32>
    %94 = arith.mulf %89, %93 : vector<32x32xf32>
    %cst_41 = arith.constant dense<0.000000e+00> : vector<32x16xf32>
    %95 = tpu.matmul %94, %81, %cst_41 {dimension_numbers = #tpu.dot_dimension_numbers<[1], [0], [0], [1], [0, 0, 1, 1], [], []>} : vector<32x32xf32>, vector<32x16xf32>, vector<32x16xf32> -> vector<32x16xf32>
    %96 = vector.extract_strided_slice %44 {offsets = [0, 48], sizes = [32, 16], strides = [1, 1]} : vector<32x192xf32> to vector<32x16xf32>
    %97 = vector.extract_strided_slice %44 {offsets = [0, 112], sizes = [32, 16], strides = [1, 1]} : vector<32x192xf32> to vector<32x16xf32>
    %98 = vector.extract_strided_slice %44 {offsets = [0, 176], sizes = [32, 16], strides = [1, 1]} : vector<32x192xf32> to vector<32x16xf32>
    %cst_42 = arith.constant dense<0.000000e+00> : vector<32x32xf32>
    %99 = tpu.matmul %96, %97, %cst_42 {dimension_numbers = #tpu.dot_dimension_numbers<[1], [1], [0], [0], [0, 0, 1, 0], [], []>} : vector<32x16xf32>, vector<32x16xf32>, vector<32x32xf32> -> vector<32x32xf32>
    %cst_43 = arith.constant 2.500000e-01 : f32
    %100 = vector.broadcast %cst_43 : f32 to vector<32x32xf32>
    %101 = arith.mulf %99, %100 : vector<32x32xf32>
    %cst_44 = arith.constant dense<0xFF800000> : vector<32xf32>
    %102 = vector.multi_reduction <maximumf>, %101, %cst_44 [1] : vector<32x32xf32> to vector<32xf32>
    %103 = vector.shape_cast %102 : vector<32xf32> to vector<32x1xf32>
    %104 = vector.broadcast %103 : vector<32x1xf32> to vector<32x32xf32>
    %105 = arith.subf %101, %104 : vector<32x32xf32>
    %106 = math.exp %105 : vector<32x32xf32>
    %cst_45 = arith.constant dense<0.000000e+00> : vector<32xf32>
    %107 = vector.multi_reduction <add>, %106, %cst_45 [1] : vector<32x32xf32> to vector<32xf32>
    %108 = vector.shape_cast %107 : vector<32xf32> to vector<32x1xf32>
    %109 = tpu.reciprocal %108 {approx = true} : vector<32x1xf32> -> vector<32x1xf32>
    %110 = vector.broadcast %109 : vector<32x1xf32> to vector<32x32xf32>
    %111 = arith.mulf %106, %110 : vector<32x32xf32>
    %cst_46 = arith.constant dense<0.000000e+00> : vector<32x16xf32>
    %112 = tpu.matmul %111, %98, %cst_46 {dimension_numbers = #tpu.dot_dimension_numbers<[1], [0], [0], [1], [0, 0, 1, 1], [], []>} : vector<32x32xf32>, vector<32x16xf32>, vector<32x16xf32> -> vector<32x16xf32>
    %113 = tpu.concatenate %61, %78, %95, %112 in 1 : vector<32x16xf32>, vector<32x16xf32>, vector<32x16xf32>, vector<32x16xf32> -> vector<32x64xf32>
    %114 = arith.truncf %113 : vector<32x64xf32> to vector<32x64xbf16>
    %c0_47 = arith.constant 0 : index
    %c0_48 = arith.constant 0 : index
    %c0_49 = arith.constant 0 : index
    %115 = vector.load %arg9[%c0_47, %c0_48, %c0_49] : memref<2x64x64xbf16, #tpu.memory_space<vmem>>, vector<1x64x64xbf16>
    %116 = vector.shape_cast %115 : vector<1x64x64xbf16> to vector<64x64xbf16>
    %cst_50 = arith.constant dense<0.000000e+00> : vector<32x64xf32>
    %117 = tpu.matmul %114, %116, %cst_50 {dimension_numbers = #tpu.dot_dimension_numbers<[1], [0], [0], [1], [0, 0, 1, 1], [], []>} : vector<32x64xbf16>, vector<64x64xbf16>, vector<32x64xf32> -> vector<32x64xf32>
    %c0_51 = arith.constant 0 : index
    %c0_52 = arith.constant 0 : index
    %c0_53 = arith.constant 0 : index
    %118 = vector.load %arg10[%c0_51, %c0_52, %c0_53] : memref<2x1x64xf32, #tpu.memory_space<vmem>>, vector<1x1x64xf32>
    %119 = vector.shape_cast %118 : vector<1x1x64xf32> to vector<1x64xf32>
    %120 = vector.broadcast %119 : vector<1x64xf32> to vector<32x64xf32>
    %121 = arith.addf %117, %120 : vector<32x64xf32>
    %122 = arith.addf %10, %121 : vector<32x64xf32>
    %c0_54 = arith.constant 0 : index
    %c0_55 = arith.constant 0 : index
    %c0_56 = arith.constant 0 : index
    %123 = vector.load %arg11[%c0_54, %c0_55, %c0_56] : memref<2x1x64xf32, #tpu.memory_space<vmem>>, vector<1x1x64xf32>
    %124 = vector.shape_cast %123 : vector<1x1x64xf32> to vector<1x64xf32>
    %c0_57 = arith.constant 0 : index
    %c0_58 = arith.constant 0 : index
    %c0_59 = arith.constant 0 : index
    %125 = vector.load %arg12[%c0_57, %c0_58, %c0_59] : memref<2x1x64xf32, #tpu.memory_space<vmem>>, vector<1x1x64xf32>
    %126 = vector.shape_cast %125 : vector<1x1x64xf32> to vector<1x64xf32>
    %cst_60 = arith.constant dense<0.000000e+00> : vector<32xf32>
    %127 = vector.multi_reduction <add>, %122, %cst_60 [1] : vector<32x64xf32> to vector<32xf32>
    %128 = vector.shape_cast %127 : vector<32xf32> to vector<32x1xf32>
    %cst_61 = arith.constant 6.400000e+01 : f32
    %129 = vector.broadcast %cst_61 : f32 to vector<32x1xf32>
    %130 = arith.divf %128, %129 : vector<32x1xf32>
    %131 = vector.broadcast %130 : vector<32x1xf32> to vector<32x64xf32>
    %132 = arith.subf %122, %131 : vector<32x64xf32>
    %133 = arith.mulf %132, %132 : vector<32x64xf32>
    %cst_62 = arith.constant dense<0.000000e+00> : vector<32xf32>
    %134 = vector.multi_reduction <add>, %133, %cst_62 [1] : vector<32x64xf32> to vector<32xf32>
    %135 = vector.shape_cast %134 : vector<32xf32> to vector<32x1xf32>
    %cst_63 = arith.constant 6.400000e+01 : f32
    %136 = vector.broadcast %cst_63 : f32 to vector<32x1xf32>
    %137 = arith.divf %135, %136 : vector<32x1xf32>
    %138 = vector.broadcast %130 : vector<32x1xf32> to vector<32x64xf32>
    %139 = arith.subf %122, %138 : vector<32x64xf32>
    %cst_64 = arith.constant 9.99999974E-6 : f32
    %140 = vector.broadcast %cst_64 : f32 to vector<32x1xf32>
    %141 = arith.addf %137, %140 : vector<32x1xf32>
    %142 = math.rsqrt %141 : vector<32x1xf32>
    %143 = vector.broadcast %142 : vector<32x1xf32> to vector<32x64xf32>
    %144 = arith.mulf %139, %143 : vector<32x64xf32>
    %145 = vector.broadcast %124 : vector<1x64xf32> to vector<32x64xf32>
    %146 = arith.mulf %144, %145 : vector<32x64xf32>
    %147 = vector.broadcast %126 : vector<1x64xf32> to vector<32x64xf32>
    %148 = arith.addf %146, %147 : vector<32x64xf32>
    %149 = arith.truncf %148 : vector<32x64xf32> to vector<32x64xbf16>
    %c0_65 = arith.constant 0 : index
    %c0_66 = arith.constant 0 : index
    %c0_67 = arith.constant 0 : index
    %150 = vector.load %arg13[%c0_65, %c0_66, %c0_67] : memref<2x64x128xbf16, #tpu.memory_space<vmem>>, vector<1x64x128xbf16>
    %151 = vector.shape_cast %150 : vector<1x64x128xbf16> to vector<64x128xbf16>
    %cst_68 = arith.constant dense<0.000000e+00> : vector<32x128xf32>
    %152 = tpu.matmul %149, %151, %cst_68 {dimension_numbers = #tpu.dot_dimension_numbers<[1], [0], [0], [1], [0, 0, 1, 1], [], []>} : vector<32x64xbf16>, vector<64x128xbf16>, vector<32x128xf32> -> vector<32x128xf32>
    %c0_69 = arith.constant 0 : index
    %c0_70 = arith.constant 0 : index
    %c0_71 = arith.constant 0 : index
    %153 = vector.load %arg14[%c0_69, %c0_70, %c0_71] : memref<2x1x128xf32, #tpu.memory_space<vmem>>, vector<1x1x128xf32>
    %154 = vector.shape_cast %153 : vector<1x1x128xf32> to vector<1x128xf32>
    %155 = vector.broadcast %154 : vector<1x128xf32> to vector<32x128xf32>
    %156 = arith.addf %152, %155 : vector<32x128xf32>
    %157 = arith.mulf %156, %156 : vector<32x128xf32>
    %158 = arith.mulf %156, %157 : vector<32x128xf32>
    %cst_72 = arith.constant 4.471500e-02 : f32
    %159 = vector.broadcast %cst_72 : f32 to vector<32x128xf32>
    %160 = arith.mulf %159, %158 : vector<32x128xf32>
    %161 = arith.addf %156, %160 : vector<32x128xf32>
    %cst_73 = arith.constant 0.797884583 : f32
    %162 = vector.broadcast %cst_73 : f32 to vector<32x128xf32>
    %163 = arith.mulf %162, %161 : vector<32x128xf32>
    %164 = math.tanh %163 : vector<32x128xf32>
    %cst_74 = arith.constant 1.000000e+00 : f32
    %165 = vector.broadcast %cst_74 : f32 to vector<32x128xf32>
    %166 = arith.addf %165, %164 : vector<32x128xf32>
    %cst_75 = arith.constant 5.000000e-01 : f32
    %167 = vector.broadcast %cst_75 : f32 to vector<32x128xf32>
    %168 = arith.mulf %167, %166 : vector<32x128xf32>
    %169 = arith.mulf %156, %168 : vector<32x128xf32>
    %170 = arith.truncf %169 : vector<32x128xf32> to vector<32x128xbf16>
    %c0_76 = arith.constant 0 : index
    %c0_77 = arith.constant 0 : index
    %c0_78 = arith.constant 0 : index
    %171 = vector.load %arg15[%c0_76, %c0_77, %c0_78] : memref<2x128x64xbf16, #tpu.memory_space<vmem>>, vector<1x128x64xbf16>
    %172 = vector.shape_cast %171 : vector<1x128x64xbf16> to vector<128x64xbf16>
    %cst_79 = arith.constant dense<0.000000e+00> : vector<32x64xf32>
    %173 = tpu.matmul %170, %172, %cst_79 {dimension_numbers = #tpu.dot_dimension_numbers<[1], [0], [0], [1], [0, 0, 1, 1], [], []>} : vector<32x128xbf16>, vector<128x64xbf16>, vector<32x64xf32> -> vector<32x64xf32>
    %c0_80 = arith.constant 0 : index
    %c0_81 = arith.constant 0 : index
    %c0_82 = arith.constant 0 : index
    %174 = vector.load %arg16[%c0_80, %c0_81, %c0_82] : memref<2x1x64xf32, #tpu.memory_space<vmem>>, vector<1x1x64xf32>
    %175 = vector.shape_cast %174 : vector<1x1x64xf32> to vector<1x64xf32>
    %176 = vector.broadcast %175 : vector<1x64xf32> to vector<32x64xf32>
    %177 = arith.addf %173, %176 : vector<32x64xf32>
    %178 = arith.addf %122, %177 : vector<32x64xf32>
    %c1 = arith.constant 1 : index
    %c0_83 = arith.constant 0 : index
    %c0_84 = arith.constant 0 : index
    %179 = vector.load %arg5[%c1, %c0_83, %c0_84] : memref<2x1x64xf32, #tpu.memory_space<vmem>>, vector<1x1x64xf32>
    %180 = vector.shape_cast %179 : vector<1x1x64xf32> to vector<1x64xf32>
    %c1_85 = arith.constant 1 : index
    %c0_86 = arith.constant 0 : index
    %c0_87 = arith.constant 0 : index
    %181 = vector.load %arg6[%c1_85, %c0_86, %c0_87] : memref<2x1x64xf32, #tpu.memory_space<vmem>>, vector<1x1x64xf32>
    %182 = vector.shape_cast %181 : vector<1x1x64xf32> to vector<1x64xf32>
    %cst_88 = arith.constant dense<0.000000e+00> : vector<32xf32>
    %183 = vector.multi_reduction <add>, %178, %cst_88 [1] : vector<32x64xf32> to vector<32xf32>
    %184 = vector.shape_cast %183 : vector<32xf32> to vector<32x1xf32>
    %cst_89 = arith.constant 6.400000e+01 : f32
    %185 = vector.broadcast %cst_89 : f32 to vector<32x1xf32>
    %186 = arith.divf %184, %185 : vector<32x1xf32>
    %187 = vector.broadcast %186 : vector<32x1xf32> to vector<32x64xf32>
    %188 = arith.subf %178, %187 : vector<32x64xf32>
    %189 = arith.mulf %188, %188 : vector<32x64xf32>
    %cst_90 = arith.constant dense<0.000000e+00> : vector<32xf32>
    %190 = vector.multi_reduction <add>, %189, %cst_90 [1] : vector<32x64xf32> to vector<32xf32>
    %191 = vector.shape_cast %190 : vector<32xf32> to vector<32x1xf32>
    %cst_91 = arith.constant 6.400000e+01 : f32
    %192 = vector.broadcast %cst_91 : f32 to vector<32x1xf32>
    %193 = arith.divf %191, %192 : vector<32x1xf32>
    %194 = vector.broadcast %186 : vector<32x1xf32> to vector<32x64xf32>
    %195 = arith.subf %178, %194 : vector<32x64xf32>
    %cst_92 = arith.constant 9.99999974E-6 : f32
    %196 = vector.broadcast %cst_92 : f32 to vector<32x1xf32>
    %197 = arith.addf %193, %196 : vector<32x1xf32>
    %198 = math.rsqrt %197 : vector<32x1xf32>
    %199 = vector.broadcast %198 : vector<32x1xf32> to vector<32x64xf32>
    %200 = arith.mulf %195, %199 : vector<32x64xf32>
    %201 = vector.broadcast %180 : vector<1x64xf32> to vector<32x64xf32>
    %202 = arith.mulf %200, %201 : vector<32x64xf32>
    %203 = vector.broadcast %182 : vector<1x64xf32> to vector<32x64xf32>
    %204 = arith.addf %202, %203 : vector<32x64xf32>
    %205 = arith.truncf %204 : vector<32x64xf32> to vector<32x64xbf16>
    %c1_93 = arith.constant 1 : index
    %c0_94 = arith.constant 0 : index
    %c0_95 = arith.constant 0 : index
    %206 = vector.load %arg7[%c1_93, %c0_94, %c0_95] : memref<2x64x192xbf16, #tpu.memory_space<vmem>>, vector<1x64x192xbf16>
    %207 = vector.shape_cast %206 : vector<1x64x192xbf16> to vector<64x192xbf16>
    %cst_96 = arith.constant dense<0.000000e+00> : vector<32x192xf32>
    %208 = tpu.matmul %205, %207, %cst_96 {dimension_numbers = #tpu.dot_dimension_numbers<[1], [0], [0], [1], [0, 0, 1, 1], [], []>} : vector<32x64xbf16>, vector<64x192xbf16>, vector<32x192xf32> -> vector<32x192xf32>
    %c1_97 = arith.constant 1 : index
    %c0_98 = arith.constant 0 : index
    %c0_99 = arith.constant 0 : index
    %209 = vector.load %arg8[%c1_97, %c0_98, %c0_99] : memref<2x1x192xf32, #tpu.memory_space<vmem>>, vector<1x1x192xf32>
    %210 = vector.shape_cast %209 : vector<1x1x192xf32> to vector<1x192xf32>
    %211 = vector.broadcast %210 : vector<1x192xf32> to vector<32x192xf32>
    %212 = arith.addf %208, %211 : vector<32x192xf32>
    %213 = vector.extract_strided_slice %212 {offsets = [0, 0], sizes = [32, 16], strides = [1, 1]} : vector<32x192xf32> to vector<32x16xf32>
    %214 = vector.extract_strided_slice %212 {offsets = [0, 64], sizes = [32, 16], strides = [1, 1]} : vector<32x192xf32> to vector<32x16xf32>
    %215 = vector.extract_strided_slice %212 {offsets = [0, 128], sizes = [32, 16], strides = [1, 1]} : vector<32x192xf32> to vector<32x16xf32>
    %cst_100 = arith.constant dense<0.000000e+00> : vector<32x32xf32>
    %216 = tpu.matmul %213, %214, %cst_100 {dimension_numbers = #tpu.dot_dimension_numbers<[1], [1], [0], [0], [0, 0, 1, 0], [], []>} : vector<32x16xf32>, vector<32x16xf32>, vector<32x32xf32> -> vector<32x32xf32>
    %cst_101 = arith.constant 2.500000e-01 : f32
    %217 = vector.broadcast %cst_101 : f32 to vector<32x32xf32>
    %218 = arith.mulf %216, %217 : vector<32x32xf32>
    %cst_102 = arith.constant dense<0xFF800000> : vector<32xf32>
    %219 = vector.multi_reduction <maximumf>, %218, %cst_102 [1] : vector<32x32xf32> to vector<32xf32>
    %220 = vector.shape_cast %219 : vector<32xf32> to vector<32x1xf32>
    %221 = vector.broadcast %220 : vector<32x1xf32> to vector<32x32xf32>
    %222 = arith.subf %218, %221 : vector<32x32xf32>
    %223 = math.exp %222 : vector<32x32xf32>
    %cst_103 = arith.constant dense<0.000000e+00> : vector<32xf32>
    %224 = vector.multi_reduction <add>, %223, %cst_103 [1] : vector<32x32xf32> to vector<32xf32>
    %225 = vector.shape_cast %224 : vector<32xf32> to vector<32x1xf32>
    %226 = tpu.reciprocal %225 {approx = true} : vector<32x1xf32> -> vector<32x1xf32>
    %227 = vector.broadcast %226 : vector<32x1xf32> to vector<32x32xf32>
    %228 = arith.mulf %223, %227 : vector<32x32xf32>
    %cst_104 = arith.constant dense<0.000000e+00> : vector<32x16xf32>
    %229 = tpu.matmul %228, %215, %cst_104 {dimension_numbers = #tpu.dot_dimension_numbers<[1], [0], [0], [1], [0, 0, 1, 1], [], []>} : vector<32x32xf32>, vector<32x16xf32>, vector<32x16xf32> -> vector<32x16xf32>
    %230 = vector.extract_strided_slice %212 {offsets = [0, 16], sizes = [32, 16], strides = [1, 1]} : vector<32x192xf32> to vector<32x16xf32>
    %231 = vector.extract_strided_slice %212 {offsets = [0, 80], sizes = [32, 16], strides = [1, 1]} : vector<32x192xf32> to vector<32x16xf32>
    %232 = vector.extract_strided_slice %212 {offsets = [0, 144], sizes = [32, 16], strides = [1, 1]} : vector<32x192xf32> to vector<32x16xf32>
    %cst_105 = arith.constant dense<0.000000e+00> : vector<32x32xf32>
    %233 = tpu.matmul %230, %231, %cst_105 {dimension_numbers = #tpu.dot_dimension_numbers<[1], [1], [0], [0], [0, 0, 1, 0], [], []>} : vector<32x16xf32>, vector<32x16xf32>, vector<32x32xf32> -> vector<32x32xf32>
    %cst_106 = arith.constant 2.500000e-01 : f32
    %234 = vector.broadcast %cst_106 : f32 to vector<32x32xf32>
    %235 = arith.mulf %233, %234 : vector<32x32xf32>
    %cst_107 = arith.constant dense<0xFF800000> : vector<32xf32>
    %236 = vector.multi_reduction <maximumf>, %235, %cst_107 [1] : vector<32x32xf32> to vector<32xf32>
    %237 = vector.shape_cast %236 : vector<32xf32> to vector<32x1xf32>
    %238 = vector.broadcast %237 : vector<32x1xf32> to vector<32x32xf32>
    %239 = arith.subf %235, %238 : vector<32x32xf32>
    %240 = math.exp %239 : vector<32x32xf32>
    %cst_108 = arith.constant dense<0.000000e+00> : vector<32xf32>
    %241 = vector.multi_reduction <add>, %240, %cst_108 [1] : vector<32x32xf32> to vector<32xf32>
    %242 = vector.shape_cast %241 : vector<32xf32> to vector<32x1xf32>
    %243 = tpu.reciprocal %242 {approx = true} : vector<32x1xf32> -> vector<32x1xf32>
    %244 = vector.broadcast %243 : vector<32x1xf32> to vector<32x32xf32>
    %245 = arith.mulf %240, %244 : vector<32x32xf32>
    %cst_109 = arith.constant dense<0.000000e+00> : vector<32x16xf32>
    %246 = tpu.matmul %245, %232, %cst_109 {dimension_numbers = #tpu.dot_dimension_numbers<[1], [0], [0], [1], [0, 0, 1, 1], [], []>} : vector<32x32xf32>, vector<32x16xf32>, vector<32x16xf32> -> vector<32x16xf32>
    %247 = vector.extract_strided_slice %212 {offsets = [0, 32], sizes = [32, 16], strides = [1, 1]} : vector<32x192xf32> to vector<32x16xf32>
    %248 = vector.extract_strided_slice %212 {offsets = [0, 96], sizes = [32, 16], strides = [1, 1]} : vector<32x192xf32> to vector<32x16xf32>
    %249 = vector.extract_strided_slice %212 {offsets = [0, 160], sizes = [32, 16], strides = [1, 1]} : vector<32x192xf32> to vector<32x16xf32>
    %cst_110 = arith.constant dense<0.000000e+00> : vector<32x32xf32>
    %250 = tpu.matmul %247, %248, %cst_110 {dimension_numbers = #tpu.dot_dimension_numbers<[1], [1], [0], [0], [0, 0, 1, 0], [], []>} : vector<32x16xf32>, vector<32x16xf32>, vector<32x32xf32> -> vector<32x32xf32>
    %cst_111 = arith.constant 2.500000e-01 : f32
    %251 = vector.broadcast %cst_111 : f32 to vector<32x32xf32>
    %252 = arith.mulf %250, %251 : vector<32x32xf32>
    %cst_112 = arith.constant dense<0xFF800000> : vector<32xf32>
    %253 = vector.multi_reduction <maximumf>, %252, %cst_112 [1] : vector<32x32xf32> to vector<32xf32>
    %254 = vector.shape_cast %253 : vector<32xf32> to vector<32x1xf32>
    %255 = vector.broadcast %254 : vector<32x1xf32> to vector<32x32xf32>
    %256 = arith.subf %252, %255 : vector<32x32xf32>
    %257 = math.exp %256 : vector<32x32xf32>
    %cst_113 = arith.constant dense<0.000000e+00> : vector<32xf32>
    %258 = vector.multi_reduction <add>, %257, %cst_113 [1] : vector<32x32xf32> to vector<32xf32>
    %259 = vector.shape_cast %258 : vector<32xf32> to vector<32x1xf32>
    %260 = tpu.reciprocal %259 {approx = true} : vector<32x1xf32> -> vector<32x1xf32>
    %261 = vector.broadcast %260 : vector<32x1xf32> to vector<32x32xf32>
    %262 = arith.mulf %257, %261 : vector<32x32xf32>
    %cst_114 = arith.constant dense<0.000000e+00> : vector<32x16xf32>
    %263 = tpu.matmul %262, %249, %cst_114 {dimension_numbers = #tpu.dot_dimension_numbers<[1], [0], [0], [1], [0, 0, 1, 1], [], []>} : vector<32x32xf32>, vector<32x16xf32>, vector<32x16xf32> -> vector<32x16xf32>
    %264 = vector.extract_strided_slice %212 {offsets = [0, 48], sizes = [32, 16], strides = [1, 1]} : vector<32x192xf32> to vector<32x16xf32>
    %265 = vector.extract_strided_slice %212 {offsets = [0, 112], sizes = [32, 16], strides = [1, 1]} : vector<32x192xf32> to vector<32x16xf32>
    %266 = vector.extract_strided_slice %212 {offsets = [0, 176], sizes = [32, 16], strides = [1, 1]} : vector<32x192xf32> to vector<32x16xf32>
    %cst_115 = arith.constant dense<0.000000e+00> : vector<32x32xf32>
    %267 = tpu.matmul %264, %265, %cst_115 {dimension_numbers = #tpu.dot_dimension_numbers<[1], [1], [0], [0], [0, 0, 1, 0], [], []>} : vector<32x16xf32>, vector<32x16xf32>, vector<32x32xf32> -> vector<32x32xf32>
    %cst_116 = arith.constant 2.500000e-01 : f32
    %268 = vector.broadcast %cst_116 : f32 to vector<32x32xf32>
    %269 = arith.mulf %267, %268 : vector<32x32xf32>
    %cst_117 = arith.constant dense<0xFF800000> : vector<32xf32>
    %270 = vector.multi_reduction <maximumf>, %269, %cst_117 [1] : vector<32x32xf32> to vector<32xf32>
    %271 = vector.shape_cast %270 : vector<32xf32> to vector<32x1xf32>
    %272 = vector.broadcast %271 : vector<32x1xf32> to vector<32x32xf32>
    %273 = arith.subf %269, %272 : vector<32x32xf32>
    %274 = math.exp %273 : vector<32x32xf32>
    %cst_118 = arith.constant dense<0.000000e+00> : vector<32xf32>
    %275 = vector.multi_reduction <add>, %274, %cst_118 [1] : vector<32x32xf32> to vector<32xf32>
    %276 = vector.shape_cast %275 : vector<32xf32> to vector<32x1xf32>
    %277 = tpu.reciprocal %276 {approx = true} : vector<32x1xf32> -> vector<32x1xf32>
    %278 = vector.broadcast %277 : vector<32x1xf32> to vector<32x32xf32>
    %279 = arith.mulf %274, %278 : vector<32x32xf32>
    %cst_119 = arith.constant dense<0.000000e+00> : vector<32x16xf32>
    %280 = tpu.matmul %279, %266, %cst_119 {dimension_numbers = #tpu.dot_dimension_numbers<[1], [0], [0], [1], [0, 0, 1, 1], [], []>} : vector<32x32xf32>, vector<32x16xf32>, vector<32x16xf32> -> vector<32x16xf32>
    %281 = tpu.concatenate %229, %246, %263, %280 in 1 : vector<32x16xf32>, vector<32x16xf32>, vector<32x16xf32>, vector<32x16xf32> -> vector<32x64xf32>
    %282 = arith.truncf %281 : vector<32x64xf32> to vector<32x64xbf16>
    %c1_120 = arith.constant 1 : index
    %c0_121 = arith.constant 0 : index
    %c0_122 = arith.constant 0 : index
    %283 = vector.load %arg9[%c1_120, %c0_121, %c0_122] : memref<2x64x64xbf16, #tpu.memory_space<vmem>>, vector<1x64x64xbf16>
    %284 = vector.shape_cast %283 : vector<1x64x64xbf16> to vector<64x64xbf16>
    %cst_123 = arith.constant dense<0.000000e+00> : vector<32x64xf32>
    %285 = tpu.matmul %282, %284, %cst_123 {dimension_numbers = #tpu.dot_dimension_numbers<[1], [0], [0], [1], [0, 0, 1, 1], [], []>} : vector<32x64xbf16>, vector<64x64xbf16>, vector<32x64xf32> -> vector<32x64xf32>
    %c1_124 = arith.constant 1 : index
    %c0_125 = arith.constant 0 : index
    %c0_126 = arith.constant 0 : index
    %286 = vector.load %arg10[%c1_124, %c0_125, %c0_126] : memref<2x1x64xf32, #tpu.memory_space<vmem>>, vector<1x1x64xf32>
    %287 = vector.shape_cast %286 : vector<1x1x64xf32> to vector<1x64xf32>
    %288 = vector.broadcast %287 : vector<1x64xf32> to vector<32x64xf32>
    %289 = arith.addf %285, %288 : vector<32x64xf32>
    %290 = arith.addf %178, %289 : vector<32x64xf32>
    %c1_127 = arith.constant 1 : index
    %c0_128 = arith.constant 0 : index
    %c0_129 = arith.constant 0 : index
    %291 = vector.load %arg11[%c1_127, %c0_128, %c0_129] : memref<2x1x64xf32, #tpu.memory_space<vmem>>, vector<1x1x64xf32>
    %292 = vector.shape_cast %291 : vector<1x1x64xf32> to vector<1x64xf32>
    %c1_130 = arith.constant 1 : index
    %c0_131 = arith.constant 0 : index
    %c0_132 = arith.constant 0 : index
    %293 = vector.load %arg12[%c1_130, %c0_131, %c0_132] : memref<2x1x64xf32, #tpu.memory_space<vmem>>, vector<1x1x64xf32>
    %294 = vector.shape_cast %293 : vector<1x1x64xf32> to vector<1x64xf32>
    %cst_133 = arith.constant dense<0.000000e+00> : vector<32xf32>
    %295 = vector.multi_reduction <add>, %290, %cst_133 [1] : vector<32x64xf32> to vector<32xf32>
    %296 = vector.shape_cast %295 : vector<32xf32> to vector<32x1xf32>
    %cst_134 = arith.constant 6.400000e+01 : f32
    %297 = vector.broadcast %cst_134 : f32 to vector<32x1xf32>
    %298 = arith.divf %296, %297 : vector<32x1xf32>
    %299 = vector.broadcast %298 : vector<32x1xf32> to vector<32x64xf32>
    %300 = arith.subf %290, %299 : vector<32x64xf32>
    %301 = arith.mulf %300, %300 : vector<32x64xf32>
    %cst_135 = arith.constant dense<0.000000e+00> : vector<32xf32>
    %302 = vector.multi_reduction <add>, %301, %cst_135 [1] : vector<32x64xf32> to vector<32xf32>
    %303 = vector.shape_cast %302 : vector<32xf32> to vector<32x1xf32>
    %cst_136 = arith.constant 6.400000e+01 : f32
    %304 = vector.broadcast %cst_136 : f32 to vector<32x1xf32>
    %305 = arith.divf %303, %304 : vector<32x1xf32>
    %306 = vector.broadcast %298 : vector<32x1xf32> to vector<32x64xf32>
    %307 = arith.subf %290, %306 : vector<32x64xf32>
    %cst_137 = arith.constant 9.99999974E-6 : f32
    %308 = vector.broadcast %cst_137 : f32 to vector<32x1xf32>
    %309 = arith.addf %305, %308 : vector<32x1xf32>
    %310 = math.rsqrt %309 : vector<32x1xf32>
    %311 = vector.broadcast %310 : vector<32x1xf32> to vector<32x64xf32>
    %312 = arith.mulf %307, %311 : vector<32x64xf32>
    %313 = vector.broadcast %292 : vector<1x64xf32> to vector<32x64xf32>
    %314 = arith.mulf %312, %313 : vector<32x64xf32>
    %315 = vector.broadcast %294 : vector<1x64xf32> to vector<32x64xf32>
    %316 = arith.addf %314, %315 : vector<32x64xf32>
    %317 = arith.truncf %316 : vector<32x64xf32> to vector<32x64xbf16>
    %c1_138 = arith.constant 1 : index
    %c0_139 = arith.constant 0 : index
    %c0_140 = arith.constant 0 : index
    %318 = vector.load %arg13[%c1_138, %c0_139, %c0_140] : memref<2x64x128xbf16, #tpu.memory_space<vmem>>, vector<1x64x128xbf16>
    %319 = vector.shape_cast %318 : vector<1x64x128xbf16> to vector<64x128xbf16>
    %cst_141 = arith.constant dense<0.000000e+00> : vector<32x128xf32>
    %320 = tpu.matmul %317, %319, %cst_141 {dimension_numbers = #tpu.dot_dimension_numbers<[1], [0], [0], [1], [0, 0, 1, 1], [], []>} : vector<32x64xbf16>, vector<64x128xbf16>, vector<32x128xf32> -> vector<32x128xf32>
    %c1_142 = arith.constant 1 : index
    %c0_143 = arith.constant 0 : index
    %c0_144 = arith.constant 0 : index
    %321 = vector.load %arg14[%c1_142, %c0_143, %c0_144] : memref<2x1x128xf32, #tpu.memory_space<vmem>>, vector<1x1x128xf32>
    %322 = vector.shape_cast %321 : vector<1x1x128xf32> to vector<1x128xf32>
    %323 = vector.broadcast %322 : vector<1x128xf32> to vector<32x128xf32>
    %324 = arith.addf %320, %323 : vector<32x128xf32>
    %325 = arith.mulf %324, %324 : vector<32x128xf32>
    %326 = arith.mulf %324, %325 : vector<32x128xf32>
    %cst_145 = arith.constant 4.471500e-02 : f32
    %327 = vector.broadcast %cst_145 : f32 to vector<32x128xf32>
    %328 = arith.mulf %327, %326 : vector<32x128xf32>
    %329 = arith.addf %324, %328 : vector<32x128xf32>
    %cst_146 = arith.constant 0.797884583 : f32
    %330 = vector.broadcast %cst_146 : f32 to vector<32x128xf32>
    %331 = arith.mulf %330, %329 : vector<32x128xf32>
    %332 = math.tanh %331 : vector<32x128xf32>
    %cst_147 = arith.constant 1.000000e+00 : f32
    %333 = vector.broadcast %cst_147 : f32 to vector<32x128xf32>
    %334 = arith.addf %333, %332 : vector<32x128xf32>
    %cst_148 = arith.constant 5.000000e-01 : f32
    %335 = vector.broadcast %cst_148 : f32 to vector<32x128xf32>
    %336 = arith.mulf %335, %334 : vector<32x128xf32>
    %337 = arith.mulf %324, %336 : vector<32x128xf32>
    %338 = arith.truncf %337 : vector<32x128xf32> to vector<32x128xbf16>
    %c1_149 = arith.constant 1 : index
    %c0_150 = arith.constant 0 : index
    %c0_151 = arith.constant 0 : index
    %339 = vector.load %arg15[%c1_149, %c0_150, %c0_151] : memref<2x128x64xbf16, #tpu.memory_space<vmem>>, vector<1x128x64xbf16>
    %340 = vector.shape_cast %339 : vector<1x128x64xbf16> to vector<128x64xbf16>
    %cst_152 = arith.constant dense<0.000000e+00> : vector<32x64xf32>
    %341 = tpu.matmul %338, %340, %cst_152 {dimension_numbers = #tpu.dot_dimension_numbers<[1], [0], [0], [1], [0, 0, 1, 1], [], []>} : vector<32x128xbf16>, vector<128x64xbf16>, vector<32x64xf32> -> vector<32x64xf32>
    %c1_153 = arith.constant 1 : index
    %c0_154 = arith.constant 0 : index
    %c0_155 = arith.constant 0 : index
    %342 = vector.load %arg16[%c1_153, %c0_154, %c0_155] : memref<2x1x64xf32, #tpu.memory_space<vmem>>, vector<1x1x64xf32>
    %343 = vector.shape_cast %342 : vector<1x1x64xf32> to vector<1x64xf32>
    %344 = vector.broadcast %343 : vector<1x64xf32> to vector<32x64xf32>
    %345 = arith.addf %341, %344 : vector<32x64xf32>
    %346 = arith.addf %290, %345 : vector<32x64xf32>
    %c0_156 = arith.constant 0 : index
    %c0_157 = arith.constant 0 : index
    %347 = vector.load %arg17[%c0_156, %c0_157] : memref<1x64xf32, #tpu.memory_space<vmem>>, vector<1x64xf32>
    %c0_158 = arith.constant 0 : index
    %c0_159 = arith.constant 0 : index
    %348 = vector.load %arg18[%c0_158, %c0_159] : memref<1x64xf32, #tpu.memory_space<vmem>>, vector<1x64xf32>
    %cst_160 = arith.constant dense<0.000000e+00> : vector<32xf32>
    %349 = vector.multi_reduction <add>, %346, %cst_160 [1] : vector<32x64xf32> to vector<32xf32>
    %350 = vector.shape_cast %349 : vector<32xf32> to vector<32x1xf32>
    %cst_161 = arith.constant 6.400000e+01 : f32
    %351 = vector.broadcast %cst_161 : f32 to vector<32x1xf32>
    %352 = arith.divf %350, %351 : vector<32x1xf32>
    %353 = vector.broadcast %352 : vector<32x1xf32> to vector<32x64xf32>
    %354 = arith.subf %346, %353 : vector<32x64xf32>
    %355 = arith.mulf %354, %354 : vector<32x64xf32>
    %cst_162 = arith.constant dense<0.000000e+00> : vector<32xf32>
    %356 = vector.multi_reduction <add>, %355, %cst_162 [1] : vector<32x64xf32> to vector<32xf32>
    %357 = vector.shape_cast %356 : vector<32xf32> to vector<32x1xf32>
    %cst_163 = arith.constant 6.400000e+01 : f32
    %358 = vector.broadcast %cst_163 : f32 to vector<32x1xf32>
    %359 = arith.divf %357, %358 : vector<32x1xf32>
    %360 = vector.broadcast %352 : vector<32x1xf32> to vector<32x64xf32>
    %361 = arith.subf %346, %360 : vector<32x64xf32>
    %cst_164 = arith.constant 9.99999974E-6 : f32
    %362 = vector.broadcast %cst_164 : f32 to vector<32x1xf32>
    %363 = arith.addf %359, %362 : vector<32x1xf32>
    %364 = math.rsqrt %363 : vector<32x1xf32>
    %365 = vector.broadcast %364 : vector<32x1xf32> to vector<32x64xf32>
    %366 = arith.mulf %361, %365 : vector<32x64xf32>
    %367 = vector.broadcast %347 : vector<1x64xf32> to vector<32x64xf32>
    %368 = arith.mulf %366, %367 : vector<32x64xf32>
    %369 = vector.broadcast %348 : vector<1x64xf32> to vector<32x64xf32>
    %370 = arith.addf %368, %369 : vector<32x64xf32>
    %371 = vector.extract_strided_slice %370 {offsets = [0, 0], sizes = [8, 64], strides = [1, 1]} : vector<32x64xf32> to vector<8x64xf32>
    %372 = vector.extract_strided_slice %370 {offsets = [8, 0], sizes = [8, 64], strides = [1, 1]} : vector<32x64xf32> to vector<8x64xf32>
    %373 = arith.addf %371, %372 : vector<8x64xf32>
    %374 = vector.extract_strided_slice %370 {offsets = [16, 0], sizes = [8, 64], strides = [1, 1]} : vector<32x64xf32> to vector<8x64xf32>
    %375 = arith.addf %373, %374 : vector<8x64xf32>
    %376 = vector.extract_strided_slice %370 {offsets = [24, 0], sizes = [8, 64], strides = [1, 1]} : vector<32x64xf32> to vector<8x64xf32>
    %377 = arith.addf %375, %376 : vector<8x64xf32>
    %cst_165 = arith.constant 2.500000e-01 : f32
    %378 = vector.broadcast %cst_165 : f32 to vector<8x64xf32>
    %379 = arith.mulf %377, %378 : vector<8x64xf32>
    %380 = arith.truncf %379 : vector<8x64xf32> to vector<8x64xbf16>
    %c0_166 = arith.constant 0 : index
    %c0_167 = arith.constant 0 : index
    %381 = vector.load %arg19[%c0_166, %c0_167] : memref<64x192xbf16, #tpu.memory_space<vmem>>, vector<64x192xbf16>
    %cst_168 = arith.constant dense<0.000000e+00> : vector<8x192xf32>
    %382 = tpu.matmul %380, %381, %cst_168 {dimension_numbers = #tpu.dot_dimension_numbers<[1], [0], [0], [1], [0, 0, 1, 1], [], []>} : vector<8x64xbf16>, vector<64x192xbf16>, vector<8x192xf32> -> vector<8x192xf32>
    %c0_169 = arith.constant 0 : index
    %c0_170 = arith.constant 0 : index
    %383 = vector.load %arg20[%c0_169, %c0_170] : memref<1x192xf32, #tpu.memory_space<vmem>>, vector<1x192xf32>
    %384 = vector.broadcast %383 : vector<1x192xf32> to vector<8x192xf32>
    %385 = arith.addf %382, %384 : vector<8x192xf32>
    %cst_171 = arith.constant 3.000000e+00 : f32
    %386 = vector.broadcast %cst_171 : f32 to vector<8x192xf32>
    %387 = arith.addf %385, %386 : vector<8x192xf32>
    %cst_172 = arith.constant 0.000000e+00 : f32
    %cst_173 = arith.constant 6.000000e+00 : f32
    %388 = vector.broadcast %cst_172 : f32 to vector<8x192xf32>
    %389 = arith.maximumf %388, %387 : vector<8x192xf32>
    %390 = vector.broadcast %cst_173 : f32 to vector<8x192xf32>
    %391 = arith.minimumf %390, %389 : vector<8x192xf32>
    %392 = arith.mulf %385, %391 : vector<8x192xf32>
    %cst_174 = arith.constant 0.166666672 : f32
    %393 = vector.broadcast %cst_174 : f32 to vector<8x192xf32>
    %394 = arith.mulf %392, %393 : vector<8x192xf32>
    %395 = arith.truncf %394 : vector<8x192xf32> to vector<8x192xbf16>
    %c0_175 = arith.constant 0 : index
    %c0_176 = arith.constant 0 : index
    %396 = vector.load %arg21[%c0_175, %c0_176] : memref<192x40xbf16, #tpu.memory_space<vmem>>, vector<192x40xbf16>
    %cst_177 = arith.constant dense<0.000000e+00> : vector<8x40xf32>
    %397 = tpu.matmul %395, %396, %cst_177 {dimension_numbers = #tpu.dot_dimension_numbers<[1], [0], [0], [1], [0, 0, 1, 1], [], []>} : vector<8x192xbf16>, vector<192x40xbf16>, vector<8x40xf32> -> vector<8x40xf32>
    %c0_178 = arith.constant 0 : index
    %c0_179 = arith.constant 0 : index
    %398 = vector.load %arg22[%c0_178, %c0_179] : memref<1x40xf32, #tpu.memory_space<vmem>>, vector<1x40xf32>
    %399 = vector.broadcast %398 : vector<1x40xf32> to vector<8x40xf32>
    %400 = arith.addf %397, %399 : vector<8x40xf32>
    %cst_180 = arith.constant dense<0xFF800000> : vector<8xf32>
    %401 = vector.multi_reduction <maximumf>, %400, %cst_180 [1] : vector<8x40xf32> to vector<8xf32>
    %402 = vector.shape_cast %401 : vector<8xf32> to vector<8x1xf32>
    %403 = vector.broadcast %402 : vector<8x1xf32> to vector<8x40xf32>
    %404 = arith.subf %400, %403 : vector<8x40xf32>
    %405 = math.exp %404 : vector<8x40xf32>
    %cst_181 = arith.constant dense<0.000000e+00> : vector<8xf32>
    %406 = vector.multi_reduction <add>, %405, %cst_181 [1] : vector<8x40xf32> to vector<8xf32>
    %407 = vector.shape_cast %406 : vector<8xf32> to vector<8x1xf32>
    %408 = vector.broadcast %407 : vector<8x1xf32> to vector<8x40xf32>
    %409 = arith.divf %405, %408 : vector<8x40xf32>
    %c0_182 = arith.constant 0 : index
    %c0_183 = arith.constant 0 : index
    %c0_184 = arith.constant 0 : index
    %410 = vector.load %arg23[%c0_182, %c0_183, %c0_184] : memref<1x8x40xf32, #tpu.memory_space<vmem>>, vector<1x8x40xf32>
    %411 = vector.shape_cast %410 : vector<1x8x40xf32> to vector<8x40xf32>
    %412 = vector.shape_cast %409 : vector<8x40xf32> to vector<1x8x40xf32>
    tpu.vector_store %arg23[%c0_182, %c0_183, %c0_184], %412 {strides = array<i32>} : memref<1x8x40xf32, #tpu.memory_space<vmem>>, vector<1x8x40xf32>,
    return
  }
  func.func @transform_0(%arg0: i32) -> (i32, i32, i32) {
    %c0_i32 = arith.constant 0 : i32
    %c0_i32_0 = arith.constant 0 : i32
    %c0_i32_1 = arith.constant 0 : i32
    return %arg0, %c0_i32, %c0_i32_0 : i32, i32, i32
  }
  func.func @transform_1(%arg0: i32) -> (i32, i32) {
    %c0_i32 = arith.constant 0 : i32
    %c0_i32_0 = arith.constant 0 : i32
    %c0_i32_1 = arith.constant 0 : i32
    return %c0_i32, %c0_i32_0 : i32, i32
  }
  func.func @transform_2(%arg0: i32) -> (i32, i32) {
    %c0_i32 = arith.constant 0 : i32
    %c0_i32_0 = arith.constant 0 : i32
    %c0_i32_1 = arith.constant 0 : i32
    return %c0_i32, %c0_i32_0 : i32, i32
  }
  func.func @transform_3(%arg0: i32) -> (i32, i32, i32) {
    %c0_i32 = arith.constant 0 : i32
    %c0_i32_0 = arith.constant 0 : i32
    %c0_i32_1 = arith.constant 0 : i32
    %c0_i32_2 = arith.constant 0 : i32
    return %c0_i32, %c0_i32_0, %c0_i32_1 : i32, i32, i32
  }
  func.func @transform_4(%arg0: i32) -> (i32, i32, i32) {
    %c0_i32 = arith.constant 0 : i32
    %c0_i32_0 = arith.constant 0 : i32
    %c0_i32_1 = arith.constant 0 : i32
    %c0_i32_2 = arith.constant 0 : i32
    return %c0_i32, %c0_i32_0, %c0_i32_1 : i32, i32, i32
  }
  func.func @transform_5(%arg0: i32) -> (i32, i32, i32) {
    %c0_i32 = arith.constant 0 : i32
    %c0_i32_0 = arith.constant 0 : i32
    %c0_i32_1 = arith.constant 0 : i32
    %c0_i32_2 = arith.constant 0 : i32
    return %c0_i32, %c0_i32_0, %c0_i32_1 : i32, i32, i32
  }
  func.func @transform_6(%arg0: i32) -> (i32, i32, i32) {
    %c0_i32 = arith.constant 0 : i32
    %c0_i32_0 = arith.constant 0 : i32
    %c0_i32_1 = arith.constant 0 : i32
    %c0_i32_2 = arith.constant 0 : i32
    return %c0_i32, %c0_i32_0, %c0_i32_1 : i32, i32, i32
  }
  func.func @transform_7(%arg0: i32) -> (i32, i32, i32) {
    %c0_i32 = arith.constant 0 : i32
    %c0_i32_0 = arith.constant 0 : i32
    %c0_i32_1 = arith.constant 0 : i32
    %c0_i32_2 = arith.constant 0 : i32
    return %c0_i32, %c0_i32_0, %c0_i32_1 : i32, i32, i32
  }
  func.func @transform_8(%arg0: i32) -> (i32, i32, i32) {
    %c0_i32 = arith.constant 0 : i32
    %c0_i32_0 = arith.constant 0 : i32
    %c0_i32_1 = arith.constant 0 : i32
    %c0_i32_2 = arith.constant 0 : i32
    return %c0_i32, %c0_i32_0, %c0_i32_1 : i32, i32, i32
  }
  func.func @transform_9(%arg0: i32) -> (i32, i32, i32) {
    %c0_i32 = arith.constant 0 : i32
    %c0_i32_0 = arith.constant 0 : i32
    %c0_i32_1 = arith.constant 0 : i32
    %c0_i32_2 = arith.constant 0 : i32
    return %c0_i32, %c0_i32_0, %c0_i32_1 : i32, i32, i32
  }
  func.func @transform_10(%arg0: i32) -> (i32, i32, i32) {
    %c0_i32 = arith.constant 0 : i32
    %c0_i32_0 = arith.constant 0 : i32
    %c0_i32_1 = arith.constant 0 : i32
    %c0_i32_2 = arith.constant 0 : i32
    return %c0_i32, %c0_i32_0, %c0_i32_1 : i32, i32, i32
  }
  func.func @transform_11(%arg0: i32) -> (i32, i32, i32) {
    %c0_i32 = arith.constant 0 : i32
    %c0_i32_0 = arith.constant 0 : i32
    %c0_i32_1 = arith.constant 0 : i32
    %c0_i32_2 = arith.constant 0 : i32
    return %c0_i32, %c0_i32_0, %c0_i32_1 : i32, i32, i32
  }
  func.func @transform_12(%arg0: i32) -> (i32, i32, i32) {
    %c0_i32 = arith.constant 0 : i32
    %c0_i32_0 = arith.constant 0 : i32
    %c0_i32_1 = arith.constant 0 : i32
    %c0_i32_2 = arith.constant 0 : i32
    return %c0_i32, %c0_i32_0, %c0_i32_1 : i32, i32, i32
  }
  func.func @transform_13(%arg0: i32) -> (i32, i32, i32) {
    %c0_i32 = arith.constant 0 : i32
    %c0_i32_0 = arith.constant 0 : i32
    %c0_i32_1 = arith.constant 0 : i32
    %c0_i32_2 = arith.constant 0 : i32
    return %c0_i32, %c0_i32_0, %c0_i32_1 : i32, i32, i32
  }
  func.func @transform_14(%arg0: i32) -> (i32, i32, i32) {
    %c0_i32 = arith.constant 0 : i32
    %c0_i32_0 = arith.constant 0 : i32
    %c0_i32_1 = arith.constant 0 : i32
    %c0_i32_2 = arith.constant 0 : i32
    return %c0_i32, %c0_i32_0, %c0_i32_1 : i32, i32, i32
  }
  func.func @transform_15(%arg0: i32) -> (i32, i32, i32) {
    %c0_i32 = arith.constant 0 : i32
    %c0_i32_0 = arith.constant 0 : i32
    %c0_i32_1 = arith.constant 0 : i32
    %c0_i32_2 = arith.constant 0 : i32
    return %c0_i32, %c0_i32_0, %c0_i32_1 : i32, i32, i32
  }
  func.func @transform_16(%arg0: i32) -> (i32, i32) {
    %c0_i32 = arith.constant 0 : i32
    %c0_i32_0 = arith.constant 0 : i32
    %c0_i32_1 = arith.constant 0 : i32
    return %c0_i32, %c0_i32_0 : i32, i32
  }
  func.func @transform_17(%arg0: i32) -> (i32, i32) {
    %c0_i32 = arith.constant 0 : i32
    %c0_i32_0 = arith.constant 0 : i32
    %c0_i32_1 = arith.constant 0 : i32
    return %c0_i32, %c0_i32_0 : i32, i32
  }
  func.func @transform_18(%arg0: i32) -> (i32, i32) {
    %c0_i32 = arith.constant 0 : i32
    %c0_i32_0 = arith.constant 0 : i32
    %c0_i32_1 = arith.constant 0 : i32
    return %c0_i32, %c0_i32_0 : i32, i32
  }
  func.func @transform_19(%arg0: i32) -> (i32, i32) {
    %c0_i32 = arith.constant 0 : i32
    %c0_i32_0 = arith.constant 0 : i32
    %c0_i32_1 = arith.constant 0 : i32
    return %c0_i32, %c0_i32_0 : i32, i32
  }
  func.func @transform_20(%arg0: i32) -> (i32, i32) {
    %c0_i32 = arith.constant 0 : i32
    %c0_i32_0 = arith.constant 0 : i32
    %c0_i32_1 = arith.constant 0 : i32
    return %c0_i32, %c0_i32_0 : i32, i32
  }
  func.func @transform_21(%arg0: i32) -> (i32, i32) {
    %c0_i32 = arith.constant 0 : i32
    %c0_i32_0 = arith.constant 0 : i32
    %c0_i32_1 = arith.constant 0 : i32
    return %c0_i32, %c0_i32_0 : i32, i32
  }
  func.func @transform_22(%arg0: i32) -> (i32, i32, i32) {
    %c0_i32 = arith.constant 0 : i32
    %c0_i32_0 = arith.constant 0 : i32
    %c0_i32_1 = arith.constant 0 : i32
    return %arg0, %c0_i32, %c0_i32_0 : i32, i32, i32
  }
}

</mosaic_0001>

<bundles_post_ra>
// kernel: svtr_forward.5
= control target key start
LH: loop header
LB: loop body
LE: loop exit
PB: predicated region body
PF: predicated region fallthrough
CT: control target
= control target key end

     0   :  { %s584_s12 = smov 0   ;;  %s687_s0 = inlined_call_operand.vmem [shape: f32[256,128], index: 0, kind: input, shape index: {}]   ;;  %s688_s1 = inlined_call_operand.vmem [shape: bf16[128,8], index: 1, kind: input, shape index: {}]   ;;  %s689_s2 = inlined_call_operand.vmem [shape: f32[1,8], index: 2, kind: input, shape index: {}]   ;;  %s690_s3 = inlined_call_operand.vmem [shape: f32[256,8], index: 3, kind: output, shape index: {}]  }
   0x1 LB: > { %s456_s13 = sadd.s32 4294967295, %s562_s12   ;;  %p460_p0 = scmp.ge.s32.totalorder %s562_s12, 1  ;;  %s562_s12 = sphi %s584_s12, %s13_s12  }
   0x2   : > { %p138_p1 = scmp.lt.s32.totalorder %s562_s12, 3 }
   0x4   : > { %p139_p2 = pnand %p460_p0, %p138_p1 }
   0x5   : > { %s461_s16 = sshll.u32 (!%p139_p2), %s456_s13, 4 }
   0x6   : > { %142 = sbr.rel (%p139_p2) target bundleno = 256 (0x100), region = 32  ;;  %p163_p3 = scmp.lt.s32.totalorder (!%p139_p2), %s461_s16, 31 }
   0xb   : > { %v548_v0 = vld [vmem:[%s688_s1 + $0x38] sm:$0xff]   ;;  %v549_v1 = vld [vmem:[%s688_s1 + $0x30] sm:$0xff]   ;;  %s692_s16 = smov (!%p163_p3, %s461_s16), 31  ;;  %v550_v2 = vld [vmem:[%s688_s1 + $0x28] sm:$0xff]   ;;  %vm383_vm0 = vcmask 64512  }
   0xc   : > { %492 = vmatprep.subr.bf16.mxu0 %v548_v0  ;;  %524 = vmatprep.subr.bf16.mxu1 %v548_v0  ;;  %s462_s21 = sshll.u32 %s692_s16, 3  ;;  %v551_v3 = vld [vmem:[%s688_s1 + $0x20] sm:$0xff]   ;;  %v552_v10 = vld [vmem:[%s688_s1 + $0x18] sm:$0xff]   ;;  %v553_v11 = vld [vmem:[%s688_s1 + $0x10] sm:$0xff]  }
   0xd   : > { %493 = vmatpush3.bf16.msra.mxu0 %v548_v0  ;;  %532 = vmatpush3.bf16.msra.mxu1 %v548_v0  ;;  %s609_s24 = scalar_lea.vmem %s687_s0, %s462_s21  ;;  %v554_v12 = vld [vmem:[%s688_s1 + $0x8] sm:$0xff]   ;;  %v555_v13 = vld [vmem:[%s688_s1] sm:$0xff]   ;;  %s650_s13 = scalar_lea.vmem %s690_s3, %s462_s21 }
   0xe   : > { %494 = vmatprep.subr.bf16.mxu0 %v549_v1  ;;  %525 = vmatprep.subr.bf16.mxu1 %v549_v1  ;;  %v175_v4 = vld [vmem:[%s609_s24] sm:$0xff]  ;;  %v176_v5 = vld [vmem:[%s609_s24 + $0x8] sm:$0xff]  ;;  %v177_v14 = vld [vmem:[%s609_s24 + $0x10] sm:$0xff] }
   0xf   : > { %v183_v6 = vld [vmem:[%s609_s24 + $0x40] sm:$0xff]  ;;  %v191_v7 = vpack.c.bf16 %v176_v5, %v175_v4  ;;  %v184_v8 = vld [vmem:[%s609_s24 + $0x48] sm:$0xff]  ;;  %v178_v15 = vld [vmem:[%s609_s24 + $0x18] sm:$0xff] }
  0x10   : > { %v195_v9 = vpack.c.bf16 %v184_v8, %v183_v6  ;;  %v185_v16 = vld [vmem:[%s609_s24 + $0x50] sm:$0xff]  ;;  %v186_v17 = vld [vmem:[%s609_s24 + $0x58] sm:$0xff]  ;;  %v179_v18 = vld [vmem:[%s609_s24 + $0x20] sm:$0xff]  ;;  %v192_v22 = vpack.c.bf16 %v178_v15, %v177_v14 }
  0x11   : > { %495 = vmatpush3.bf16.msra.mxu0 %v549_v1  ;;  %533 = vmatpush3.bf16.msra.mxu1 %v549_v1  ;;  %v180_v19 = vld [vmem:[%s609_s24 + $0x28] sm:$0xff]  ;;  %v187_v20 = vld [vmem:[%s609_s24 + $0x60] sm:$0xff]  ;;  %v196_v23 = vpack.c.bf16 %v186_v17, %v185_v16  ;;  %v181_v26 = vld [vmem:[%s609_s24 + $0x30] sm:$0xff] }
  0x12   : > { %496 = vmatprep.subr.bf16.mxu0 %v550_v2  ;;  %526 = vmatprep.subr.bf16.mxu1 %v550_v2  ;;  %v188_v21 = vld [vmem:[%s609_s24 + $0x68] sm:$0xff]  ;;  %v193_v24 = vpack.c.bf16 %v180_v19, %v179_v18  ;;  %v182_v27 = vld [vmem:[%s609_s24 + $0x38] sm:$0xff]  ;;  %v189_v28 = vld [vmem:[%s609_s24 + $0x70] sm:$0xff] }
  0x13   : > { %508 = vmatprep.mubr.bf16.mxu0 %v191_v7  ;;  %516 = vmatprep.mubr.bf16.mxu1 %v195_v9  ;;  %v197_v25 = vpack.c.bf16 %v188_v21, %v187_v20  ;;  %v190_v29 = vld [vmem:[%s609_s24 + $0x78] sm:$0xff]  ;;  %v194_v30 = vpack.c.bf16 %v182_v27, %v181_v26  ;;  %v465_v32 = vld [vmem:[%s689_s2] ss:$0 sm:$0xff] }
  0x14   : > { %v198_v31 = vpack.c.bf16 %v190_v29, %v189_v28 }
  0x15   : > { %497 = vmatpush3.bf16.msra.mxu0 %v550_v2  ;;  %534 = vmatpush3.bf16.msra.mxu1 %v550_v2 }
  0x16   : > { %498 = vmatprep.subr.bf16.mxu0 %v551_v3  ;;  %527 = vmatprep.subr.bf16.mxu1 %v551_v3 }
  0x19   : > { %499 = vmatpush3.bf16.msra.mxu0 %v551_v3  ;;  %535 = vmatpush3.bf16.msra.mxu1 %v551_v3 }
  0x1a   : > { %500 = vmatprep.subr.bf16.mxu0 %v552_v10  ;;  %528 = vmatprep.subr.bf16.mxu1 %v552_v10 }
  0x1d   : > { %501 = vmatpush3.bf16.msra.mxu0 %v552_v10  ;;  %536 = vmatpush3.bf16.msra.mxu1 %v552_v10 }
  0x1e   : > { %502 = vmatprep.subr.bf16.mxu0 %v553_v11  ;;  %529 = vmatprep.subr.bf16.mxu1 %v553_v11 }
  0x21   : > { %503 = vmatpush3.bf16.msra.mxu0 %v553_v11  ;;  %537 = vmatpush3.bf16.msra.mxu1 %v553_v11 }
  0x22   : > { %504 = vmatprep.subr.bf16.mxu0 %v554_v12  ;;  %530 = vmatprep.subr.bf16.mxu1 %v554_v12 }
  0x25   : > { %505 = vmatpush3.bf16.msra.mxu0 %v554_v12  ;;  %538 = vmatpush3.bf16.msra.mxu1 %v554_v12 }
  0x26   : > { %506 = vmatprep.subr.bf16.mxu0 %v555_v13  ;;  %531 = vmatprep.subr.bf16.mxu1 %v555_v13 }
  0x29   : > { %507 = vmatpush3.bf16.msra.mxu0 %v555_v13  ;;  %539 = vmatpush3.bf16.msra.mxu1 %v555_v13 }
  0x2c   : > { %509 = vmatmul.mubr.bf16.vlgmr.msra.gmra.mxu0 %v192_v22  ;;  %517 = vmatmul.mubr.bf16.vlgmr.msra.gmra.mxu1 %v196_v23 }
  0x2d   : > { %512 = vmatprep.mubr.bf16.mxu0 %v193_v24  ;;  %520 = vmatprep.mubr.bf16.mxu1 %v197_v25 }
  0x34   : > { %513 = vmatmul.mubr.bf16.gmra.mxu0 %v194_v30  ;;  %521 = vmatmul.mubr.bf16.gmra.mxu1 %v198_v31 }
  0xec   : > { %v510_v33 = vpop.f32.mrf.mxu0  ;;  %v518_v34 = vpop.f32.mrf.mxu1 }
  0xed   : > { %v313_v35 = vadd.f32 %v510_v33, %v465_v32  ;;  %v345_v36 = vadd.f32 %v518_v34, %v465_v32 }
  0xee   : > { %v304_v37 = vpop.f32.mrf.mxu0  ;;  %v336_v38 = vpop.f32.mrf.mxu1 }
  0xef   : > { %v369_v39 = vmax.f32 %v313_v35, 0.0  ;;  %v377_v40 = vmax.f32 %v345_v36, 0.0  ;;  %v305_v41 = vadd.f32 %v465_v32, %v304_v37  ;;  %v337_v42 = vadd.f32 %v465_v32, %v336_v38 }
  0xf0   : > { %v511_v43 = vpop.f32.mrf.mxu0  ;;  %v519_v44 = vpop.f32.mrf.mxu1 }
  0xf1   : > { %386 = vst.msk [vmem:[%s650_s13 + $0x10] sm:$0xff] %vm383_vm0, %v369_v39  ;;  %394 = vst.msk [vmem:[%s650_s13 + $0x50] sm:$0xff] %vm383_vm0, %v377_v40  ;;  %v367_v45 = vmax.f32 %v305_v41, 0.0  ;;  %v375_v46 = vmax.f32 %v337_v42, 0.0  ;;  %v316_v47 = vadd.f32 %v511_v43, %v465_v32  ;;  %v348_v48 = vadd.f32 %v519_v44, %v465_v32 }
  0xf2   : > { %v307_v49 = vpop.f32.mrf.mxu0  ;;  %v339_v50 = vpop.f32.mrf.mxu1 }
  0xf3   : > { %384 = vst.msk [vmem:[%s650_s13] sm:$0xff] %vm383_vm0, %v367_v45  ;;  %392 = vst.msk [vmem:[%s650_s13 + $0x40] sm:$0xff] %vm383_vm0, %v375_v46  ;;  %v370_v51 = vmax.f32 %v316_v47, 0.0  ;;  %v378_v52 = vmax.f32 %v348_v48, 0.0  ;;  %v308_v53 = vadd.f32 %v465_v32, %v307_v49  ;;  %v340_v54 = vadd.f32 %v465_v32, %v339_v50 }
  0xf4   : > { %v514_v55 = vpop.f32.mrf.mxu0  ;;  %v522_v56 = vpop.f32.mrf.mxu1 }
  0xf5   : > { %387 = vst.msk [vmem:[%s650_s13 + $0x18] sm:$0xff] %vm383_vm0, %v370_v51  ;;  %395 = vst.msk [vmem:[%s650_s13 + $0x58] sm:$0xff] %vm383_vm0, %v378_v52  ;;  %v368_v57 = vmax.f32 %v308_v53, 0.0  ;;  %v376_v58 = vmax.f32 %v340_v54, 0.0  ;;  %v329_v59 = vadd.f32 %v514_v55, %v465_v32  ;;  %v361_v60 = vadd.f32 %v522_v56, %v465_v32 }
  0xf6   : > { %v320_v61 = vpop.f32.mrf.mxu0  ;;  %v352_v62 = vpop.f32.mrf.mxu1 }
  0xf7   : > { %385 = vst.msk [vmem:[%s650_s13 + $0x8] sm:$0xff] %vm383_vm0, %v368_v57  ;;  %393 = vst.msk [vmem:[%s650_s13 + $0x48] sm:$0xff] %vm383_vm0, %v376_v58  ;;  %v373_v63 = vmax.f32 %v329_v59, 0.0  ;;  %v381_v0 = vmax.f32 %v361_v60, 0.0  ;;  %v321_v1 = vadd.f32 %v465_v32, %v320_v61  ;;  %v353_v2 = vadd.f32 %v465_v32, %v352_v62 }
  0xf8   : > { %v515_v3 = vpop.f32.mrf.mxu0  ;;  %v523_v4 = vpop.f32.mrf.mxu1 }
  0xf9   : > { %390 = vst.msk [vmem:[%s650_s13 + $0x30] sm:$0xff] %vm383_vm0, %v373_v63  ;;  %398 = vst.msk [vmem:[%s650_s13 + $0x70] sm:$0xff] %vm383_vm0, %v381_v0  ;;  %v371_v5 = vmax.f32 %v321_v1, 0.0  ;;  %v379_v6 = vmax.f32 %v353_v2, 0.0  ;;  %v332_v7 = vadd.f32 %v515_v3, %v465_v32  ;;  %v364_v8 = vadd.f32 %v523_v4, %v465_v32 }
  0xfa   : > { %v323_v9 = vpop.f32.mrf.mxu0  ;;  %v355_v10 = vpop.f32.mrf.mxu1 }
  0xfb   : > { %388 = vst.msk [vmem:[%s650_s13 + $0x20] sm:$0xff] %vm383_vm0, %v371_v5  ;;  %396 = vst.msk [vmem:[%s650_s13 + $0x60] sm:$0xff] %vm383_vm0, %v379_v6  ;;  %v374_v11 = vmax.f32 %v332_v7, 0.0  ;;  %v382_v12 = vmax.f32 %v364_v8, 0.0  ;;  %v324_v13 = vadd.f32 %v465_v32, %v323_v9  ;;  %v356_v14 = vadd.f32 %v465_v32, %v355_v10 }
  0xfd   : > { %391 = vst.msk [vmem:[%s650_s13 + $0x38] sm:$0xff] %vm383_vm0, %v374_v11  ;;  %399 = vst.msk [vmem:[%s650_s13 + $0x78] sm:$0xff] %vm383_vm0, %v382_v12  ;;  %v372_v15 = vmax.f32 %v324_v13, 0.0  ;;  %v380_v16 = vmax.f32 %v356_v14, 0.0 }
  0xff   : > { %389 = vst.msk [vmem:[%s650_s13 + $0x28] sm:$0xff] %vm383_vm0, %v372_v15  ;;  %397 = vst.msk [vmem:[%s650_s13 + $0x68] sm:$0xff] %vm383_vm0, %v380_v16 }
 0x100 PF: > { %s13_s12 = sadd.s32 1, %s562_s12  }
 0x101   : > { %p10_p4 = scmp.ge.s32.totalorder %s13_s12, 4  }
 0x103   :  { %12 = sbr.rel (!%p10_p4) target bundleno = 1 (0x1), region = 62 }

// kernel: svtr_forward.6
= control target key start
LH: loop header
LB: loop body
LE: loop exit
PB: predicated region body
PF: predicated region fallthrough
CT: control target
= control target key end

     0   :  { %vm171_vm0 = vcmask 130048   ;;  %s356_s1 = inlined_call_operand.vmem [shape: bf16[128,16], index: 1, kind: input, shape index: {}]   ;;  %s357_s0 = inlined_call_operand.vmem [shape: f32[64,128], index: 0, kind: input, shape index: {}]   ;;  %s358_s2 = inlined_call_operand.vmem [shape: f32[1,16], index: 2, kind: input, shape index: {}]   ;;  %s359_s3 = inlined_call_operand.vmem [shape: f32[64,16], index: 3, kind: output, shape index: {}]  }
   0x1   :  { %v245_v0 = vld [vmem:[%s356_s1 + $0x38] sm:$0xff]   ;;  %v246_v1 = vld [vmem:[%s356_s1 + $0x30] sm:$0xff]   ;;  %v247_v2 = vld [vmem:[%s356_s1 + $0x28] sm:$0xff]  }
   0x2   :  { %205 = vmatprep.subr.bf16.mxu0 %v245_v0  ;;  %229 = vmatprep.subr.bf16.mxu1 %v245_v0  ;;  %v248_v3 = vld [vmem:[%s356_s1 + $0x20] sm:$0xff]   ;;  %v16_v5 = vld [vmem:[%s357_s0 + $0x8] sm:$0xff]  ;;  %v249_v10 = vld [vmem:[%s356_s1 + $0x18] sm:$0xff]  }
   0x3   :  { %206 = vmatpush3.bf16.msra.mxu0 %v245_v0  ;;  %237 = vmatpush3.bf16.msra.mxu1 %v245_v0  ;;  %v15_v4 = vld [vmem:[%s357_s0] sm:$0xff]  ;;  %v20_v8 = vld [vmem:[%s357_s0 + $0x28] sm:$0xff]  ;;  %v250_v11 = vld [vmem:[%s356_s1 + $0x10] sm:$0xff]  }
   0x4   :  { %207 = vmatprep.subr.bf16.mxu0 %v246_v1  ;;  %230 = vmatprep.subr.bf16.mxu1 %v246_v1  ;;  %v19_v6 = vld [vmem:[%s357_s0 + $0x20] sm:$0xff]  ;;  %v23_v7 = vpack.c.bf16 %v16_v5, %v15_v4  ;;  %v251_v12 = vld [vmem:[%s356_s1 + $0x8] sm:$0xff]   ;;  %v17_v14 = vld [vmem:[%s357_s0 + $0x10] sm:$0xff] }
   0x5   :  { %v25_v9 = vpack.c.bf16 %v20_v8, %v19_v6  ;;  %v252_v13 = vld [vmem:[%s356_s1] sm:$0xff]   ;;  %v18_v15 = vld [vmem:[%s357_s0 + $0x18] sm:$0xff]  ;;  %v21_v16 = vld [vmem:[%s357_s0 + $0x30] sm:$0xff] }
   0x6   :  { %221 = vmatprep.mubr.bf16.mxu0 %v23_v7  ;;  %v22_v17 = vld [vmem:[%s357_s0 + $0x38] sm:$0xff]  ;;  %v24_v18 = vpack.c.bf16 %v18_v15, %v17_v14  ;;  %v184_v20 = vld [vmem:[%s358_s2] ss:$0 sm:$0xff] }
   0x7   :  { %208 = vmatpush3.bf16.msra.mxu0 %v246_v1  ;;  %238 = vmatpush3.bf16.msra.mxu1 %v246_v1  ;;  %v26_v19 = vpack.c.bf16 %v22_v17, %v21_v16 }
   0x8   :  { %209 = vmatprep.subr.bf16.mxu0 %v247_v2  ;;  %231 = vmatprep.subr.bf16.mxu1 %v247_v2 }
   0x9   :  { %225 = vmatprep.mubr.bf16.mxu1 %v25_v9 }
   0xb   :  { %210 = vmatpush3.bf16.msra.mxu0 %v247_v2  ;;  %239 = vmatpush3.bf16.msra.mxu1 %v247_v2 }
   0xc   :  { %211 = vmatprep.subr.bf16.mxu0 %v248_v3  ;;  %232 = vmatprep.subr.bf16.mxu1 %v248_v3 }
   0xf   :  { %212 = vmatpush3.bf16.msra.mxu0 %v248_v3  ;;  %240 = vmatpush3.bf16.msra.mxu1 %v248_v3 }
  0x10   :  { %213 = vmatprep.subr.bf16.mxu0 %v249_v10  ;;  %233 = vmatprep.subr.bf16.mxu1 %v249_v10 }
  0x13   :  { %214 = vmatpush3.bf16.msra.mxu0 %v249_v10  ;;  %241 = vmatpush3.bf16.msra.mxu1 %v249_v10 }
  0x14   :  { %215 = vmatprep.subr.bf16.mxu0 %v250_v11  ;;  %234 = vmatprep.subr.bf16.mxu1 %v250_v11 }
  0x17   :  { %216 = vmatpush3.bf16.msra.mxu0 %v250_v11  ;;  %242 = vmatpush3.bf16.msra.mxu1 %v250_v11 }
  0x18   :  { %217 = vmatprep.subr.bf16.mxu0 %v251_v12  ;;  %235 = vmatprep.subr.bf16.mxu1 %v251_v12 }
  0x1b   :  { %218 = vmatpush3.bf16.msra.mxu0 %v251_v12  ;;  %243 = vmatpush3.bf16.msra.mxu1 %v251_v12 }
  0x1c   :  { %219 = vmatprep.subr.bf16.mxu0 %v252_v13  ;;  %236 = vmatprep.subr.bf16.mxu1 %v252_v13 }
  0x1f   :  { %220 = vmatpush3.bf16.msra.mxu0 %v252_v13  ;;  %244 = vmatpush3.bf16.msra.mxu1 %v252_v13 }
  0x22   :  { %222 = vmatmul.mubr.bf16.vlgmr.msra.gmra.mxu0 %v24_v18  ;;  %226 = vmatmul.mubr.bf16.vlgmr.msra.gmra.mxu1 %v26_v19 }
  0xe2   :  { %v223_v21 = vpop.f32.mrf.mxu0  ;;  %v227_v22 = vpop.f32.mrf.mxu1 }
  0xe3   :  { %v141_v23 = vadd.f32 %v223_v21, %v184_v20  ;;  %v157_v24 = vadd.f32 %v227_v22, %v184_v20 }
  0xe4   :  { %v132_v25 = vpop.f32.mrf.mxu0  ;;  %v148_v26 = vpop.f32.mrf.mxu1 }
  0xe5   :  { %v165_v27 = vmax.f32 %v141_v23, 0.0  ;;  %v169_v28 = vmax.f32 %v157_v24, 0.0  ;;  %v133_v29 = vadd.f32 %v184_v20, %v132_v25  ;;  %v149_v30 = vadd.f32 %v184_v20, %v148_v26 }
  0xe6   :  { %v224_v31 = vpop.f32.mrf.mxu0  ;;  %v228_v32 = vpop.f32.mrf.mxu1 }
  0xe7   :  { %174 = vst.msk [vmem:[%s359_s3 + $0x10] sm:$0xff] %vm171_vm0, %v165_v27  ;;  %178 = vst.msk [vmem:[%s359_s3 + $0x30] sm:$0xff] %vm171_vm0, %v169_v28  ;;  %v163_v33 = vmax.f32 %v133_v29, 0.0  ;;  %v167_v34 = vmax.f32 %v149_v30, 0.0  ;;  %v144_v35 = vadd.f32 %v224_v31, %v184_v20  ;;  %v160_v36 = vadd.f32 %v228_v32, %v184_v20 }
  0xe8   :  { %v135_v37 = vpop.f32.mrf.mxu0  ;;  %v151_v38 = vpop.f32.mrf.mxu1 }
  0xe9   :  { %172 = vst.msk [vmem:[%s359_s3] sm:$0xff] %vm171_vm0, %v163_v33  ;;  %176 = vst.msk [vmem:[%s359_s3 + $0x20] sm:$0xff] %vm171_vm0, %v167_v34  ;;  %v166_v39 = vmax.f32 %v144_v35, 0.0  ;;  %v170_v40 = vmax.f32 %v160_v36, 0.0  ;;  %v136_v41 = vadd.f32 %v184_v20, %v135_v37  ;;  %v152_v42 = vadd.f32 %v184_v20, %v151_v38 }
  0xeb   :  { %175 = vst.msk [vmem:[%s359_s3 + $0x18] sm:$0xff] %vm171_vm0, %v166_v39  ;;  %179 = vst.msk [vmem:[%s359_s3 + $0x38] sm:$0xff] %vm171_vm0, %v170_v40  ;;  %v164_v43 = vmax.f32 %v136_v41, 0.0  ;;  %v168_v44 = vmax.f32 %v152_v42, 0.0 }
  0xed   :  { %173 = vst.msk [vmem:[%s359_s3 + $0x8] sm:$0xff] %vm171_vm0, %v164_v43  ;;  %177 = vst.msk [vmem:[%s359_s3 + $0x28] sm:$0xff] %vm171_vm0, %v168_v44 }

// kernel: svtr_forward.7
= control target key start
LH: loop header
LB: loop body
LE: loop exit
PB: predicated region body
PF: predicated region fallthrough
CT: control target
= control target key end

     0   :  { %v596_v22 = vmov 1983009808   ;;  %v27_v24 = vlaneseq  ;;  %v597_v49 = vmov 0.0   ;;  %vm598_vm0 = vmmov 0   ;;  %s743_s1 = inlined_call_operand.vmem [shape: bf16[512,32], index: 1, kind: input, shape index: {}]   ;;  %s744_s0 = inlined_call_operand.vmem [shape: f32[2,512], index: 0, kind: input, shape index: {}]   ;;  %s745_s3 = inlined_call_operand.vmem [shape: bf16[32,6], index: 3, kind: input, shape index: {}]   ;;  %s746_s2 = inlined_call_operand.vmem [shape: f32[1,32], index: 2, kind: input, shape index: {}]   ;;  %s747_s4 = inlined_call_operand.vmem [shape: f32[1,6], index: 4, kind: input, shape index: {}]   ;;  %s748_s5 = inlined_call_operand.vmem [shape: f32[2,6], index: 5, kind: output, shape index: {}]  }
   0x1   :  { %v561_v0 = vld [vmem:[%s743_s1 + $0x78] sm:$0xff]   ;;  %v565_v4 = vld [vmem:[%s743_s1 + $0x70] sm:$0xff]   ;;  %v569_v8 = vld [vmem:[%s743_s1 + $0x68] sm:$0xff]   ;;  %v25_v23 = vunpack.c.l.s4 %v596_v22  ;;  %vm416_vm1 = vcmask 261120   ;;  %vm460_vm2 = vcmask 41984  }
   0x2   :  { %v562_v1 = vld [vmem:[%s743_s1 + $0xf8] sm:$0xff]   ;;  %503 = vmatprep.subr.bf16.mxu0 %v561_v0  ;;  %v566_v5 = vld [vmem:[%s743_s1 + $0xf0] sm:$0xff]   ;;  %v570_v9 = vld [vmem:[%s743_s1 + $0xe8] sm:$0xff]   ;;  %v28_v30 = vshrl.u32 %v27_v24, 7 }
   0x3   :  { %v563_v2 = vld [vmem:[%s743_s1 + $0x38] sm:$0xff]   ;;  %525 = vmatprep.subr.bf16.mxu1 %v562_v1  ;;  %v567_v6 = vld [vmem:[%s743_s1 + $0x30] sm:$0xff]   ;;  %v571_v10 = vld [vmem:[%s743_s1 + $0x28] sm:$0xff]   ;;  %v26_v29 = vunpack.c.0.s8 %v25_v23 }
   0x4   :  { %v564_v3 = vld [vmem:[%s743_s1 + $0xb8] sm:$0xff]   ;;  %504 = vmatpush3.bf16.msra.mxu0 %v563_v2  ;;  %v568_v7 = vld [vmem:[%s743_s1 + $0xb0] sm:$0xff]   ;;  %v572_v11 = vld [vmem:[%s743_s1 + $0xa8] sm:$0xff]  }
   0x5   :  { %526 = vmatpush3.bf16.msra.mxu1 %v564_v3  ;;  %505 = vmatprep.subr.bf16.mxu0 %v565_v4  ;;  %v573_v12 = vld [vmem:[%s743_s1 + $0x60] sm:$0xff]   ;;  %v577_v16 = vld [vmem:[%s743_s1 + $0x58] sm:$0xff]   ;;  %v581_v20 = vld [vmem:[%s743_s1 + $0x50] sm:$0xff]   ;;  %v29_v35 = vsub.s32 %v26_v29, %v28_v30 }
   0x6   :  { %527 = vmatprep.subr.bf16.mxu1 %v566_v5  ;;  %v574_v13 = vld [vmem:[%s743_s1 + $0xe0] sm:$0xff]   ;;  %v578_v17 = vld [vmem:[%s743_s1 + $0xd8] sm:$0xff]   ;;  %v582_v21 = vld [vmem:[%s743_s1 + $0xd0] sm:$0xff]  }
   0x7   :  { %v575_v14 = vld [vmem:[%s743_s1 + $0x20] sm:$0xff]   ;;  %v579_v18 = vld [vmem:[%s743_s1 + $0x18] sm:$0xff]   ;;  %v583_v25 = vld [vmem:[%s743_s1 + $0x10] sm:$0xff]  }
   0x8   :  { %506 = vmatpush3.bf16.msra.mxu0 %v567_v6  ;;  %v576_v15 = vld [vmem:[%s743_s1 + $0xa0] sm:$0xff]   ;;  %v580_v19 = vld [vmem:[%s743_s1 + $0x98] sm:$0xff]   ;;  %v584_v26 = vld [vmem:[%s743_s1 + $0x90] sm:$0xff]  }
   0x9   :  { %528 = vmatpush3.bf16.msra.mxu1 %v568_v7  ;;  %507 = vmatprep.subr.bf16.mxu0 %v569_v8  ;;  %v585_v27 = vld [vmem:[%s743_s1 + $0x48] sm:$0xff]   ;;  %v589_v33 = vld [vmem:[%s743_s1 + $0x40] sm:$0xff]  }
   0xa   :  { %529 = vmatprep.subr.bf16.mxu1 %v570_v9  ;;  %v586_v28 = vld [vmem:[%s743_s1 + $0xc8] sm:$0xff]   ;;  %v590_v34 = vld [vmem:[%s743_s1 + $0xc0] sm:$0xff]  }
   0xb   :  { %v587_v31 = vld [vmem:[%s743_s1 + $0x8] sm:$0xff]   ;;  %v591_v36 = vld [vmem:[%s743_s1] sm:$0xff]  }
   0xc   :  { %508 = vmatpush3.bf16.msra.mxu0 %v571_v10  ;;  %v588_v32 = vld [vmem:[%s743_s1 + $0x88] sm:$0xff]   ;;  %v592_v37 = vld [vmem:[%s743_s1 + $0x80] sm:$0xff]  }
   0xd   :  { %530 = vmatpush3.bf16.msra.mxu1 %v572_v11  ;;  %509 = vmatprep.subr.bf16.mxu0 %v573_v12  ;;  %v21_v38 = vld [vmem:[%s744_s0] sm:$0xff]  ;;  %v594_v48 = vld [vmem:[%s745_s3 + $0x8] sm:$0xff]  }
   0xe   :  { %531 = vmatprep.subr.bf16.mxu1 %v574_v13  ;;  %v30_v39 = vrot.slane %v21_v38, %v29_v35  ;;  %v23_v40 = vcombine.high %v21_v38, %v21_v38  ;;  %v595_v50 = vld [vmem:[%s745_s3] sm:$0xff]  }
   0xf   :  { %v466_v53 = vld [vmem:[%s746_s2] ss:$0 sm:$0xff] }
  0x10   :  { %510 = vmatpush3.bf16.msra.mxu0 %v575_v14  ;;  %v38_v41 = vcombine.high %v30_v39, %v30_v39  ;;  %v37_v42 = vrot.slane %v23_v40, %v29_v35  ;;  %v44_v43 = vpack.c.bf16 %v30_v39, %v30_v39  ;;  %v499_v2 = vld [vmem:[%s747_s4] ss:$0 sm:$0xff] }
  0x11   :  { %532 = vmatpush3.bf16.msra.mxu1 %v576_v15  ;;  %511 = vmatprep.subr.bf16.mxu0 %v577_v16 }
  0x12   :  { %533 = vmatprep.subr.bf16.mxu1 %v578_v17  ;;  %v45_v44 = vpack.c.bf16 %v38_v41, %v38_v41  ;;  %v39_v45 = vcombine.high %v37_v42, %v37_v42  ;;  %v46_v46 = vpack.c.bf16 %v37_v42, %v37_v42 }
  0x14   :  { %512 = vmatpush3.bf16.msra.mxu0 %v579_v18  ;;  %343 = vmatprep.mubr.bf16.mxu0 %v45_v44  ;;  %v47_v47 = vpack.c.bf16 %v39_v45, %v39_v45 }
  0x15   :  { %534 = vmatpush3.bf16.msra.mxu1 %v580_v19  ;;  %513 = vmatprep.subr.bf16.mxu0 %v581_v20 }
  0x16   :  { %535 = vmatprep.subr.bf16.mxu1 %v582_v21  ;;  %383 = vmatprep.mubr.bf16.mxu1 %v47_v47 }
  0x18   :  { %514 = vmatpush3.bf16.msra.mxu0 %v583_v25 }
  0x19   :  { %536 = vmatpush3.bf16.msra.mxu1 %v584_v26  ;;  %515 = vmatprep.subr.bf16.mxu0 %v585_v27 }
  0x1a   :  { %537 = vmatprep.subr.bf16.mxu1 %v586_v28 }
  0x1c   :  { %516 = vmatpush3.bf16.msra.mxu0 %v587_v31 }
  0x1d   :  { %538 = vmatpush3.bf16.msra.mxu1 %v588_v32  ;;  %517 = vmatprep.subr.bf16.mxu0 %v589_v33 }
  0x1e   :  { %539 = vmatprep.subr.bf16.mxu1 %v590_v34 }
  0x20   :  { %518 = vmatpush3.bf16.msra.mxu0 %v591_v36 }
  0x21   :  { %540 = vmatpush3.bf16.msra.mxu1 %v592_v37  ;;  %550 = vmatprep.subr.bf16.mxu0 %v597_v49 }
  0x23   :  { %344 = vmatmul.mubr.bf16.vlgmr.msra.gmra.mxu0 %v44_v43 }
  0x24   :  { %384 = vmatmul.mubr.bf16.vlgmr.msra.gmra.mxu1 %v46_v46  ;;  %551 = vmatpush3.bf16.msra.mxu0 %v594_v48 }
  0x25   :  { %552 = vmatprep.subr.bf16.mxu0 %v597_v49  ;;  %554 = vmatprep.mubr.msk.bf16.mxu0 %vm598_vm0, %v597_v49 }
  0x28   :  { %553 = vmatpush3.bf16.msra.mxu0 %v595_v50 }
  0xe3   :  { %v519_v51 = vpop.f32.mrf.mxu0 }
  0xe4   :  { %v541_v52 = vpop.f32.mrf.mxu1 }
  0xe5   :  { %v520_v54 = vpop.f32.mrf.mxu0 }
  0xe6   :  { %v521_v55 = vadd.f32 %v520_v54, %v519_v51  ;;  %v542_v56 = vpop.f32.mrf.mxu1 }
  0xe7   :  { %v522_v57 = vpop.f32.mrf.mxu0  ;;  %v543_v59 = vadd.f32 %v542_v56, %v541_v52 }
  0xe8   :  { %v346_v58 = vadd.f32 %v521_v55, %v466_v53  ;;  %v544_v60 = vpop.f32.mrf.mxu1 }
  0xe9   :  { %v523_v61 = vpop.f32.mrf.mxu0 }
  0xea   :  { %v386_v62 = vadd.f32 %v543_v59, %v346_v58  ;;  %v545_v63 = vpop.f32.mrf.mxu1 }
  0xec   :  { %v391_v0 = vmax.f32 %v386_v62, 0.0 }
  0xee   :  { %v392_v1 = vpack.c.bf16 %v391_v0, %v391_v0 }
  0xf0   :  { %555 = vmatmul.mubr.msk.bf16.vlgmr.msra.gmra.mxu0 %vm416_vm1, %v392_v1 }
 0x1b0   :  { %v454_v3 = vpop.f32.mrf.mxu0 }
 0x1b1   :  { %v455_v4 = vadd.f32 %v499_v2, %v454_v3 }
 0x1b2   :  { %v556_v5 = vpop.f32.mrf.mxu0 }
 0x1b3   :  { %461 = vst.msk [vmem:[%s748_s5] sm:$0x3] %vm460_vm2, %v455_v4 }
 0x1b4   :  { %v457_v6 = vpop.f32.mrf.mxu0 }
 0x1b6   :  { %v557_v7 = vpop.f32.mrf.mxu0 }

// kernel: svtr_forward.8
= control target key start
LH: loop header
LB: loop body
LE: loop exit
PB: predicated region body
PF: predicated region fallthrough
CT: control target
= control target key end

     0   :  { %s744_s12 = smov 0   ;;  %s977_s0 = inlined_call_operand.vmem [shape: f32[256,128], index: 0, kind: input, shape index: {}]   ;;  %s978_s1 = inlined_call_operand.vmem [shape: bf16[128,32], index: 1, kind: input, shape index: {}]   ;;  %s979_s2 = inlined_call_operand.vmem [shape: f32[1,32], index: 2, kind: input, shape index: {}]   ;;  %s980_s3 = inlined_call_operand.vmem [shape: f32[256,32], index: 3, kind: output, shape index: {}]  }
   0x1 LB: > { %s584_s13 = sadd.s32 4294967295, %s722_s12   ;;  %p588_p0 = scmp.ge.s32.totalorder %s722_s12, 1  ;;  %s722_s12 = sphi %s744_s12, %s13_s12  }
   0x2   : > { %p138_p1 = scmp.lt.s32.totalorder %s722_s12, 3 }
   0x4   : > { %p139_p2 = pnand %p588_p0, %p138_p1 }
   0x5   : > { %s589_s16 = sshll.u32 (!%p139_p2), %s584_s13, 4 }
   0x6   : > { %142 = sbr.rel (%p139_p2) target bundleno = 297 (0x129), region = 32  ;;  %p163_p3 = scmp.lt.s32.totalorder (!%p139_p2), %s589_s16, 31 }
   0xb   : > { %v676_v0 = vld [vmem:[%s978_s1 + $0x38] sm:$0xff]   ;;  %v677_v1 = vld [vmem:[%s978_s1 + $0x30] sm:$0xff]   ;;  %s982_s16 = smov (!%p163_p3, %s589_s16), 31  ;;  %v678_v2 = vld [vmem:[%s978_s1 + $0x28] sm:$0xff]   ;;  %vm511_vm0 = vcmask 261120  }
   0xc   : > { %620 = vmatprep.subr.bf16.mxu0 %v676_v0  ;;  %652 = vmatprep.subr.bf16.mxu1 %v676_v0  ;;  %s590_s21 = sshll.u32 %s982_s16, 3  ;;  %v679_v3 = vld [vmem:[%s978_s1 + $0x20] sm:$0xff]   ;;  %v680_v10 = vld [vmem:[%s978_s1 + $0x18] sm:$0xff]   ;;  %v681_v11 = vld [vmem:[%s978_s1 + $0x10] sm:$0xff]  }
   0xd   : > { %621 = vmatpush3.bf16.msra.mxu0 %v676_v0  ;;  %660 = vmatpush3.bf16.msra.mxu1 %v676_v0  ;;  %s769_s24 = scalar_lea.vmem %s977_s0, %s590_s21  ;;  %v682_v12 = vld [vmem:[%s978_s1 + $0x8] sm:$0xff]   ;;  %v683_v13 = vld [vmem:[%s978_s1] sm:$0xff]   ;;  %s922_s13 = scalar_lea.vmem %s980_s3, %s590_s21 }
   0xe   : > { %622 = vmatprep.subr.bf16.mxu0 %v677_v1  ;;  %653 = vmatprep.subr.bf16.mxu1 %v677_v1  ;;  %v175_v4 = vld [vmem:[%s769_s24] sm:$0xff]  ;;  %v176_v5 = vld [vmem:[%s769_s24 + $0x8] sm:$0xff]  ;;  %v177_v14 = vld [vmem:[%s769_s24 + $0x10] sm:$0xff] }
   0xf   : > { %v183_v6 = vld [vmem:[%s769_s24 + $0x40] sm:$0xff]  ;;  %v191_v7 = vpack.c.bf16 %v176_v5, %v175_v4  ;;  %v184_v8 = vld [vmem:[%s769_s24 + $0x48] sm:$0xff]  ;;  %v178_v15 = vld [vmem:[%s769_s24 + $0x18] sm:$0xff] }
  0x10   : > { %v195_v9 = vpack.c.bf16 %v184_v8, %v183_v6  ;;  %v185_v16 = vld [vmem:[%s769_s24 + $0x50] sm:$0xff]  ;;  %v186_v17 = vld [vmem:[%s769_s24 + $0x58] sm:$0xff]  ;;  %v179_v18 = vld [vmem:[%s769_s24 + $0x20] sm:$0xff]  ;;  %v192_v22 = vpack.c.bf16 %v178_v15, %v177_v14 }
  0x11   : > { %623 = vmatpush3.bf16.msra.mxu0 %v677_v1  ;;  %661 = vmatpush3.bf16.msra.mxu1 %v677_v1  ;;  %v180_v19 = vld [vmem:[%s769_s24 + $0x28] sm:$0xff]  ;;  %v187_v20 = vld [vmem:[%s769_s24 + $0x60] sm:$0xff]  ;;  %v196_v23 = vpack.c.bf16 %v186_v17, %v185_v16  ;;  %v181_v26 = vld [vmem:[%s769_s24 + $0x30] sm:$0xff] }
  0x12   : > { %624 = vmatprep.subr.bf16.mxu0 %v678_v2  ;;  %654 = vmatprep.subr.bf16.mxu1 %v678_v2  ;;  %v188_v21 = vld [vmem:[%s769_s24 + $0x68] sm:$0xff]  ;;  %v193_v24 = vpack.c.bf16 %v180_v19, %v179_v18  ;;  %v182_v27 = vld [vmem:[%s769_s24 + $0x38] sm:$0xff]  ;;  %v189_v28 = vld [vmem:[%s769_s24 + $0x70] sm:$0xff] }
  0x13   : > { %636 = vmatprep.mubr.bf16.mxu0 %v191_v7  ;;  %644 = vmatprep.mubr.bf16.mxu1 %v195_v9  ;;  %v197_v25 = vpack.c.bf16 %v188_v21, %v187_v20  ;;  %v190_v29 = vld [vmem:[%s769_s24 + $0x78] sm:$0xff]  ;;  %v194_v30 = vpack.c.bf16 %v182_v27, %v181_v26  ;;  %v805_v32 = vld [vmem:[%s979_s2] ss:$0 sm:$0xff] }
  0x14   : > { %v198_v31 = vpack.c.bf16 %v190_v29, %v189_v28 }
  0x15   : > { %625 = vmatpush3.bf16.msra.mxu0 %v678_v2  ;;  %662 = vmatpush3.bf16.msra.mxu1 %v678_v2 }
  0x16   : > { %626 = vmatprep.subr.bf16.mxu0 %v679_v3  ;;  %655 = vmatprep.subr.bf16.mxu1 %v679_v3 }
  0x19   : > { %627 = vmatpush3.bf16.msra.mxu0 %v679_v3  ;;  %663 = vmatpush3.bf16.msra.mxu1 %v679_v3 }
  0x1a   : > { %628 = vmatprep.subr.bf16.mxu0 %v680_v10  ;;  %656 = vmatprep.subr.bf16.mxu1 %v680_v10 }
  0x1d   : > { %629 = vmatpush3.bf16.msra.mxu0 %v680_v10  ;;  %664 = vmatpush3.bf16.msra.mxu1 %v680_v10 }
  0x1e   : > { %630 = vmatprep.subr.bf16.mxu0 %v681_v11  ;;  %657 = vmatprep.subr.bf16.mxu1 %v681_v11 }
  0x21   : > { %631 = vmatpush3.bf16.msra.mxu0 %v681_v11  ;;  %665 = vmatpush3.bf16.msra.mxu1 %v681_v11 }
  0x22   : > { %632 = vmatprep.subr.bf16.mxu0 %v682_v12  ;;  %658 = vmatprep.subr.bf16.mxu1 %v682_v12 }
  0x25   : > { %633 = vmatpush3.bf16.msra.mxu0 %v682_v12  ;;  %666 = vmatpush3.bf16.msra.mxu1 %v682_v12 }
  0x26   : > { %634 = vmatprep.subr.bf16.mxu0 %v683_v13  ;;  %659 = vmatprep.subr.bf16.mxu1 %v683_v13 }
  0x29   : > { %635 = vmatpush3.bf16.msra.mxu0 %v683_v13  ;;  %667 = vmatpush3.bf16.msra.mxu1 %v683_v13 }
  0x2c   : > { %637 = vmatmul.mubr.bf16.vlgmr.msra.gmra.mxu0 %v192_v22  ;;  %645 = vmatmul.mubr.bf16.vlgmr.msra.gmra.mxu1 %v196_v23 }
  0x2d   : > { %640 = vmatprep.mubr.bf16.mxu0 %v193_v24  ;;  %648 = vmatprep.mubr.bf16.mxu1 %v197_v25 }
  0x34   : > { %641 = vmatmul.mubr.bf16.gmra.mxu0 %v194_v30  ;;  %649 = vmatmul.mubr.bf16.gmra.mxu1 %v198_v31 }
  0xec   : > { %v638_v33 = vpop.f32.mrf.mxu0  ;;  %v646_v34 = vpop.f32.mrf.mxu1 }
  0xed   : > { %v808_v35 = vadd.f32 %v638_v33, %v805_v32  ;;  %v811_v36 = vadd.f32 %v646_v34, %v805_v32 }
  0xee   : > { %v304_v37 = vpop.f32.mrf.mxu0  ;;  %v336_v38 = vpop.f32.mrf.mxu1 }
  0xef   : > { %v369_v39 = vmul.f32 %v808_v35, %v808_v35  ;;  %v377_v40 = vmul.f32 %v811_v36, %v811_v36  ;;  %v818_v41 = vadd.f32 %v805_v32, %v304_v37  ;;  %v821_v42 = vadd.f32 %v805_v32, %v336_v38 }
  0xf0   : > { %v639_v43 = vpop.f32.mrf.mxu0  ;;  %v647_v44 = vpop.f32.mrf.mxu1 }
  0xf1   : > { %v385_v45 = vmul.f32 %v369_v39, %v808_v35  ;;  %v393_v46 = vmul.f32 %v377_v40, %v811_v36  ;;  %v367_v47 = vmul.f32 %v818_v41, %v818_v41  ;;  %v375_v48 = vmul.f32 %v821_v42, %v821_v42 }
  0xf2   : > { %v830_v49 = vadd.f32 %v639_v43, %v805_v32  ;;  %v833_v50 = vadd.f32 %v647_v44, %v805_v32  ;;  %v307_v51 = vpop.f32.mrf.mxu0  ;;  %v339_v52 = vpop.f32.mrf.mxu1 }
  0xf3   : > { %v401_v53 = vmul.f32 0.044715, %v385_v45  ;;  %v409_v54 = vmul.f32 0.044715, %v393_v46  ;;  %v383_v55 = vmul.f32 %v367_v47, %v818_v41  ;;  %v391_v56 = vmul.f32 %v375_v48, %v821_v42 }
  0xf4   : > { %v370_v57 = vmul.f32 %v830_v49, %v830_v49  ;;  %v378_v58 = vmul.f32 %v833_v50, %v833_v50  ;;  %v842_v59 = vadd.f32 %v805_v32, %v307_v51  ;;  %v845_v60 = vadd.f32 %v805_v32, %v339_v52  ;;  %v642_v61 = vpop.f32.mrf.mxu0  ;;  %v650_v62 = vpop.f32.mrf.mxu1 }
  0xf5   : > { %v417_v63 = vadd.f32 %v401_v53, %v808_v35  ;;  %v425_v0 = vadd.f32 %v409_v54, %v811_v36  ;;  %v399_v1 = vmul.f32 0.044715, %v383_v55  ;;  %v407_v2 = vmul.f32 0.044715, %v391_v56 }
  0xf6   : > { %v386_v3 = vmul.f32 %v370_v57, %v830_v49  ;;  %v394_v4 = vmul.f32 %v378_v58, %v833_v50  ;;  %v368_v5 = vmul.f32 %v842_v59, %v842_v59  ;;  %v376_v6 = vmul.f32 %v845_v60, %v845_v60  ;;  %v320_v11 = vpop.f32.mrf.mxu0  ;;  %v352_v16 = vpop.f32.mrf.mxu1 }
  0xf7   : > { %v433_v7 = vmul.f32 0.7978846, %v417_v63  ;;  %v441_v8 = vmul.f32 0.7978846, %v425_v0  ;;  %v415_v9 = vadd.f32 %v399_v1, %v818_v41  ;;  %v423_v10 = vadd.f32 %v407_v2, %v821_v42 }
  0xf8   : > { %v402_v12 = vmul.f32 0.044715, %v386_v3  ;;  %v410_v13 = vmul.f32 0.044715, %v394_v4  ;;  %v384_v14 = vmul.f32 %v368_v5, %v842_v59  ;;  %v392_v15 = vmul.f32 %v376_v6, %v845_v60  ;;  %v643_v26 = vpop.f32.mrf.mxu0  ;;  %v651_v30 = vpop.f32.mrf.mxu1 }
  0xf9   : > { %684 = vtanh.f32 %v433_v7  ;;  %v431_v17 = vmul.f32 0.7978846, %v415_v9  ;;  %v439_v18 = vmul.f32 0.7978846, %v423_v10  ;;  %v860_v19 = vadd.f32 %v642_v61, %v805_v32 }
  0xfa   : > { %686 = vtanh.f32 %v441_v8  ;;  %v418_v20 = vadd.f32 %v402_v12, %v830_v49  ;;  %v426_v21 = vadd.f32 %v410_v13, %v833_v50  ;;  %v400_v22 = vmul.f32 0.044715, %v384_v14  ;;  %v323_v46 = vpop.f32.mrf.mxu0  ;;  %v355_v52 = vpop.f32.mrf.mxu1 }
  0xfb   : > { %688 = vtanh.f32 %v431_v17  ;;  %v408_v23 = vmul.f32 0.044715, %v392_v15  ;;  %v373_v24 = vmul.f32 %v860_v19, %v860_v19  ;;  %v867_v25 = vadd.f32 %v650_v62, %v805_v32 }
  0xfc   : > { %690 = vtanh.f32 %v439_v18  ;;  %v434_v27 = vmul.f32 0.7978846, %v418_v20  ;;  %v442_v28 = vmul.f32 0.7978846, %v426_v21  ;;  %v416_v29 = vadd.f32 %v400_v22, %v842_v59 }
  0xfd   : > { %v424_v31 = vadd.f32 %v408_v23, %v845_v60  ;;  %v389_v33 = vmul.f32 %v373_v24, %v860_v19  ;;  %v381_v34 = vmul.f32 %v867_v25, %v867_v25  ;;  %v875_v37 = vadd.f32 %v805_v32, %v320_v11 }
  0xfe   : > { %692 = vtanh.f32 %v434_v27  ;;  %v432_v38 = vmul.f32 0.7978846, %v416_v29  ;;  %v878_v39 = vadd.f32 %v805_v32, %v352_v16  ;;  %v881_v40 = vadd.f32 %v643_v26, %v805_v32 }
  0xff   : > { %694 = vtanh.f32 %v442_v28  ;;  %v440_v43 = vmul.f32 0.7978846, %v424_v31  ;;  %v405_v44 = vmul.f32 0.044715, %v389_v33  ;;  %v397_v45 = vmul.f32 %v381_v34, %v867_v25 }
 0x100   : > { %696 = vtanh.f32 %v432_v38  ;;  %v371_v47 = vmul.f32 %v875_v37, %v875_v37  ;;  %v379_v48 = vmul.f32 %v878_v39, %v878_v39  ;;  %v374_v51 = vmul.f32 %v881_v40, %v881_v40 }
 0x101   : > { %698 = vtanh.f32 %v440_v43  ;;  %v421_v53 = vadd.f32 %v405_v44, %v860_v19  ;;  %v413_v54 = vmul.f32 0.044715, %v397_v45  ;;  %v892_v55 = vadd.f32 %v651_v30, %v805_v32 }
 0x102   : > { %v387_v56 = vmul.f32 %v371_v47, %v875_v37  ;;  %v395_v57 = vmul.f32 %v379_v48, %v878_v39  ;;  %v390_v58 = vmul.f32 %v374_v51, %v881_v40  ;;  %v898_v61 = vadd.f32 %v805_v32, %v323_v46 }
 0x103   : > { %v437_v62 = vmul.f32 0.7978846, %v421_v53  ;;  %v429_v63 = vadd.f32 %v413_v54, %v867_v25  ;;  %v382_v0 = vmul.f32 %v892_v55, %v892_v55  ;;  %v904_v1 = vadd.f32 %v805_v32, %v355_v52 }
 0x104   : > { %v403_v2 = vmul.f32 0.044715, %v387_v56  ;;  %v411_v3 = vmul.f32 0.044715, %v395_v57  ;;  %v406_v4 = vmul.f32 0.044715, %v390_v58  ;;  %v372_v5 = vmul.f32 %v898_v61, %v898_v61 }
 0x105   : > { %700 = vtanh.f32 %v437_v62  ;;  %v445_v6 = vmul.f32 0.7978846, %v429_v63  ;;  %v398_v7 = vmul.f32 %v382_v0, %v892_v55  ;;  %v380_v8 = vmul.f32 %v904_v1, %v904_v1 }
 0x106   : > { %v685_v9 = vpop.eup %684  ;;  %v419_v10 = vadd.f32 %v403_v2, %v875_v37  ;;  %v427_v11 = vadd.f32 %v411_v3, %v878_v39  ;;  %v422_v32 = vadd.f32 %v406_v4, %v881_v40  ;;  %v388_v12 = vmul.f32 %v372_v5, %v898_v61 }
 0x107   : > { %v687_v13 = vpop.eup %686  ;;  %v465_v14 = vadd.f32 1.0, %v685_v9  ;;  %702 = vtanh.f32 %v445_v6  ;;  %v414_v15 = vmul.f32 0.044715, %v398_v7  ;;  %v396_v21 = vmul.f32 %v380_v8, %v904_v1 }
 0x108   : > { %v689_v16 = vpop.eup %688  ;;  %v473_v17 = vadd.f32 1.0, %v687_v13  ;;  %v435_v18 = vmul.f32 0.7978846, %v419_v10  ;;  %v443_v20 = vmul.f32 0.7978846, %v427_v11 }
 0x109   : > { %v691_v22 = vpop.eup %690  ;;  %v481_v23 = vmul.f32 0.5, %v465_v14  ;;  %v463_v24 = vadd.f32 1.0, %v689_v16  ;;  %v438_v26 = vmul.f32 0.7978846, %v422_v32  ;;  %v430_v27 = vadd.f32 %v414_v15, %v892_v55 }
 0x10a   : > { %v489_v28 = vmul.f32 0.5, %v473_v17  ;;  %v471_v29 = vadd.f32 1.0, %v691_v22  ;;  %704 = vtanh.f32 %v435_v18  ;;  %v404_v30 = vmul.f32 0.044715, %v388_v12 }
 0x10b   : > { %v693_v31 = vpop.eup %692  ;;  %v497_v33 = vmul.f32 %v481_v23, %v808_v35  ;;  %v479_v34 = vmul.f32 0.5, %v463_v24  ;;  %706 = vtanh.f32 %v443_v20  ;;  %v446_v38 = vmul.f32 0.7978846, %v430_v27 }
 0x10c   : > { %v695_v43 = vpop.eup %694  ;;  %v505_v44 = vmul.f32 %v489_v28, %v811_v36  ;;  %v487_v45 = vmul.f32 0.5, %v471_v29  ;;  %v466_v46 = vadd.f32 1.0, %v693_v31  ;;  %708 = vtanh.f32 %v438_v26 }
 0x10d   : > { %v697_v47 = vpop.eup %696  ;;  %514 = vst.msk [vmem:[%s922_s13 + $0x10] sm:$0xff] %vm511_vm0, %v497_v33  ;;  %v495_v48 = vmul.f32 %v479_v34, %v818_v41  ;;  %v474_v51 = vadd.f32 1.0, %v695_v43  ;;  %710 = vtanh.f32 %v446_v38  ;;  %v420_v35 = vadd.f32 %v404_v30, %v898_v61 }
 0x10e   : > { %v699_v52 = vpop.eup %698  ;;  %522 = vst.msk [vmem:[%s922_s13 + $0x50] sm:$0xff] %vm511_vm0, %v505_v44  ;;  %v503_v53 = vmul.f32 %v487_v45, %v821_v42  ;;  %v482_v36 = vmul.f32 0.5, %v466_v46  ;;  %v464_v54 = vadd.f32 1.0, %v697_v47  ;;  %v412_v56 = vmul.f32 0.044715, %v396_v21 }
 0x10f   : > { %512 = vst.msk [vmem:[%s922_s13] sm:$0xff] %vm511_vm0, %v495_v48  ;;  %v490_v57 = vmul.f32 0.5, %v474_v51  ;;  %v472_v58 = vadd.f32 1.0, %v699_v52  ;;  %v436_v62 = vmul.f32 0.7978846, %v420_v35 }
 0x110   : > { %520 = vst.msk [vmem:[%s922_s13 + $0x40] sm:$0xff] %vm511_vm0, %v503_v53  ;;  %v498_v41 = vmul.f32 %v482_v36, %v830_v49  ;;  %v480_v63 = vmul.f32 0.5, %v464_v54  ;;  %v428_v0 = vadd.f32 %v412_v56, %v904_v1 }
 0x111   : > { %v506_v42 = vmul.f32 %v490_v57, %v833_v50  ;;  %v488_v2 = vmul.f32 0.5, %v472_v58  ;;  %712 = vtanh.f32 %v436_v62 }
 0x112   : > { %v701_v3 = vpop.eup %700  ;;  %515 = vst.msk [vmem:[%s922_s13 + $0x18] sm:$0xff] %vm511_vm0, %v498_v41  ;;  %v496_v4 = vmul.f32 %v480_v63, %v842_v59  ;;  %v444_v5 = vmul.f32 0.7978846, %v428_v0 }
 0x113   : > { %523 = vst.msk [vmem:[%s922_s13 + $0x58] sm:$0xff] %vm511_vm0, %v506_v42  ;;  %v504_v6 = vmul.f32 %v488_v2, %v845_v60  ;;  %v469_v49 = vadd.f32 1.0, %v701_v3 }
 0x114   : > { %v703_v7 = vpop.eup %702  ;;  %513 = vst.msk [vmem:[%s922_s13 + $0x8] sm:$0xff] %vm511_vm0, %v496_v4  ;;  %714 = vtanh.f32 %v444_v5 }
 0x115   : > { %521 = vst.msk [vmem:[%s922_s13 + $0x48] sm:$0xff] %vm511_vm0, %v504_v6  ;;  %v485_v50 = vmul.f32 0.5, %v469_v49  ;;  %v477_v8 = vadd.f32 1.0, %v703_v7 }
 0x117   : > { %v705_v9 = vpop.eup %704  ;;  %v501_v10 = vmul.f32 %v485_v50, %v860_v19  ;;  %v493_v59 = vmul.f32 0.5, %v477_v8 }
 0x118   : > { %v707_v11 = vpop.eup %706  ;;  %v467_v32 = vadd.f32 1.0, %v705_v9 }
 0x119   : > { %v709_v12 = vpop.eup %708  ;;  %518 = vst.msk [vmem:[%s922_s13 + $0x30] sm:$0xff] %vm511_vm0, %v501_v10  ;;  %v509_v60 = vmul.f32 %v493_v59, %v867_v25  ;;  %v475_v13 = vadd.f32 1.0, %v707_v11 }
 0x11a   : > { %v711_v14 = vpop.eup %710  ;;  %v483_v15 = vmul.f32 0.5, %v467_v32  ;;  %v470_v16 = vadd.f32 1.0, %v709_v12 }
 0x11b   : > { %526 = vst.msk [vmem:[%s922_s13 + $0x70] sm:$0xff] %vm511_vm0, %v509_v60  ;;  %v491_v17 = vmul.f32 0.5, %v475_v13  ;;  %v478_v19 = vadd.f32 1.0, %v711_v14 }
 0x11c   : > { %v499_v18 = vmul.f32 %v483_v15, %v875_v37  ;;  %v486_v20 = vmul.f32 0.5, %v470_v16 }
 0x11d   : > { %v507_v21 = vmul.f32 %v491_v17, %v878_v39  ;;  %v494_v22 = vmul.f32 0.5, %v478_v19 }
 0x11e   : > { %v713_v23 = vpop.eup %712  ;;  %516 = vst.msk [vmem:[%s922_s13 + $0x20] sm:$0xff] %vm511_vm0, %v499_v18  ;;  %v502_v25 = vmul.f32 %v486_v20, %v881_v40 }
 0x11f   : > { %524 = vst.msk [vmem:[%s922_s13 + $0x60] sm:$0xff] %vm511_vm0, %v507_v21  ;;  %v510_v24 = vmul.f32 %v494_v22, %v892_v55  ;;  %v468_v26 = vadd.f32 1.0, %v713_v23 }
 0x120   : > { %519 = vst.msk [vmem:[%s922_s13 + $0x38] sm:$0xff] %vm511_vm0, %v502_v25 }
 0x121   : > { %v715_v27 = vpop.eup %714  ;;  %527 = vst.msk [vmem:[%s922_s13 + $0x78] sm:$0xff] %vm511_vm0, %v510_v24  ;;  %v484_v37 = vmul.f32 0.5, %v468_v26 }
 0x122   : > { %v476_v28 = vadd.f32 1.0, %v715_v27 }
 0x123   : > { %v500_v39 = vmul.f32 %v484_v37, %v898_v61 }
 0x124   : > { %v492_v29 = vmul.f32 0.5, %v476_v28 }
 0x125   : > { %517 = vst.msk [vmem:[%s922_s13 + $0x28] sm:$0xff] %vm511_vm0, %v500_v39 }
 0x126   : > { %v508_v30 = vmul.f32 %v492_v29, %v904_v1 }
 0x128   : > { %525 = vst.msk [vmem:[%s922_s13 + $0x68] sm:$0xff] %vm511_vm0, %v508_v30 }
 0x129 PF: > { %s13_s12 = sadd.s32 1, %s722_s12  }
 0x12a   : > { %p10_p4 = scmp.ge.s32.totalorder %s13_s12, 4  }
 0x12c   :  { %12 = sbr.rel (!%p10_p4) target bundleno = 1 (0x1), region = 62 }

// kernel: svtr_forward.9
= control target key start
LH: loop header
LB: loop body
LE: loop exit
PB: predicated region body
PF: predicated region fallthrough
CT: control target
= control target key end

     0   :  { %s7612_s0 = inlined_call_operand.vmem [shape: f32[2,32,384], index: 0, kind: input, shape index: {}]   ;;  %s7613_s1 = inlined_call_operand.vmem [shape: bf16[384,64], index: 1, kind: input, shape index: {}]   ;;  %s7614_s2 = inlined_call_operand.vmem [shape: f32[1,64], index: 2, kind: input, shape index: {}]   ;;  %s7615_s3 = inlined_call_operand.vmem [shape: f32[1,32,64], index: 3, kind: input, shape index: {}]   ;;  %s7616_s4 = inlined_call_operand.vmem [shape: f32[2,1,64], index: 4, kind: input, shape index: {}]   ;;  %s7617_s5 = inlined_call_operand.vmem [shape: f32[2,1,64], index: 5, kind: input, shape index: {}]   ;;  %s7618_s6 = inlined_call_operand.vmem [shape: bf16[2,64,192], index: 6, kind: input, shape index: {}]   ;;  %s7619_s7 = inlined_call_operand.vmem [shape: f32[2,1,192], index: 7, kind: input, shape index: {}]   ;;  %s7620_s8 = inlined_call_operand.vmem [shape: bf16[2,64,64], index: 8, kind: input, shape index: {}]   ;;  %s7621_s9 = inlined_call_operand.vmem [shape: f32[2,1,64], index: 9, kind: input, shape index: {}]   ;;  %s7622_s10 = inlined_call_operand.vmem [shape: f32[2,1,64], index: 10, kind: input, shape index: {}]   ;;  %s7623_s11 = inlined_call_operand.vmem [shape: f32[2,1,64], index: 11, kind: input, shape index: {}]   ;;  %s7624_s12 = inlined_call_operand.vmem [shape: bf16[2,64,128], index: 12, kind: input, shape index: {}]   ;;  %s7625_s13 = inlined_call_operand.vmem [shape: f32[2,1,128], index: 13, kind: input, shape index: {}]   ;;  %s7626_s14 = inlined_call_operand.vmem [shape: bf16[2,128,64], index: 14, kind: input, shape index: {}]   ;;  %s7627_s15 = inlined_call_operand.vmem [shape: f32[2,1,64], index: 15, kind: input, shape index: {}]   ;;  %s7628_s16 = inlined_call_operand.vmem [shape: f32[1,64], index: 16, kind: input, shape index: {}]   ;;  %s7629_s17 = inlined_call_operand.vmem [shape: f32[1,64], index: 17, kind: input, shape index: {}]   ;;  %s7630_s18 = inlined_call_operand.vmem [shape: bf16[64,192], index: 18, kind: input, shape index: {}]   ;;  %s7631_s19 = inlined_call_operand.vmem [shape: f32[1,192], index: 19, kind: input, shape index: {}]   ;;  %s7632_s20 = inlined_call_operand.vmem [shape: bf16[192,40], index: 20, kind: input, shape index: {}]   ;;  %s7633_s21 = inlined_call_operand.vmem [shape: f32[1,40], index: 21, kind: input, shape index: {}]   ;;  %s7634_s22 = inlined_call_operand.hbm [shape: f32[2,8,40], index: 22, kind: output, shape index: {}]  }
   0x1   :  { %7665 = sst [smem:[#allocation11_spill]] %s7612_s0 }
   0x2   :  { %7666 = sst [smem:[#allocation12_spill]] %s7613_s1 }
   0x3   :  { %7667 = sst [smem:[#allocation13_spill]] %s7614_s2 }
   0x4   :  { %7668 = sst [smem:[#allocation14_spill]] %s7615_s3 }
   0x5   :  { %7669 = sst [smem:[#allocation15_spill]] %s7616_s4 }
   0x6   :  { %7670 = sst [smem:[#allocation16_spill]] %s7617_s5 }
   0x7   :  { %7671 = sst [smem:[#allocation17_spill]] %s7618_s6 }
   0x8   :  { %7672 = sst [smem:[#allocation18_spill]] %s7619_s7 }
   0x9   :  { %7673 = sst [smem:[#allocation19_spill]] %s7634_s22 }
   0xa   :  { %27 = vsyncpa [#allocation3], 0 }
   0xb   :  { %29 = vsyncpa [#allocation3 + $0x1], 0  ;;  %s6398_s3 = smov 0   ;;  %s6400_s28 = smov 0  }
   0xc   :  { %s6402_s29 = smov 0   ;;  %s6404_s30 = smov 0  }
   0xd LB: > { %7674 = sst [smem:[#allocation5_spill]] %s6260_s3  ;;  %s6419_s4 = sadd.s32 4294967295, %s6272_s30   ;;  %s6272_s30 = sphi %s6404_s30, %s7704_s30   ;;  %s6268_s29 = sphi %s6402_s29, %s7706_s29   ;;  %s6264_s28 = sphi %s6400_s28, %s7708_s28   ;;  %s6260_s3 = sphi %s6398_s3, %s7707_s3  }
   0xe   : > { %7675 = sst [smem:[#allocation6_spill]] %s6268_s29  ;;  %s4992_s0 = sadd.s32 4294967294, %s6272_s30  }
   0xf   : > { %7676 = sst [smem:[#allocation7_spill]] %s6272_s30  ;;  %s6423_s23 = sadd.s32 1, %s6272_s30  }
  0x10   : > { %7677 = sst [smem:[#allocation8_spill]] %s6423_s23  ;;  %s509_s1 = sadd.s32 1, %s6268_s29 }
  0x11   : > { %s506_s5 = ssub.s32 %s6272_s30, %s6423_s23  ;;  %p519_p0 = scmp.ne.s32.totalorder %s6268_s29, %s6264_s28 }
  0x12   : > { %p507_p1 = scmp.eq.s32.totalorder %s506_s5, 0  ;;  %p520_p2 = scmp.eq.s32.totalorder %s6419_s4, 1 }
  0x13   : > { %p525_p3 = scmp.ne.s32.totalorder %s6264_s28, %s6260_s3  ;;  %p526_p4 = scmp.eq.s32.totalorder %s4992_s0, 1 }
  0x14   : > { %s6434_s24 = scalar_select %p507_p1, %s6268_s29, %s509_s1  }
  0x15   : > { %p6436_p5 = por %p520_p2, %p519_p0  ;;  %p6440_p6 = por %p526_p4, %p525_p3 }
  0x16   : > { %7678 = sst [smem:[#allocation9_spill]] %s6434_s24  ;;  %p4995_p7 = scmp.ge.s32.totalorder %s6272_s30, 1 }
  0x17   : > { %s7680_s25 = scalar_select %p6440_p6, 1, 0 }
  0x18   : > { %p615_p8 = scmp.lt.s32.totalorder %s6272_s30, 3 }
  0x19   : > { %7681 = sst [smem:[#allocation10_spill]] %s7680_s25 }
  0x1a   : > { %p616_p9 = pnand %p4995_p7, %p615_p8 }
  0x1b   : > { %s7682_s27 = sld [smem:[#allocation12_spill]] (!%p616_p9)  ;;  %p677_p10 = scmp.lt.s32.totalorder (!%p616_p9), %s6419_s4, 1 }
  0x1c   : > { %619 = sbr.rel (%p616_p9) target bundleno = 7949 (0x1f0d), region = 108  ;;  %s7683_s29 = sld [smem:[#allocation11_spill]] (!%p616_p9) }
  0x1d   : > { %s7684_s1 = sld [smem:[#allocation13_spill]] (!%p616_p9)  ;;  %s7654_s26 = smov (!%p616_p9), 32  }
  0x1e   : > { %s7685_s30 = sld [smem:[#allocation14_spill]] (!%p616_p9)  ;;  %s7650_s24 = smov (!%p616_p9), 16  }
  0x1f   : > { %s7689_s3 = sld [smem:[#allocation15_spill]] (!%p616_p9)  ;;  %s7648_s0 = smov (!%p616_p9), 80  }
  0x20   : > { %s7692_s7 = sld [smem:[#allocation18_spill]] (!%p616_p9) }
  0x21   : > { %v5920_v0 = vld [vmem:[%s7682_s27 + $0x78] sm:$0xff]   ;;  %v5923_v3 = vld [vmem:[%s7682_s27 + $0x70] sm:$0xff]   ;;  %v5926_v6 = vld [vmem:[%s7682_s27 + $0x68] sm:$0xff]   ;;  %s678_s2 = scalar_select %p677_p10, %s6419_s4, 1  ;;  %vm1008_vm0 = vcmask 523264   ;;  %vm1215_vm1 = vcmask 130048  }
  0x22   : > { %v5921_v1 = vld [vmem:[%s7682_s27 + $0xb8] sm:$0xff]   ;;  %5270 = vmatprep.subr.bf16.mxu0 %v5920_v0  ;;  %v5924_v4 = vld [vmem:[%s7682_s27 + $0xb0] sm:$0xff]   ;;  %v5927_v7 = vld [vmem:[%s7682_s27 + $0xa8] sm:$0xff]   ;;  %vm1321_vm2 = vcmask 261120   ;;  %vm2345_vm3 = vcmask 392192   ;;  %vm4906_vm4 = vcmask 326656  }
  0x23   : > { %v5922_v2 = vld [vmem:[%s7682_s27 + $0x38] sm:$0xff]   ;;  %5480 = vmatprep.subr.bf16.mxu1 %v5921_v1  ;;  %v5925_v5 = vld [vmem:[%s7682_s27 + $0x30] sm:$0xff]   ;;  %v5928_v8 = vld [vmem:[%s7682_s27 + $0x28] sm:$0xff]   ;;  %s5812_s23 = smul.u32 96, %s678_s2 }
  0x24   : > { %5271 = vmatpush3.bf16.msra.mxu0 %v5922_v2  ;;  %5481 = vmatpush3.bf16.msra.mxu1 %v5921_v1  ;;  %v5929_v9 = vld [vmem:[%s7682_s27 + $0x60] sm:$0xff]   ;;  %v5932_v12 = vld [vmem:[%s7682_s27 + $0x58] sm:$0xff]   ;;  %v5935_v15 = vld [vmem:[%s7682_s27 + $0x50] sm:$0xff]   ;;  %s7686_s22 = smov %s7685_s30 }
  0x25   : > { %5272 = vmatprep.subr.bf16.mxu0 %v5923_v3  ;;  %5482 = vmatprep.subr.bf16.mxu1 %v5924_v4  ;;  %v5930_v10 = vld [vmem:[%s7682_s27 + $0xa0] sm:$0xff]   ;;  %v5933_v13 = vld [vmem:[%s7682_s27 + $0x98] sm:$0xff]   ;;  %v5936_v16 = vld [vmem:[%s7682_s27 + $0x90] sm:$0xff]   ;;  %s6511_s2 = scalar_lea.vmem %s7683_s29, %s5812_s23  ;;  %s7687_s29 = sld [smem:[#allocation17_spill]] }
  0x26   : > { %v5931_v11 = vld [vmem:[%s7682_s27 + $0x20] sm:$0xff]   ;;  %v5934_v14 = vld [vmem:[%s7682_s27 + $0x18] sm:$0xff]   ;;  %v5937_v17 = vld [vmem:[%s7682_s27 + $0x10] sm:$0xff]   ;;  %s7690_s5 = smov %s7689_s3  ;;  %s7660_s23 = smov 48  }
  0x27   : > { %v5938_v18 = vld [vmem:[%s7682_s27 + $0x48] sm:$0xff]   ;;  %v687_v22 = vld [vmem:[%s6511_s2 + $0x20] sm:$0xff]  ;;  %v685_v23 = vld [vmem:[%s6511_s2 + $0x10] sm:$0xff] }
  0x28   : > { %5273 = vmatpush3.bf16.msra.mxu0 %v5925_v5  ;;  %5483 = vmatpush3.bf16.msra.mxu1 %v5924_v4  ;;  %v5939_v19 = vld [vmem:[%s7682_s27 + $0x88] sm:$0xff]   ;;  %v5941_v24 = vld [vmem:[%s7682_s27 + $0x40] sm:$0xff]   ;;  %v686_v31 = vld [vmem:[%s6511_s2 + $0x18] sm:$0xff] }
  0x29   : > { %5274 = vmatprep.subr.bf16.mxu0 %v5926_v6  ;;  %5484 = vmatprep.subr.bf16.mxu1 %v5927_v7  ;;  %v5940_v20 = vld [vmem:[%s7682_s27 + $0x8] sm:$0xff]   ;;  %v5942_v25 = vld [vmem:[%s7682_s27 + $0x80] sm:$0xff]   ;;  %v694_v33 = vld [vmem:[%s6511_s2 + $0x58] sm:$0xff] }
  0x2a   : > { %v684_v21 = vld [vmem:[%s6511_s2 + $0x8] sm:$0xff]  ;;  %v5943_v28 = vld [vmem:[%s7682_s27] sm:$0xff]   ;;  %v690_v34 = vld [vmem:[%s6511_s2 + $0x38] sm:$0xff]  ;;  %s7697_s27 = smov 96  }
  0x2b   : > { %v696_v26 = vpack.c.bf16 %v687_v22, %v684_v21  ;;  %v688_v27 = vld [vmem:[%s6511_s2 + $0x28] sm:$0xff]  ;;  %v683_v30 = vld [vmem:[%s6511_s2] sm:$0xff]  ;;  %v693_v35 = vld [vmem:[%s6511_s2 + $0x50] sm:$0xff]  ;;  %s7688_s25 = smov %s7687_s29 }
  0x2c   : > { %5275 = vmatpush3.bf16.msra.mxu0 %v5928_v8  ;;  %5485 = vmatpush3.bf16.msra.mxu1 %v5927_v7  ;;  %v697_v29 = vpack.c.bf16 %v688_v27, %v685_v23  ;;  %v691_v32 = vld [vmem:[%s6511_s2 + $0x40] sm:$0xff]  ;;  %v695_v36 = vpack.c.bf16 %v686_v31, %v683_v30  ;;  %v699_v38 = vpack.c.bf16 %v693_v35, %v690_v34  ;;  %v689_v39 = vld [vmem:[%s6511_s2 + $0x30] sm:$0xff]  ;;  %v692_v40 = vld [vmem:[%s6511_s2 + $0x48] sm:$0xff]  ;;  %s7658_s2 = smov 64  }
  0x2d   : > { %5276 = vmatprep.subr.bf16.mxu0 %v5929_v9  ;;  %5486 = vmatprep.subr.bf16.mxu1 %v5930_v10  ;;  %v700_v37 = vpack.c.bf16 %v694_v33, %v691_v32  ;;  %v698_v41 = vpack.c.bf16 %v692_v40, %v689_v39  ;;  %v4998_v45 = vld [vmem:[%s7684_s1] ss:$0 sm:$0xff]  ;;  %v999_v59 = vld [vmem:[%s7686_s22 + $0x8] sm:$0xff]  ;;  %v1000_v4 = vld [vmem:[%s7686_s22 + $0x10] sm:$0xff]  ;;  %s7691_s1 = sld [smem:[#allocation16_spill]] }
  0x2e   : > { %932 = vmatprep.mubr.bf16.mxu0 %v696_v26  ;;  %5496 = vmatprep.mubr.bf16.mxu1 %v697_v29  ;;  %v998_v50 = vld [vmem:[%s7685_s30] sm:$0xff]  ;;  %v5946_v35 = vld [vmem:[%s7687_s29 + $0x34] ss:$8 sps:$4 sm:$0xff]   ;;  %v5950_v40 = vld [vmem:[%s7688_s25 + $0x10] ss:$8 sps:$4 sm:$0xff]   ;;  %s7695_s29 = smov 112  }
  0x2f   : > { %v5952_v39 = vld [vmem:[%s7688_s25 + $0x14] ss:$8 sps:$4 sm:$0xff]   ;;  %s7696_s30 = smov 32  }
  0x30   : > { %5277 = vmatpush3.bf16.msra.mxu0 %v5931_v11  ;;  %5487 = vmatpush3.bf16.msra.mxu1 %v5930_v10  ;;  %v1001_v10 = vld [vmem:[%s7686_s22 + $0x18] sm:$0xff]  ;;  %s7656_s22 = smov 112  }
  0x31   : > { %5278 = vmatprep.subr.bf16.mxu0 %v5932_v12  ;;  %5488 = vmatprep.subr.bf16.mxu1 %v5933_v13 }
  0x34   : > { %5279 = vmatpush3.bf16.msra.mxu0 %v5934_v14  ;;  %5489 = vmatpush3.bf16.msra.mxu1 %v5933_v13 }
  0x35   : > { %5280 = vmatprep.subr.bf16.mxu0 %v5935_v15  ;;  %5490 = vmatprep.subr.bf16.mxu1 %v5936_v16 }
  0x38   : > { %5281 = vmatpush3.bf16.msra.mxu0 %v5937_v17  ;;  %5491 = vmatpush3.bf16.msra.mxu1 %v5936_v16 }
  0x39   : > { %5282 = vmatprep.subr.bf16.mxu0 %v5938_v18  ;;  %5492 = vmatprep.subr.bf16.mxu1 %v5939_v19 }
  0x3c   : > { %5283 = vmatpush3.bf16.msra.mxu0 %v5940_v20  ;;  %5493 = vmatpush3.bf16.msra.mxu1 %v5939_v19 }
  0x3d   : > { %5284 = vmatprep.subr.bf16.mxu0 %v5941_v24  ;;  %5494 = vmatprep.subr.bf16.mxu1 %v5942_v25 }
  0x40   : > { %5285 = vmatpush3.bf16.msra.mxu0 %v5943_v28  ;;  %5495 = vmatpush3.bf16.msra.mxu1 %v5942_v25 }
  0x41   : > { %1158 = vmatprep.subr.bf16.mxu0 %v5946_v35 }
  0x43   : > { %933 = vmatmul.mubr.bf16.vlgmr.msra.gmra.mxu0 %v695_v36  ;;  %5497 = vmatmul.mubr.bf16.vlgmr.msra.gmra.mxu1 %v700_v37  ;;  %v5944_v36 = vld [vmem:[%s7688_s25 + $0x30] ss:$8 sps:$4 sm:$0xff]   ;;  %v5949_v37 = vld [vmem:[%s7688_s25 + $0x24] ss:$8 sps:$4 sm:$0xff]  }
  0x44   : > { %940 = vmatprep.mubr.bf16.mxu0 %v699_v38  ;;  %1159 = vmatpush1.bf16.msra.mxu0 %v5944_v36  ;;  %v5947_v38 = vld [vmem:[%s7688_s25 + $0x20] ss:$8 sps:$4 sm:$0xff]  }
  0x45   : > { %1160 = vmatprep.subr.bf16.mxu0 %v5949_v37 }
  0x48   : > { %1161 = vmatpush1.bf16.msra.mxu0 %v5947_v38 }
  0x49   : > { %1162 = vmatprep.subr.bf16.mxu0 %v5952_v39 }
  0x4b   : > { %941 = vmatmul.mubr.bf16.gmra.mxu0 %v698_v41  ;;  %v5953_v41 = vld [vmem:[%s7688_s25] ss:$8 sps:$4 sm:$0xff]  }
  0x4c   : > { %1163 = vmatpush1.bf16.msra.mxu0 %v5950_v40 }
 0x103   : > { %v5286_v42 = vpop.f32.mrf.mxu0  ;;  %v5498_v43 = vpop.f32.mrf.mxu1 }
 0x105   : > { %v5287_v44 = vpop.f32.mrf.mxu0  ;;  %v983_v46 = vpop.f32.mrf.mxu1 }
 0x106   : > { %v5288_v47 = vadd.f32 %v5287_v44, %v5286_v42  ;;  %v5955_v42 = vld [vmem:[%s7688_s25 + $0x4] ss:$8 sps:$4 sm:$0xff]  }
 0x107   : > { %v5289_v48 = vpop.f32.mrf.mxu0  ;;  %v5499_v51 = vpop.f32.mrf.mxu1  ;;  %1164 = vmatprep.subr.bf16.mxu0 %v5955_v42 }
 0x108   : > { %v935_v49 = vadd.f32 %v5288_v47, %v4998_v45  ;;  %1165 = vmatpush1.bf16.msra.mxu0 %v5953_v41 }
 0x109   : > { %v5290_v52 = vpop.f32.mrf.mxu0  ;;  %v986_v58 = vpop.f32.mrf.mxu1 }
 0x10a   : > { %v984_v53 = vadd.f32 %v983_v46, %v935_v49  ;;  %v5291_v54 = vadd.f32 %v5290_v52, %v5289_v48 }
 0x10b   : > { %v5292_v55 = vpop.f32.mrf.mxu0 }
 0x10c   : > { %v6543_v56 = vadd.f32 %v998_v50, %v984_v53  ;;  %v938_v57 = vadd.f32 %v5291_v54, %v4998_v45 }
 0x10d   : > { %v5293_v60 = vpop.f32.mrf.mxu0 }
 0x10e   : > { %v987_v61 = vadd.f32 %v986_v58, %v938_v57  ;;  %v5294_v62 = vadd.f32 %v5293_v60, %v5292_v55  ;;  %v1009_v63 = vsel %vm1008_vm0, %v6543_v56, 0.0 }
 0x10f   : > { %v5295_v0 = vpop.f32.mrf.mxu0  ;;  %1010 = vadd.xlane.f32.xlu0 %v1009_v63  ;;  %v5024_v63 = vld [vmem:[%s7691_s1] ss:$0 sm:$0xff] }
 0x110   : > { %v6550_v1 = vadd.f32 %v999_v59, %v987_v61  ;;  %v943_v2 = vadd.f32 %v5294_v62, %v4998_v45  ;;  %v5023_v59 = vld [vmem:[%s7689_s3] ss:$0 sm:$0xff]  ;;  %s7652_s3 = smov 96  }
 0x111   : > { %v5296_v3 = vpop.f32.mrf.mxu0 }
 0x112   : > { %v992_v5 = vadd.f32 %v5498_v43, %v943_v2  ;;  %v5297_v6 = vadd.f32 %v5296_v3, %v5295_v0  ;;  %v1012_v7 = vsel %vm1008_vm0, %v6550_v1, 0.0  ;;  %v6274_v43 = vmov 0  }
 0x113   : > { %1013 = vadd.xlane.f32.xlu0 %v1012_v7  ;;  %1182 = vmatprep.mubr.bf16.mxu0 %v6274_v43 }
 0x114   : > { %v946_v8 = vadd.f32 %v5297_v6, %v4998_v45  ;;  %v6557_v9 = vadd.f32 %v1000_v4, %v992_v5 }
 0x116   : > { %v995_v11 = vadd.f32 %v5499_v51, %v946_v8  ;;  %v1015_v12 = vsel %vm1008_vm0, %v6557_v9, 0.0 }
 0x117   : > { %1016 = vadd.xlane.f32.xlu1 %v1015_v12 }
 0x118   : > { %v6564_v13 = vadd.f32 %v1001_v10, %v995_v11 }
 0x11a   : > { %v1018_v14 = vsel %vm1008_vm0, %v6564_v13, 0.0 }
 0x11b   : > { %1019 = vadd.xlane.f32.xlu1 %v1018_v14 }
 0x198   : > { %v1011_v15 = vpop.xlane.xlu0 %1010 }
 0x199   : > { %v1022_v16 = vmul.f32 0.015625, %v1011_v15 }
 0x19b   : > { %v1026_v17 = vsub.f32 %v6543_v56, %v1022_v16  ;;  %v1094_v16 = vlaneseq }
 0x19c   : > { %v1014_v18 = vpop.xlane.xlu0 %1013 }
 0x19d   : > { %v1023_v19 = vmul.f32 0.015625, %v1014_v18  ;;  %v1030_v20 = vmul.f32 %v1026_v17, %v1026_v17 }
 0x19f   : > { %v1027_v21 = vsub.f32 %v6550_v1, %v1023_v19  ;;  %v1034_v22 = vsel %vm1008_vm0, %v1030_v20, 0.0  ;;  %v1092_v19 = vld [vmem:[%s7692_s7] sm:$0x3] }
 0x1a0   : > { %v1017_v23 = vpop.xlane.xlu1 %1016  ;;  %1035 = vadd.xlane.f32.xlu0 %v1034_v22 }
 0x1a1   : > { %v1024_v24 = vmul.f32 0.015625, %v1017_v23  ;;  %v1031_v25 = vmul.f32 %v1027_v21, %v1027_v21 }
 0x1a3   : > { %v1028_v26 = vsub.f32 %v6557_v9, %v1024_v24  ;;  %v1037_v27 = vsel %vm1008_vm0, %v1031_v25, 0.0 }
 0x1a4   : > { %v1020_v28 = vpop.xlane.xlu1 %1019  ;;  %1038 = vadd.xlane.f32.xlu1 %v1037_v27 }
 0x1a5   : > { %v1025_v29 = vmul.f32 0.015625, %v1020_v28  ;;  %v1032_v30 = vmul.f32 %v1028_v26, %v1028_v26 }
 0x1a7   : > { %v1029_v31 = vsub.f32 %v6564_v13, %v1025_v29  ;;  %v1040_v32 = vsel %vm1008_vm0, %v1032_v30, 0.0 }
 0x1a8   : > { %1041 = vadd.xlane.f32.xlu0 %v1040_v32 }
 0x1a9   : > { %v1033_v33 = vmul.f32 %v1029_v31, %v1029_v31 }
 0x1ab   : > { %v1043_v34 = vsel %vm1008_vm0, %v1033_v33, 0.0 }
 0x1ac   : > { %1044 = vadd.xlane.f32.xlu1 %v1043_v34 }
 0x229   : > { %v1036_v44 = vpop.xlane.xlu0 %1035 }
 0x22a   : > { %v1046_v45 = vmul.f32 0.015625, %v1036_v44 }
 0x22c   : > { %v1050_v46 = vadd.f32 1e-05, %v1046_v45 }
 0x22d   : > { %v1039_v47 = vpop.xlane.xlu1 %1038 }
 0x22e   : > { %6024 = vrsqrt.f32 %v1050_v46  ;;  %v1047_v48 = vmul.f32 0.015625, %v1039_v47 }
 0x230   : > { %v1051_v49 = vadd.f32 1e-05, %v1047_v48 }
 0x231   : > { %v1042_v50 = vpop.xlane.xlu0 %1041 }
 0x232   : > { %6026 = vrsqrt.f32 %v1051_v49  ;;  %v1048_v51 = vmul.f32 0.015625, %v1042_v50 }
 0x234   : > { %v1052_v52 = vadd.f32 1e-05, %v1048_v51 }
 0x235   : > { %v1045_v53 = vpop.xlane.xlu1 %1044 }
 0x236   : > { %6028 = vrsqrt.f32 %v1052_v52  ;;  %v1049_v54 = vmul.f32 0.015625, %v1045_v53 }
 0x238   : > { %v1053_v55 = vadd.f32 1e-05, %v1049_v54 }
 0x23a   : > { %6030 = vrsqrt.f32 %v1053_v55 }
 0x23b   : > { %v6025_v57 = vpop.eup %6024 }
 0x23c   : > { %v1058_v58 = vmul.f32 %v6025_v57, %v1026_v17  ;;  %v1095_v17 = vshrl.u32 %v1094_v16, 7 }
 0x23e   : > { %v1068_v61 = vmul.f32 %v5023_v59, %v1058_v58  ;;  %v6610_v18 = vsub.s32 0, %v1095_v17  ;;  %v6620_v27 = vsub.s32 1, %v1095_v17 }
 0x23f   : > { %v6027_v60 = vpop.eup %6026 }
 0x240   : > { %v1059_v62 = vmul.f32 %v6027_v60, %v1027_v21  ;;  %v1078_v3 = vadd.f32 %v5024_v63, %v1068_v61  ;;  %v1097_v20 = vrot.slane %v1092_v19, %v6610_v18 }
 0x242   : > { %v1069_v0 = vmul.f32 %v5023_v59, %v1059_v62 }
 0x243   : > { %v6029_v2 = vpop.eup %6028 }
 0x244   : > { %v1079_v4 = vadd.f32 %v5024_v63, %v1069_v0  ;;  %v1060_v5 = vmul.f32 %v6029_v2, %v1028_v26 }
 0x246   : > { %v1082_v6 = vpack.c.bf16 %v1079_v4, %v1078_v3  ;;  %v1070_v10 = vmul.f32 %v5023_v59, %v1060_v5 }
 0x247   : > { %v6031_v7 = vpop.eup %6030 }
 0x248   : > { %5033 = vmatmul.mubr.msk.bf16.vlgmr.msra.gmra.mxu0 %vm1008_vm0, %v1082_v6  ;;  %v1061_v8 = vmul.f32 %v6031_v7, %v1029_v31  ;;  %v1080_v12 = vadd.f32 %v5024_v63, %v1070_v10  ;;  %v1101_v31 = vrot.slane %v1092_v19, %v6620_v27 }
 0x249   : > { %1192 = vmatprep.mubr.bf16.mxu0 %v6274_v43 }
 0x24a   : > { %v1071_v11 = vmul.f32 %v5023_v59, %v1061_v8 }
 0x24c   : > { %v1081_v14 = vadd.f32 %v5024_v63, %v1071_v11 }
 0x24e   : > { %v1083_v15 = vpack.c.bf16 %v1081_v14, %v1080_v12 }
 0x250   : > { %5034 = vmatmul.mubr.msk.bf16.gmra.mxu0 %vm1008_vm0, %v1083_v15 }
 0x308   : > { %v1184_v21 = vpop.f32.mrf.mxu0 }
 0x309   : > { %v6616_v22 = vadd.f32 %v1184_v21, %v1097_v20 }
 0x30a   : > { %v1186_v23 = vpop.f32.mrf.mxu0 }
 0x30b   : > { %5508 = vmatprep.mubr.msk.f32.mxu0 %vm1215_vm1, %v6616_v22  ;;  %v6649_v38 = vadd.f32 %v1186_v23, %v1101_v31 }
 0x30c   : > { %v1188_v24 = vpop.f32.mrf.mxu0 }
 0x30d   : > { %v6627_v32 = vadd.f32 %v1188_v24, %v1097_v20 }
 0x30e   : > { %v1190_v25 = vpop.f32.mrf.mxu0 }
 0x30f   : > { %v6641_v37 = vadd.f32 %v1190_v25, %v1101_v31 }
 0x310   : > { %v1194_v26 = vpop.f32.mrf.mxu0 }
 0x311   : > { %v6622_v28 = vadd.f32 %v1194_v26, %v1097_v20 }
 0x312   : > { %v1196_v29 = vpop.f32.mrf.mxu0 }
 0x313   : > { %1211 = vrot.lane.b32.xlu1 %v6622_v28, %s7658_s2  ;;  %v6637_v36 = vadd.f32 %v1196_v29, %v1101_v31 }
 0x314   : > { %v1198_v30 = vpop.f32.mrf.mxu0 }
 0x315   : > { %v6629_v33 = vadd.f32 %v1198_v30, %v1097_v20 }
 0x316   : > { %v1200_v34 = vpop.f32.mrf.mxu0 }
 0x317   : > { %v6631_v35 = vadd.f32 %v1200_v34, %v1101_v31  ;;  %1213 = vrot.lane.b32.xlu0 %v6629_v33, %s7658_s2  ;;  %1209 = vrot.lane.b32.xlu1 %v6627_v32, %s7658_s2 }
 0x319   : > { %5514 = vmatprep.subr.mxu1 %v6631_v35 }
 0x31a   : > { %5515 = vmatpush3.msra.mxu1 %v6631_v35 }
 0x31b   : > { %1477 = vrot.lane.b32.xlu0 %v6629_v33, %s7660_s23  ;;  %5516 = vmatprep.subr.mxu1 %v6637_v36 }
 0x31c   : > { %1207 = vrot.lane.b32.xlu1 %v6616_v22, %s7658_s2  ;;  %5517 = vmatpush3.msra.mxu1 %v6637_v36  ;;  %s7699_s2 = smov 80  }
 0x31d   : > { %5518 = vmatprep.subr.mxu1 %v6641_v37 }
 0x31e   : > { %5519 = vmatpush3.msra.mxu1 %v6641_v37 }
 0x31f   : > { %1473 = vrot.lane.b32.xlu0 %v6627_v32, %s7660_s23  ;;  %5520 = vmatprep.subr.mxu1 %v6649_v38 }
 0x320   : > { %1475 = vrot.lane.b32.xlu1 %v6622_v28, %s7660_s23  ;;  %5521 = vmatpush3.msra.mxu1 %v6649_v38 }
 0x323   : > { %1463 = vrot.lane.b32.xlu0 %v6616_v22, %s7656_s22 }
 0x324   : > { %1471 = vrot.lane.b32.xlu1 %v6616_v22, %s7660_s23 }
 0x327   : > { %1465 = vrot.lane.b32.xlu0 %v6627_v32, %s7656_s22 }
 0x328   : > { %1755 = vrot.lane.b32.xlu1 %v6629_v33, %s7654_s26 }
 0x32b   : > { %1751 = vrot.lane.b32.xlu0 %v6627_v32, %s7654_s26 }
 0x32c   : > { %1753 = vrot.lane.b32.xlu1 %v6622_v28, %s7654_s26 }
 0x32f   : > { %1469 = vrot.lane.b32.xlu0 %v6629_v33, %s7656_s22 }
 0x330   : > { %1467 = vrot.lane.b32.xlu1 %v6622_v28, %s7656_s22 }
 0x333   : > { %1741 = vrot.lane.b32.xlu0 %v6616_v22, %s7652_s3 }
 0x334   : > { %1749 = vrot.lane.b32.xlu1 %v6616_v22, %s7654_s26 }
 0x337   : > { %1745 = vrot.lane.b32.xlu0 %v6622_v28, %s7652_s3 }
 0x338   : > { %1743 = vrot.lane.b32.xlu1 %v6627_v32, %s7652_s3 }
 0x33c   : > { %1747 = vrot.lane.b32.xlu1 %v6629_v33, %s7652_s3 }
 0x385   : > { %v1212_v39 = vpop.permute.xlu1 %1211 }
 0x389   : > { %v1214_v40 = vpop.permute.xlu0 %1213  ;;  %v1210_v41 = vpop.permute.xlu1 %1209 }
 0x38a   : > { %5500 = vmatprep.subr.msk.mxu0 %vm1215_vm1, %v1214_v40 }
 0x38b   : > { %5501 = vmatpush3.xpose.msk.msra.mxu0 %vm1215_vm1, %v1214_v40 }
 0x38c   : > { %5502 = vmatprep.subr.msk.mxu0 %vm1215_vm1, %v1212_v39 }
 0x38d   : > { %v1478_v42 = vpop.permute.xlu0 %1477 }
 0x38e   : > { %v1208_v44 = vpop.permute.xlu1 %1207 }
 0x38f   : > { %5503 = vmatpush3.xpose.msk.msra.mxu0 %vm1215_vm1, %v1212_v39 }
 0x390   : > { %5504 = vmatprep.subr.msk.mxu0 %vm1215_vm1, %v1210_v41 }
 0x391   : > { %v1474_v45 = vpop.permute.xlu0 %1473 }
 0x392   : > { %v1476_v46 = vpop.permute.xlu1 %1475 }
 0x393   : > { %5505 = vmatpush3.xpose.msk.msra.mxu0 %vm1215_vm1, %v1210_v41 }
 0x394   : > { %5506 = vmatprep.subr.msk.mxu0 %vm1215_vm1, %v1208_v44 }
 0x395   : > { %v1464_v47 = vpop.permute.xlu0 %1463 }
 0x396   : > { %v1472_v48 = vpop.permute.xlu1 %1471 }
 0x397   : > { %5507 = vmatpush3.xpose.msk.msra.mxu0 %vm1215_vm1, %v1208_v44 }
 0x398   : > { %5528 = vmatprep.subr.msk.mxu0 %vm1215_vm1, %v1478_v42 }
 0x399   : > { %v1466_v49 = vpop.permute.xlu0 %1465 }
 0x39a   : > { %5509 = vmatmul.mubr.msk.f32.vlgmr.msra.gmra.mxu0 %vm1215_vm1, %v6627_v32  ;;  %v1756_v50 = vpop.permute.xlu1 %1755 }
 0x39b   : > { %5511 = vmatprep.mubr.msk.f32.mxu0 %vm1215_vm1, %v6622_v28  ;;  %5529 = vmatpush3.xpose.msk.msra.mxu0 %vm1215_vm1, %v1478_v42 }
 0x39c   : > { %5530 = vmatprep.subr.msk.mxu0 %vm1215_vm1, %v1476_v46 }
 0x39d   : > { %v1752_v51 = vpop.permute.xlu0 %1751 }
 0x39e   : > { %5512 = vmatmul.mubr.msk.f32.gmra.mxu0 %vm1215_vm1, %v6629_v33  ;;  %v1754_v52 = vpop.permute.xlu1 %1753 }
 0x39f   : > { %5531 = vmatpush3.xpose.msk.msra.mxu0 %vm1215_vm1, %v1476_v46  ;;  %5536 = vmatprep.mubr.msk.f32.mxu0 %vm1215_vm1, %v1464_v47 }
 0x3a0   : > { %5532 = vmatprep.subr.msk.mxu0 %vm1215_vm1, %v1474_v45 }
 0x3a1   : > { %v1470_v53 = vpop.permute.xlu0 %1469 }
 0x3a2   : > { %v1468_v54 = vpop.permute.xlu1 %1467 }
 0x3a3   : > { %5533 = vmatpush3.xpose.msk.msra.mxu0 %vm1215_vm1, %v1474_v45 }
 0x3a4   : > { %5534 = vmatprep.subr.msk.mxu0 %vm1215_vm1, %v1472_v48 }
 0x3a5   : > { %v1742_v55 = vpop.permute.xlu0 %1741 }
 0x3a6   : > { %v1750_v57 = vpop.permute.xlu1 %1749 }
 0x3a7   : > { %5535 = vmatpush3.xpose.msk.msra.mxu0 %vm1215_vm1, %v1472_v48 }
 0x3a8   : > { %5556 = vmatprep.subr.msk.mxu0 %vm1215_vm1, %v1756_v50 }
 0x3a9   : > { %v1746_v59 = vpop.permute.xlu0 %1745 }
 0x3aa   : > { %5537 = vmatmul.mubr.msk.f32.vlgmr.msra.gmra.mxu0 %vm1215_vm1, %v1466_v49  ;;  %v1744_v58 = vpop.permute.xlu1 %1743 }
 0x3ab   : > { %5539 = vmatprep.mubr.msk.f32.mxu0 %vm1215_vm1, %v1468_v54  ;;  %5557 = vmatpush3.xpose.msk.msra.mxu0 %vm1215_vm1, %v1756_v50 }
 0x3ac   : > { %5558 = vmatprep.subr.msk.mxu0 %vm1215_vm1, %v1754_v52 }
 0x3ae   : > { %5540 = vmatmul.mubr.msk.f32.gmra.mxu0 %vm1215_vm1, %v1470_v53  ;;  %v1748_v60 = vpop.permute.xlu1 %1747 }
 0x3af   : > { %5559 = vmatpush3.xpose.msk.msra.mxu0 %vm1215_vm1, %v1754_v52  ;;  %5564 = vmatprep.mubr.msk.f32.mxu0 %vm1215_vm1, %v1742_v55 }
 0x3b0   : > { %5560 = vmatprep.subr.msk.mxu0 %vm1215_vm1, %v1752_v51 }
 0x3b3   : > { %5561 = vmatpush3.xpose.msk.msra.mxu0 %vm1215_vm1, %v1752_v51 }
 0x3b4   : > { %5562 = vmatprep.subr.msk.mxu0 %vm1215_vm1, %v1750_v57 }
 0x3b7   : > { %5563 = vmatpush3.xpose.msk.msra.mxu0 %vm1215_vm1, %v1750_v57 }
 0x3ba   : > { %5565 = vmatmul.mubr.msk.f32.vlgmr.msra.gmra.mxu0 %vm1215_vm1, %v1744_v58 }
 0x3bb   : > { %5567 = vmatprep.mubr.msk.f32.mxu0 %vm1215_vm1, %v1746_v59 }
 0x3be   : > { %5568 = vmatmul.mubr.msk.f32.gmra.mxu0 %vm1215_vm1, %v1748_v60 }
 0x45a   : > { %v5510_v61 = vpop.f32.mrf.mxu0 }
 0x45b   : > { %v1318_v62 = vmul.f32 0.25, %v5510_v61 }
 0x45c   : > { %v1298_v63 = vpop.f32.mrf.mxu0 }
 0x45d   : > { %v1317_v0 = vmul.f32 0.25, %v1298_v63  ;;  %v1325_v2 = vsel %vm1321_vm2, %v1318_v62, -inf }
 0x45e   : > { %1326 = vmax.xlane.f32.xlu1 %v1325_v2  ;;  %v5513_v3 = vpop.f32.mrf.mxu0 }
 0x45f   : > { %v1320_v4 = vmul.f32 0.25, %v5513_v3  ;;  %v1322_v5 = vsel %vm1321_vm2, %v1317_v0, -inf }
 0x460   : > { %1323 = vmax.xlane.f32.xlu0 %v1322_v5  ;;  %v1308_v6 = vpop.f32.mrf.mxu0 }
 0x461   : > { %v1319_v7 = vmul.f32 0.25, %v1308_v6  ;;  %v1331_v8 = vsel %vm1321_vm2, %v1320_v4, -inf }
 0x463   : > { %v1328_v10 = vsel %vm1321_vm2, %v1319_v7, -inf }
 0x464   : > { %1332 = vmax.xlane.f32.xlu0 %v1331_v8 }
 0x468   : > { %1329 = vmax.xlane.f32.xlu0 %v1328_v10 }
 0x46a   : > { %v5538_v11 = vpop.f32.mrf.mxu0 }
 0x46b   : > { %v1581_v12 = vmul.f32 0.25, %v5538_v11 }
 0x46c   : > { %v1561_v14 = vpop.f32.mrf.mxu0 }
 0x46d   : > { %v6727_v15 = vmul.f32 0.25, %v1561_v14  ;;  %v1587_v16 = vsel %vm1321_vm2, %v1581_v12, -inf }
 0x46e   : > { %1588 = vmax.xlane.f32.xlu1 %v1587_v16  ;;  %v5541_v17 = vpop.f32.mrf.mxu0 }
 0x46f   : > { %v6730_v19 = vmul.f32 0.25, %v5541_v17  ;;  %v1584_v20 = vsel %vm1321_vm2, %v6727_v15, -inf }
 0x470   : > { %1585 = vmax.xlane.f32.xlu0 %v1584_v20  ;;  %v1571_v21 = vpop.f32.mrf.mxu0 }
 0x471   : > { %v6734_v23 = vmul.f32 0.25, %v1571_v21  ;;  %v1593_v24 = vsel %vm1321_vm2, %v6730_v19, -inf }
 0x472   : > { %1594 = vmax.xlane.f32.xlu1 %v1593_v24 }
 0x473   : > { %v1590_v25 = vsel %vm1321_vm2, %v6734_v23, -inf }
 0x474   : > { %1591 = vmax.xlane.f32.xlu0 %v1590_v25 }
 0x47a   : > { %v5566_v26 = vpop.f32.mrf.mxu0 }
 0x47b   : > { %v6740_v29 = vmul.f32 0.25, %v5566_v26 }
 0x47c   : > { %v1839_v30 = vpop.f32.mrf.mxu0 }
 0x47d   : > { %v6742_v31 = vmul.f32 0.25, %v1839_v30  ;;  %v1865_v34 = vsel %vm1321_vm2, %v6740_v29, -inf }
 0x47e   : > { %1866 = vmax.xlane.f32.xlu1 %v1865_v34  ;;  %v5569_v39 = vpop.f32.mrf.mxu0 }
 0x47f   : > { %v1862_v40 = vsel %vm1321_vm2, %v6742_v31, -inf  ;;  %v6760_v45 = vmul.f32 0.25, %v5569_v39 }
 0x480   : > { %1863 = vmax.xlane.f32.xlu0 %v1862_v40  ;;  %v1849_v41 = vpop.f32.mrf.mxu0 }
 0x481   : > { %v6748_v42 = vmul.f32 0.25, %v1849_v41  ;;  %v1871_v46 = vsel %vm1321_vm2, %v6760_v45, -inf }
 0x483   : > { %v1868_v44 = vsel %vm1321_vm2, %v6748_v42, -inf }
 0x484   : > { %1869 = vmax.xlane.f32.xlu0 %v1868_v44 }
 0x48f   : > { %1638 = vrot.lane.b32.xlu1 %v6631_v35, %s7656_s22 }
 0x49a   : > { %1636 = vrot.lane.b32.xlu0 %v6637_v36, %s7656_s22 }
 0x49e   : > { %1908 = vrot.lane.b32.xlu0 %v6641_v37, %s7652_s3 }
 0x4a2   : > { %2029 = vrot.lane.b32.xlu0 %v6629_v33, %s7650_s24 }
 0x4b3   : > { %1872 = vmax.xlane.f32.xlu1 %v1871_v46 }
 0x4c4   : > { %1634 = vrot.lane.b32.xlu1 %v6641_v37, %s7656_s22 }
 0x4c8   : > { %1632 = vrot.lane.b32.xlu1 %v6649_v38, %s7656_s22  ;;  %s674_s22 = sand.u32 1, %s6264_s28  }
 0x4cc   : > { %1912 = vrot.lane.b32.xlu1 %v6631_v35, %s7652_s3 }
 0x4d0   : > { %1910 = vrot.lane.b32.xlu1 %v6637_v36, %s7652_s3 }
 0x4d4   : > { %1906 = vrot.lane.b32.xlu1 %v6649_v38, %s7652_s3  ;;  %s5267_s3 = sshll.u32 %s6419_s4, 7 }
 0x4e7   : > { %v1327_v47 = vpop.xlane.xlu1 %1326 }
 0x4e8   : > { %v1335_v48 = vsub.f32 %v1318_v62, %v1327_v47 }
 0x4e9   : > { %v1324_v49 = vpop.xlane.xlu0 %1323 }
 0x4ea   : > { %v1340_v50 = vmul.f32 1.442695, %v1335_v48  ;;  %v1334_v51 = vsub.f32 %v1317_v0, %v1324_v49 }
 0x4ec   : > { %6032 = vpow2.f32 %v1340_v50  ;;  %v1338_v52 = vmul.f32 1.442695, %v1334_v51 }
 0x4ed   : > { %v1333_v53 = vpop.xlane.xlu0 %1332 }
 0x4ee   : > { %6034 = vpow2.f32 %v1338_v52  ;;  %v1337_v54 = vsub.f32 %v1320_v4, %v1333_v53 }
 0x4f0   : > { %v1344_v55 = vmul.f32 1.442695, %v1337_v54 }
 0x4f1   : > { %v1330_v57 = vpop.xlane.xlu0 %1329 }
 0x4f2   : > { %6036 = vpow2.f32 %v1344_v55  ;;  %v1336_v58 = vsub.f32 %v1319_v7, %v1330_v57 }
 0x4f4   : > { %v1342_v59 = vmul.f32 1.442695, %v1336_v58 }
 0x4f6   : > { %6038 = vpow2.f32 %v1342_v59 }
 0x4f7   : > { %v1589_v60 = vpop.xlane.xlu1 %1588 }
 0x4f8   : > { %v1597_v61 = vsub.f32 %v1581_v12, %v1589_v60 }
 0x4f9   : > { %v6774_v63 = vpop.eup %6032  ;;  %v1586_v2 = vpop.xlane.xlu0 %1585 }
 0x4fa   : > { %v1602_v62 = vmul.f32 1.442695, %v1597_v61  ;;  %v1596_v3 = vsub.f32 %v6727_v15, %v1586_v2  ;;  %v1349_v0 = vsel %vm1321_vm2, %v6774_v63, 0.0 }
 0x4fb   : > { %v6779_v5 = vpop.eup %6034  ;;  %1350 = vadd.xlane.f32.xlu1 %v1349_v0  ;;  %v1595_v4 = vpop.xlane.xlu1 %1594 }
 0x4fc   : > { %6040 = vpow2.f32 %v1602_v62  ;;  %v1600_v6 = vmul.f32 1.442695, %v1596_v3  ;;  %v1599_v7 = vsub.f32 %v6730_v19, %v1595_v4  ;;  %v1346_v8 = vsel %vm1321_vm2, %v6779_v5, 0.0 }
 0x4fd   : > { %v1592_v10 = vpop.xlane.xlu0 %1591  ;;  %1347 = vadd.xlane.f32.xlu0 %v1346_v8 }
 0x4fe   : > { %6042 = vpow2.f32 %v1600_v6  ;;  %v1606_v11 = vmul.f32 1.442695, %v1599_v7  ;;  %v1598_v12 = vsub.f32 %v6734_v23, %v1592_v10 }
 0x4ff   : > { %v6785_v14 = vpop.eup %6036 }
 0x500   : > { %6044 = vpow2.f32 %v1606_v11  ;;  %v1604_v15 = vmul.f32 1.442695, %v1598_v12  ;;  %v1355_v16 = vsel %vm1321_vm2, %v6785_v14, 0.0 }
 0x501   : > { %1356 = vadd.xlane.f32.xlu1 %v1355_v16 }
 0x502   : > { %6046 = vpow2.f32 %v1604_v15 }
 0x503   : > { %v6789_v17 = vpop.eup %6038 }
 0x504   : > { %v1352_v19 = vsel %vm1321_vm2, %v6789_v17, 0.0 }
 0x505   : > { %1353 = vadd.xlane.f32.xlu0 %v1352_v19 }
 0x507   : > { %v1867_v20 = vpop.xlane.xlu1 %1866 }
 0x508   : > { %v1875_v21 = vsub.f32 %v6740_v29, %v1867_v20 }
 0x509   : > { %v6794_v24 = vpop.eup %6040  ;;  %v1864_v23 = vpop.xlane.xlu0 %1863 }
 0x50a   : > { %v1880_v25 = vmul.f32 1.442695, %v1875_v21  ;;  %v1874_v26 = vsub.f32 %v6742_v31, %v1864_v23  ;;  %v1611_v30 = vsel %vm1321_vm2, %v6794_v24, 0.0 }
 0x50b   : > { %v6799_v34 = vpop.eup %6042  ;;  %1612 = vadd.xlane.f32.xlu1 %v1611_v30  ;;  %v6801_v39 = vpop.permute.xlu1 %1638 }
 0x50c   : > { %6048 = vpow2.f32 %v1880_v25  ;;  %v1878_v40 = vmul.f32 1.442695, %v1874_v26  ;;  %5542 = vmatprep.subr.mxu1 %v6801_v39  ;;  %v1608_v29 = vsel %vm1321_vm2, %v6799_v34, 0.0 }
 0x50d   : > { %v6806_v41 = vpop.eup %6044  ;;  %1609 = vadd.xlane.f32.xlu0 %v1608_v29  ;;  %v1870_v51 = vpop.xlane.xlu0 %1869 }
 0x50e   : > { %6050 = vpow2.f32 %v1878_v40  ;;  %v1617_v31 = vsel %vm1321_vm2, %v6806_v41, 0.0  ;;  %v1876_v52 = vsub.f32 %v6748_v42, %v1870_v51 }
 0x50f   : > { %v6810_v44 = vpop.eup %6046  ;;  %1618 = vadd.xlane.f32.xlu1 %v1617_v31 }
 0x510   : > { %v1614_v46 = vsel %vm1321_vm2, %v6810_v44, 0.0  ;;  %v1882_v55 = vmul.f32 1.442695, %v1876_v52 }
 0x511   : > { %1615 = vadd.xlane.f32.xlu0 %v1614_v46  ;;  %v1637_v2 = vpop.permute.xlu0 %1636 }
 0x515   : > { %v1909_v3 = vpop.permute.xlu0 %1908 }
 0x519   : > { %v6814_v47 = vpop.eup %6048  ;;  %v6846_v4 = vpop.permute.xlu0 %2029 }
 0x51a   : > { %v1889_v48 = vsel %vm1321_vm2, %v6814_v47, 0.0 }
 0x51b   : > { %v6818_v49 = vpop.eup %6050  ;;  %1890 = vadd.xlane.f32.xlu1 %v1889_v48 }
 0x51c   : > { %v1886_v50 = vsel %vm1321_vm2, %v6818_v49, 0.0 }
 0x51d   : > { %1887 = vadd.xlane.f32.xlu0 %v1886_v50 }
 0x52c   : > { %2027 = vrot.lane.b32.xlu1 %v6622_v28, %s7650_s24 }
 0x530   : > { %2023 = vrot.lane.b32.xlu1 %v6616_v22, %s7650_s24 }
 0x534   : > { %2017 = vrot.lane.b32.xlu1 %v6627_v32, %s7648_s0 }
 0x538   : > { %2021 = vrot.lane.b32.xlu1 %v6629_v33, %s7648_s0 }
 0x53c   : > { %v1873_v53 = vpop.xlane.xlu1 %1872 }
 0x53d   : > { %v1877_v54 = vsub.f32 %v6760_v45, %v1873_v53 }
 0x53f   : > { %v1884_v57 = vmul.f32 1.442695, %v1877_v54 }
 0x540   : > { %v1635_v42 = vpop.permute.xlu1 %1634 }
 0x541   : > { %6052 = vpow2.f32 %v1884_v57 }
 0x542   : > { %6054 = vpow2.f32 %v1882_v55 }
 0x544   : > { %v1633_v45 = vpop.permute.xlu1 %1632 }
 0x548   : > { %v1913_v61 = vpop.permute.xlu1 %1912 }
 0x54c   : > { %v1911_v62 = vpop.permute.xlu1 %1910 }
 0x54e   : > { %v6832_v58 = vpop.eup %6052 }
 0x54f   : > { %v1895_v59 = vsel %vm1321_vm2, %v6832_v58, 0.0  ;;  %v6836_v60 = vpop.eup %6054 }
 0x550   : > { %1896 = vadd.xlane.f32.xlu0 %v1895_v59  ;;  %v1892_v33 = vsel %vm1321_vm2, %v6836_v60, 0.0  ;;  %v1907_v0 = vpop.permute.xlu1 %1906 }
 0x554   : > { %1893 = vadd.xlane.f32.xlu0 %v1892_v33 }
 0x56a   : > { %2025 = vrot.lane.b32.xlu0 %v6627_v32, %s7650_s24 }
 0x56e   : > { %2015 = vrot.lane.b32.xlu0 %v6616_v22, %s7648_s0 }
 0x572   : > { %2019 = vrot.lane.b32.xlu0 %v6622_v28, %s7648_s0 }
 0x584   : > { %v1351_v6 = vpop.xlane.xlu1 %1350 }
 0x585   : > { %6056 = vrcp.f32 %v1351_v6 }
 0x586   : > { %v1348_v7 = vpop.xlane.xlu0 %1347 }
 0x587   : > { %6058 = vrcp.f32 %v1348_v7 }
 0x58a   : > { %v1357_v8 = vpop.xlane.xlu1 %1356 }
 0x58b   : > { %6060 = vrcp.f32 %v1357_v8 }
 0x58e   : > { %v1354_v32 = vpop.xlane.xlu0 %1353 }
 0x58f   : > { %6062 = vrcp.f32 %v1354_v32 }
 0x592   : > { %v6057_v10 = vpop.eup %6056 }
 0x593   : > { %v1363_v15 = vmul.f32 %v6057_v10, %v6774_v63 }
 0x594   : > { %v6059_v22 = vpop.eup %6058  ;;  %v1613_v11 = vpop.xlane.xlu1 %1612 }
 0x595   : > { %v1362_v28 = vmul.f32 %v6059_v22, %v6779_v5  ;;  %6064 = vrcp.f32 %v1613_v11 }
 0x596   : > { %v1610_v12 = vpop.xlane.xlu0 %1609 }
 0x597   : > { %6066 = vrcp.f32 %v1610_v12  ;;  %5522 = vmatprep.mubr.msk.f32.mxu1 %vm1321_vm2, %v1362_v28 }
 0x598   : > { %5523 = vmatmul.mubr.msk.f32.vlgmr.msra.gmra.mxu1 %vm1321_vm2, %v1363_v15  ;;  %v1619_v16 = vpop.xlane.xlu1 %1618  ;;  %v6061_v20 = vpop.eup %6060 }
 0x599   : > { %5543 = vmatpush3.msra.mxu1 %v6801_v39  ;;  %6068 = vrcp.f32 %v1619_v16  ;;  %v1365_v63 = vmul.f32 %v6061_v20, %v6785_v14 }
 0x59a   : > { %5544 = vmatprep.subr.mxu1 %v1637_v2  ;;  %v1616_v19 = vpop.xlane.xlu0 %1615 }
 0x59b   : > { %6070 = vrcp.f32 %v1616_v19  ;;  %5545 = vmatpush3.msra.mxu1 %v1637_v2 }
 0x59c   : > { %v6063_v21 = vpop.eup %6062  ;;  %5546 = vmatprep.subr.mxu1 %v1635_v42 }
 0x59d   : > { %5547 = vmatpush3.msra.mxu1 %v1635_v42  ;;  %v1364_v5 = vmul.f32 %v6063_v21, %v6789_v17 }
 0x59e   : > { %5548 = vmatprep.subr.mxu1 %v1633_v45 }
 0x59f   : > { %5549 = vmatpush3.msra.mxu1 %v1633_v45  ;;  %5525 = vmatprep.mubr.msk.f32.mxu1 %vm1321_vm2, %v1364_v5 }
 0x5a0   : > { %5570 = vmatprep.subr.mxu1 %v1913_v61  ;;  %5526 = vmatmul.mubr.msk.f32.gmra.mxu1 %vm1321_vm2, %v1365_v63 }
 0x5a2   : > { %v6065_v23 = vpop.eup %6064 }
 0x5a3   : > { %v1625_v39 = vmul.f32 %v6065_v23, %v6794_v24 }
 0x5a4   : > { %v6067_v25 = vpop.eup %6066  ;;  %v1891_v26 = vpop.xlane.xlu1 %1890 }
 0x5a5   : > { %v1624_v30 = vmul.f32 %v6067_v25, %v6799_v34  ;;  %6072 = vrcp.f32 %v1891_v26 }
 0x5a6   : > { %v1888_v40 = vpop.xlane.xlu0 %1887  ;;  %v6069_v29 = vpop.eup %6068 }
 0x5a7   : > { %6074 = vrcp.f32 %v1888_v40  ;;  %5550 = vmatprep.mubr.msk.f32.mxu1 %vm1321_vm2, %v1624_v30  ;;  %v1627_v31 = vmul.f32 %v6069_v29, %v6806_v41 }
 0x5a8   : > { %v6071_v14 = vpop.eup %6070  ;;  %5551 = vmatmul.mubr.msk.f32.vlgmr.msra.gmra.mxu1 %vm1321_vm2, %v1625_v39  ;;  %v2028_v41 = vpop.permute.xlu1 %2027 }
 0x5a9   : > { %5571 = vmatpush3.msra.mxu1 %v1913_v61  ;;  %v1626_v17 = vmul.f32 %v6071_v14, %v6810_v44 }
 0x5aa   : > { %5572 = vmatprep.subr.mxu1 %v1911_v62 }
 0x5ab   : > { %5573 = vmatpush3.msra.mxu1 %v1911_v62  ;;  %5553 = vmatprep.mubr.msk.f32.mxu1 %vm1321_vm2, %v1626_v17 }
 0x5ac   : > { %5574 = vmatprep.subr.mxu1 %v1909_v3  ;;  %5554 = vmatmul.mubr.msk.f32.gmra.mxu1 %vm1321_vm2, %v1627_v31 }
 0x5ad   : > { %5575 = vmatpush3.msra.mxu1 %v1909_v3 }
 0x5ae   : > { %5576 = vmatprep.subr.mxu1 %v1907_v0 }
 0x5af   : > { %5577 = vmatpush3.msra.mxu1 %v1907_v0 }
 0x5b0   : > { %5584 = vmatprep.subr.msk.mxu1 %vm1215_vm1, %v6846_v4 }
 0x5b2   : > { %v6073_v24 = vpop.eup %6072 }
 0x5b3   : > { %v1903_v44 = vmul.f32 %v6073_v24, %v6814_v47  ;;  %v2024_v47 = vpop.permute.xlu1 %2023 }
 0x5b4   : > { %v6075_v34 = vpop.eup %6074 }
 0x5b5   : > { %v1902_v46 = vmul.f32 %v6075_v34, %v6818_v49 }
 0x5b7   : > { %5578 = vmatprep.mubr.msk.f32.mxu1 %vm1321_vm2, %v1902_v46  ;;  %v2018_v57 = vpop.permute.xlu1 %2017 }
 0x5b8   : > { %5579 = vmatmul.mubr.msk.f32.vlgmr.msra.gmra.mxu1 %vm1321_vm2, %v1903_v44 }
 0x5b9   : > { %5585 = vmatpush3.xpose.msk.msra.mxu1 %vm1215_vm1, %v6846_v4 }
 0x5ba   : > { %5586 = vmatprep.subr.msk.mxu1 %vm1215_vm1, %v2028_v41 }
 0x5bb   : > { %v2022_v33 = vpop.permute.xlu1 %2021 }
 0x5bd   : > { %5587 = vmatpush3.xpose.msk.msra.mxu1 %vm1215_vm1, %v2028_v41 }
 0x5d9   : > { %v1897_v48 = vpop.xlane.xlu0 %1896 }
 0x5da   : > { %6076 = vrcp.f32 %v1897_v48 }
 0x5dd   : > { %v1894_v50 = vpop.xlane.xlu0 %1893 }
 0x5de   : > { %6078 = vrcp.f32 %v1894_v50 }
 0x5e1   : > { %v2026_v51 = vpop.permute.xlu0 %2025 }
 0x5e2   : > { %5588 = vmatprep.subr.msk.mxu1 %vm1215_vm1, %v2026_v51 }
 0x5e3   : > { %5589 = vmatpush3.xpose.msk.msra.mxu1 %vm1215_vm1, %v2026_v51 }
 0x5e4   : > { %5590 = vmatprep.subr.msk.mxu1 %vm1215_vm1, %v2024_v47 }
 0x5e5   : > { %v2016_v54 = vpop.permute.xlu0 %2015 }
 0x5e7   : > { %5591 = vmatpush3.xpose.msk.msra.mxu1 %vm1215_vm1, %v2024_v47  ;;  %v6077_v49 = vpop.eup %6076 }
 0x5e8   : > { %v1905_v55 = vmul.f32 %v6077_v49, %v6832_v58 }
 0x5e9   : > { %v2020_v59 = vpop.permute.xlu0 %2019 }
 0x5eb   : > { %v6079_v52 = vpop.eup %6078 }
 0x5ec   : > { %v1904_v53 = vmul.f32 %v6079_v52, %v6836_v60 }
 0x5ee   : > { %5581 = vmatprep.mubr.msk.f32.mxu1 %vm1321_vm2, %v1904_v53 }
 0x5ef   : > { %5582 = vmatmul.mubr.msk.f32.gmra.mxu1 %vm1321_vm2, %v1905_v55 }
 0x5f0   : > { %5592 = vmatprep.mubr.msk.f32.mxu1 %vm1215_vm1, %v2016_v54 }
 0x5f3   : > { %5593 = vmatmul.mubr.msk.f32.vlgmr.msra.gmra.mxu1 %vm1215_vm1, %v2018_v57 }
 0x5f4   : > { %5595 = vmatprep.mubr.msk.f32.mxu1 %vm1215_vm1, %v2020_v59 }
 0x5f7   : > { %5596 = vmatmul.mubr.msk.f32.gmra.mxu1 %vm1215_vm1, %v2022_v33 }
 0x658   : > { %v6887_v42 = vpop.f32.mrf.mxu1 }
 0x65a   : > { %v6889_v60 = vpop.f32.mrf.mxu1 }
 0x660   : > { %v6891_v58 = vpop.f32.mrf.mxu1 }
 0x662   : > { %v6893_v45 = vpop.f32.mrf.mxu1 }
 0x668   : > { %v5552_v61 = vpop.f32.mrf.mxu1 }
 0x66a   : > { %v1722_v2 = vpop.f32.mrf.mxu1 }
 0x66b   : > { %v5860_v62 = vpack.i.bf16 %v5552_v61, %v1722_v2 }
 0x66c   : > { %v5555_v3 = vpop.f32.mrf.mxu1 }
 0x66e   : > { %v1732_v0 = vpop.f32.mrf.mxu1 }
 0x66f   : > { %v5865_v4 = vpack.i.bf16 %v5555_v3, %v1732_v0 }
 0x678   : > { %v5580_v6 = vpop.f32.mrf.mxu1 }
 0x67a   : > { %v1996_v7 = vpop.f32.mrf.mxu1 }
 0x67b   : > { %v5870_v8 = vpack.i.bf16 %v5580_v6, %v1996_v7  ;;  %v5956_v7 = vld [vmem:[%s7620_s8 + $0x18] sm:$0xff]  }
 0x6af   : > { %v5583_v32 = vpop.f32.mrf.mxu1 }
 0x6b1   : > { %v2006_v10 = vpop.f32.mrf.mxu1 }
 0x6b2   : > { %v5875_v22 = vpack.i.bf16 %v5583_v32, %v2006_v10  ;;  %v5958_v32 = vld [vmem:[%s7620_s8 + $0x8] sm:$0xff]   ;;  %v5959_v10 = vld [vmem:[%s7620_s8] sm:$0xff]  }
 0x6b3   : > { %v5594_v11 = vpop.f32.mrf.mxu1 }
 0x6b4   : > { %v2133_v28 = vmul.f32 0.25, %v5594_v11 }
 0x6b5   : > { %v2113_v12 = vpop.f32.mrf.mxu1 }
 0x6b6   : > { %v2132_v15 = vmul.f32 0.25, %v2113_v12  ;;  %v2139_v16 = vsel %vm1321_vm2, %v2133_v28, -inf }
 0x6b7   : > { %2140 = vmax.xlane.f32.xlu1 %v2139_v16  ;;  %v5597_v19 = vpop.f32.mrf.mxu1 }
 0x6b8   : > { %v2136_v20 = vsel %vm1321_vm2, %v2132_v15, -inf  ;;  %v2135_v63 = vmul.f32 0.25, %v5597_v19 }
 0x6b9   : > { %2137 = vmax.xlane.f32.xlu0 %v2136_v20  ;;  %v2123_v21 = vpop.f32.mrf.mxu1 }
 0x6ba   : > { %v2134_v5 = vmul.f32 0.25, %v2123_v21  ;;  %v2145_v25 = vsel %vm1321_vm2, %v2135_v63, -inf }
 0x6bc   : > { %v2142_v23 = vsel %vm1321_vm2, %v2134_v5, -inf }
 0x6bd   : > { %2143 = vmax.xlane.f32.xlu0 %v2142_v23 }
 0x6c1   : > { %2146 = vmax.xlane.f32.xlu0 %v2145_v25 }
 0x740   : > { %v2141_v26 = vpop.xlane.xlu1 %2140 }
 0x741   : > { %v2149_v30 = vsub.f32 %v2133_v28, %v2141_v26 }
 0x742   : > { %v2138_v39 = vpop.xlane.xlu0 %2137 }
 0x743   : > { %v2154_v40 = vmul.f32 1.442695, %v2149_v30  ;;  %v2148_v29 = vsub.f32 %v2132_v15, %v2138_v39 }
 0x745   : > { %6080 = vpow2.f32 %v2154_v40  ;;  %v2152_v14 = vmul.f32 1.442695, %v2148_v29 }
 0x746   : > { %v2144_v17 = vpop.xlane.xlu0 %2143 }
 0x747   : > { %6082 = vpow2.f32 %v2152_v14  ;;  %v2150_v31 = vsub.f32 %v2134_v5, %v2144_v17 }
 0x749   : > { %v2156_v24 = vmul.f32 1.442695, %v2150_v31 }
 0x74a   : > { %v2147_v34 = vpop.xlane.xlu0 %2146 }
 0x74b   : > { %6084 = vpow2.f32 %v2156_v24  ;;  %v2151_v46 = vsub.f32 %v2135_v63, %v2147_v34 }
 0x74d   : > { %v2158_v44 = vmul.f32 1.442695, %v2151_v46 }
 0x74f   : > { %6086 = vpow2.f32 %v2158_v44 }
 0x752   : > { %v6081_v41 = vpop.eup %6080 }
 0x753   : > { %v2163_v48 = vsel %vm1321_vm2, %v6081_v41, 0.0 }
 0x754   : > { %v6083_v50 = vpop.eup %6082  ;;  %2164 = vadd.xlane.f32.xlu1 %v2163_v48 }
 0x755   : > { %v2160_v51 = vsel %vm1321_vm2, %v6083_v50, 0.0 }
 0x756   : > { %2161 = vadd.xlane.f32.xlu0 %v2160_v51 }
 0x758   : > { %v6085_v47 = vpop.eup %6084 }
 0x759   : > { %v2166_v49 = vsel %vm1321_vm2, %v6085_v47, 0.0 }
 0x75a   : > { %2167 = vadd.xlane.f32.xlu0 %v2166_v49 }
 0x75c   : > { %v6087_v52 = vpop.eup %6086 }
 0x75d   : > { %v2169_v53 = vsel %vm1321_vm2, %v6087_v52, 0.0 }
 0x75e   : > { %2170 = vadd.xlane.f32.xlu1 %v2169_v53 }
 0x76f   : > { %2184 = vrot.lane.b32.xlu1 %v6637_v36, %s7648_s0 }
 0x770   : > { %2186 = vrot.lane.b32.xlu0 %v6631_v35, %s7648_s0 }
 0x773   : > { %2182 = vrot.lane.b32.xlu1 %v6641_v37, %s7648_s0 }
 0x774   : > { %5861 = vrot.lane.b32.xlu0 %v5860_v62, %s7650_s24 }
 0x777   : > { %2180 = vrot.lane.b32.xlu1 %v6649_v38, %s7648_s0  ;;  %s7694_s0 = smov 48  }
 0x778   : > { %5871 = vrot.lane.b32.xlu0 %v5870_v8, %s7654_s26  ;;  %v5957_v8 = vld [vmem:[%s7620_s8 + $0x10] sm:$0xff]  }
 0x77b   : > { %5866 = vrot.lane.b32.xlu1 %v5865_v4, %s7650_s24  ;;  %s7693_s24 = smov 64  }
 0x77f   : > { %5876 = vrot.lane.b32.xlu1 %v5875_v22, %s7654_s26  ;;  %s4996_s26 = sshll.u32 %s674_s22, 3 }
 0x7dd   : > { %v2165_v36 = vpop.xlane.xlu1 %2164 }
 0x7df   : > { %v2162_v54 = vpop.xlane.xlu0 %2161 }
 0x7e0   : > { %6088 = vrcp.f32 %v2162_v54 }
 0x7e1   : > { %6090 = vrcp.f32 %v2165_v36 }
 0x7e3   : > { %v2168_v55 = vpop.xlane.xlu0 %2167 }
 0x7e4   : > { %6092 = vrcp.f32 %v2168_v55 }
 0x7e7   : > { %v2187_v35 = vpop.permute.xlu0 %2186  ;;  %v2171_v57 = vpop.xlane.xlu1 %2170 }
 0x7e8   : > { %6094 = vrcp.f32 %v2171_v57  ;;  %5598 = vmatprep.subr.mxu0 %v2187_v35 }
 0x7e9   : > { %5599 = vmatpush3.msra.mxu0 %v2187_v35 }
 0x7eb   : > { %v2185_v37 = vpop.permute.xlu1 %2184  ;;  %v5862_v19 = vpop.permute.xlu0 %5861 }
 0x7ec   : > { %5600 = vmatprep.subr.mxu0 %v2185_v37  ;;  %v5864_v5 = vunpack.i.h.bf16 %v5862_v19  ;;  %v5863_v63 = vunpack.i.l.bf16 %v5862_v19 }
 0x7ed   : > { %v6089_v38 = vpop.eup %6088  ;;  %5601 = vmatpush3.msra.mxu0 %v2185_v37 }
 0x7ee   : > { %v2176_v59 = vmul.f32 %v6089_v38, %v6083_v50  ;;  %v6091_v61 = vpop.eup %6090  ;;  %v2338_v30 = vsel %vm1215_vm1, %v6887_v42, %v5864_v5  ;;  %v2337_v39 = vsel %vm1215_vm1, %v6889_v60, %v5863_v63 }
 0x7ef   : > { %v2183_v33 = vpop.permute.xlu1 %2182  ;;  %v2177_v3 = vmul.f32 %v6091_v61, %v6081_v41  ;;  %v5872_v21 = vpop.permute.xlu0 %5871 }
 0x7f0   : > { %5602 = vmatprep.subr.mxu0 %v2183_v33  ;;  %5606 = vmatprep.mubr.msk.f32.mxu0 %vm1321_vm2, %v2176_v59  ;;  %v5874_v23 = vunpack.i.h.bf16 %v5872_v21  ;;  %v5873_v25 = vunpack.i.l.bf16 %v5872_v21 }
 0x7f1   : > { %5603 = vmatpush3.msra.mxu0 %v2183_v33  ;;  %v6093_v2 = vpop.eup %6092 }
 0x7f2   : > { %v2178_v4 = vmul.f32 %v6093_v2, %v6085_v47  ;;  %v2341_v24 = vsel %vm1321_vm2, %v2337_v39, %v5873_v25  ;;  %v2342_v34 = vsel %vm1321_vm2, %v2338_v30, %v5874_v23  ;;  %v5960_v30 = vld [vmem:[%s7624_s12 + $0x18] sm:$0xff]   ;;  %v5961_v39 = vld [vmem:[%s7624_s12 + $0x10] sm:$0xff]  }
 0x7f3   : > { %v2181_v62 = vpop.permute.xlu1 %2180  ;;  %5624 = vmatprep.subr.bf16.mxu1 %v5960_v30 }
 0x7f4   : > { %5604 = vmatprep.subr.mxu0 %v2181_v62  ;;  %5625 = vmatpush3.bf16.msra.mxu1 %v5960_v30 }
 0x7f5   : > { %v6095_v0 = vpop.eup %6094  ;;  %5605 = vmatpush3.msra.mxu0 %v2181_v62  ;;  %5626 = vmatprep.subr.bf16.mxu1 %v5961_v39 }
 0x7f6   : > { %5607 = vmatmul.mubr.msk.f32.vlgmr.msra.gmra.mxu0 %vm1321_vm2, %v2177_v3  ;;  %v2179_v6 = vmul.f32 %v6095_v0, %v6087_v52  ;;  %5612 = vmatprep.subr.bf16.mxu0 %v5956_v7 }
 0x7f7   : > { %5609 = vmatprep.mubr.msk.f32.mxu0 %vm1321_vm2, %v2178_v4  ;;  %5613 = vmatpush3.bf16.msra.mxu0 %v5956_v7  ;;  %v5867_v20 = vpop.permute.xlu1 %5866 }
 0x7f8   : > { %5614 = vmatprep.subr.bf16.mxu0 %v5957_v8  ;;  %v5869_v29 = vunpack.i.h.bf16 %v5867_v20  ;;  %v5868_v14 = vunpack.i.l.bf16 %v5867_v20  ;;  %5627 = vmatpush3.bf16.msra.mxu1 %v5961_v39 }
 0x7fa   : > { %5610 = vmatmul.mubr.msk.f32.gmra.mxu0 %vm1321_vm2, %v2179_v6  ;;  %v2340_v60 = vsel %vm1215_vm1, %v6891_v58, %v5869_v29  ;;  %v2339_v51 = vsel %vm1215_vm1, %v6893_v45, %v5868_v14  ;;  %v5083_v58 = vld [vmem:[%s7621_s9] ss:$0 sm:$0xff] }
 0x7fb   : > { %5615 = vmatpush3.bf16.msra.mxu0 %v5957_v8  ;;  %v5877_v26 = vpop.permute.xlu1 %5876  ;;  %v5963_v29 = vld [vmem:[%s7624_s12] sm:$0xff]  }
 0x7fc   : > { %5616 = vmatprep.subr.bf16.mxu0 %v5958_v32  ;;  %v5879_v46 = vunpack.i.h.bf16 %v5877_v26  ;;  %v5878_v44 = vunpack.i.l.bf16 %v5877_v26 }
 0x7fe   : > { %v2343_v52 = vsel %vm1321_vm2, %v2339_v51, %v5878_v44  ;;  %v2344_v53 = vsel %vm1321_vm2, %v2340_v60, %v5879_v46 }
 0x7ff   : > { %5617 = vmatpush3.bf16.msra.mxu0 %v5958_v32 }
 0x800   : > { %5618 = vmatprep.subr.bf16.mxu0 %v5959_v10 }
 0x803   : > { %5619 = vmatpush3.bf16.msra.mxu0 %v5959_v10 }
 0x8b6   : > { %v5608_v22 = vpop.f32.mrf.mxu0 }
 0x8b8   : > { %v2270_v11 = vpop.f32.mrf.mxu0 }
 0x8b9   : > { %v5880_v28 = vpack.i.bf16 %v5608_v22, %v2270_v11 }
 0x8ba   : > { %v5611_v12 = vpop.f32.mrf.mxu0 }
 0x8bb   : > { %5881 = vrot.lane.b32.xlu0 %v5880_v28, %s7660_s23 }
 0x8bc   : > { %v2280_v15 = vpop.f32.mrf.mxu0 }
 0x8bd   : > { %v5885_v16 = vpack.i.bf16 %v5611_v12, %v2280_v15 }
 0x8bf   : > { %5886 = vrot.lane.b32.xlu1 %v5885_v16, %s7660_s23  ;;  %s7698_s23 = smov 16  }
 0x92d   : > { %v5882_v40 = vpop.permute.xlu0 %5881 }
 0x92e   : > { %v5884_v17 = vunpack.i.h.bf16 %v5882_v40  ;;  %v5883_v31 = vunpack.i.l.bf16 %v5882_v40  ;;  %v5962_v40 = vld [vmem:[%s7624_s12 + $0x8] sm:$0xff]  }
 0x92f   : > { %5628 = vmatprep.subr.bf16.mxu1 %v5962_v40 }
 0x930   : > { %v2347_v41 = vsel %vm2345_vm3, %v2342_v34, %v5884_v17  ;;  %v2346_v48 = vsel %vm2345_vm3, %v2341_v24, %v5883_v31  ;;  %5629 = vmatpush3.bf16.msra.mxu1 %v5962_v40 }
 0x931   : > { %v5887_v42 = vpop.permute.xlu1 %5886  ;;  %v2350_v50 = vpack.c.bf16 %v2347_v41, %v2346_v48  ;;  %5630 = vmatprep.subr.bf16.mxu1 %v5963_v29 }
 0x932   : > { %v5889_v47 = vunpack.i.h.bf16 %v5887_v42  ;;  %v5888_v49 = vunpack.i.l.bf16 %v5887_v42 }
 0x933   : > { %5620 = vmatprep.mubr.msk.bf16.mxu0 %vm1008_vm0, %v2350_v50 }
 0x934   : > { %v2348_v54 = vsel %vm2345_vm3, %v2343_v52, %v5888_v49  ;;  %v2349_v36 = vsel %vm2345_vm3, %v2344_v53, %v5889_v47  ;;  %5631 = vmatpush3.bf16.msra.mxu1 %v5963_v29  ;;  %v5090_v49 = vld [vmem:[%s7622_s10] ss:$0 sm:$0xff] }
 0x935   : > { %v2351_v55 = vpack.c.bf16 %v2349_v36, %v2348_v54 }
 0x937   : > { %5621 = vmatmul.mubr.msk.bf16.vlgmr.msra.gmra.mxu0 %vm1008_vm0, %v2351_v55 }
 0x9f7   : > { %v5622_v35 = vpop.f32.mrf.mxu0 }
 0x9f8   : > { %v2440_v57 = vadd.f32 %v5622_v35, %v5083_v58  ;;  %v5091_v35 = vld [vmem:[%s7623_s11] ss:$0 sm:$0xff] }
 0x9f9   : > { %v2431_v45 = vpop.f32.mrf.mxu0 }
 0x9fa   : > { %v2432_v37 = vadd.f32 %v5083_v58, %v2431_v45  ;;  %v6958_v61 = vadd.f32 %v2440_v57, %v6557_v9 }
 0x9fb   : > { %v5623_v38 = vpop.f32.mrf.mxu0 }
 0x9fc   : > { %v6955_v59 = vadd.f32 %v2432_v37, %v6543_v56  ;;  %v2443_v2 = vadd.f32 %v5623_v38, %v5083_v58  ;;  %v2458_v6 = vsel %vm1008_vm0, %v6958_v61, 0.0 }
 0x9fd   : > { %v2434_v33 = vpop.f32.mrf.mxu0 }
 0x9fe   : > { %v2435_v62 = vadd.f32 %v5083_v58, %v2434_v33  ;;  %v2452_v3 = vsel %vm1008_vm0, %v6955_v59, 0.0  ;;  %v6966_v4 = vadd.f32 %v2443_v2, %v6564_v13 }
 0x9ff   : > { %2453 = vadd.xlane.f32.xlu0 %v2452_v3 }
 0xa00   : > { %v6963_v0 = vadd.f32 %v2435_v62, %v6550_v1  ;;  %v2461_v9 = vsel %vm1008_vm0, %v6966_v4, 0.0 }
 0xa02   : > { %v2455_v56 = vsel %vm1008_vm0, %v6963_v0, 0.0 }
 0xa03   : > { %2456 = vadd.xlane.f32.xlu1 %v2455_v56  ;;  %2459 = vadd.xlane.f32.xlu0 %v2458_v6 }
 0xa07   : > { %2462 = vadd.xlane.f32.xlu0 %v2461_v9  ;;  %v5964_v9 = vld [vmem:[%s7626_s14 + $0x38] sm:$0xff]  }
 0xa08   : > { %5636 = vmatprep.subr.bf16.mxu0 %v5964_v9 }
 0xa09   : > { %5637 = vmatpush3.bf16.msra.mxu0 %v5964_v9 }
 0xa88   : > { %v2454_v7 = vpop.xlane.xlu0 %2453 }
 0xa89   : > { %v2464_v8 = vmul.f32 0.015625, %v2454_v7  ;;  %v5965_v7 = vld [vmem:[%s7626_s14 + $0x30] sm:$0xff]  }
 0xa8a   : > { %5638 = vmatprep.subr.bf16.mxu0 %v5965_v7 }
 0xa8b   : > { %v2468_v1 = vsub.f32 %v6955_v59, %v2464_v8  ;;  %5639 = vmatpush3.bf16.msra.mxu0 %v5965_v7  ;;  %v5966_v8 = vld [vmem:[%s7626_s14 + $0x28] sm:$0xff]  }
 0xa8c   : > { %v2457_v32 = vpop.xlane.xlu1 %2456  ;;  %v2460_v10 = vpop.xlane.xlu0 %2459  ;;  %5640 = vmatprep.subr.bf16.mxu0 %v5966_v8 }
 0xa8d   : > { %v2465_v13 = vmul.f32 0.015625, %v2457_v32  ;;  %v2466_v22 = vmul.f32 0.015625, %v2460_v10  ;;  %v2472_v11 = vmul.f32 %v2468_v1, %v2468_v1  ;;  %v5968_v32 = vld [vmem:[%s7626_s14 + $0x18] sm:$0xff]   ;;  %v5969_v10 = vld [vmem:[%s7626_s14 + $0x10] sm:$0xff]  }
 0xa8f   : > { %v2469_v28 = vsub.f32 %v6963_v0, %v2465_v13  ;;  %v2470_v12 = vsub.f32 %v6958_v61, %v2466_v22  ;;  %v2476_v15 = vsel %vm1008_vm0, %v2472_v11, 0.0  ;;  %5641 = vmatpush3.bf16.msra.mxu0 %v5966_v8  ;;  %v5970_v13 = vld [vmem:[%s7626_s14 + $0x8] sm:$0xff]   ;;  %v5971_v22 = vld [vmem:[%s7626_s14] sm:$0xff]  }
 0xa90   : > { %2477 = vadd.xlane.f32.xlu0 %v2476_v15  ;;  %v2463_v16 = vpop.xlane.xlu0 %2462  ;;  %v5092_v11 = vld [vmem:[%s7625_s13] ss:$0 sm:$0xff] }
 0xa91   : > { %v2467_v19 = vmul.f32 0.015625, %v2463_v16  ;;  %v2473_v20 = vmul.f32 %v2469_v28, %v2469_v28  ;;  %v2474_v21 = vmul.f32 %v2470_v12, %v2470_v12 }
 0xa93   : > { %v2471_v5 = vsub.f32 %v6966_v4, %v2467_v19  ;;  %v2479_v63 = vsel %vm1008_vm0, %v2473_v20, 0.0  ;;  %v2482_v23 = vsel %vm1008_vm0, %v2474_v21, 0.0 }
 0xa94   : > { %2480 = vadd.xlane.f32.xlu1 %v2479_v63  ;;  %2483 = vadd.xlane.f32.xlu0 %v2482_v23 }
 0xa95   : > { %v2475_v25 = vmul.f32 %v2471_v5, %v2471_v5 }
 0xa97   : > { %v2485_v26 = vsel %vm1008_vm0, %v2475_v25, 0.0 }
 0xa98   : > { %2486 = vadd.xlane.f32.xlu1 %v2485_v26 }
 0xb19   : > { %v2478_v14 = vpop.xlane.xlu0 %2477 }
 0xb1a   : > { %v2488_v17 = vmul.f32 0.015625, %v2478_v14 }
 0xb1c   : > { %v2492_v31 = vadd.f32 1e-05, %v2488_v17 }
 0xb1d   : > { %v2481_v24 = vpop.xlane.xlu1 %2480  ;;  %v2484_v34 = vpop.xlane.xlu0 %2483 }
 0xb1e   : > { %6096 = vrsqrt.f32 %v2492_v31  ;;  %v2489_v46 = vmul.f32 0.015625, %v2481_v24  ;;  %v2490_v44 = vmul.f32 0.015625, %v2484_v34 }
 0xb20   : > { %v2493_v41 = vadd.f32 1e-05, %v2489_v46  ;;  %v2494_v48 = vadd.f32 1e-05, %v2490_v44 }
 0xb21   : > { %v2487_v42 = vpop.xlane.xlu1 %2486 }
 0xb22   : > { %6098 = vrsqrt.f32 %v2493_v41  ;;  %v2491_v50 = vmul.f32 0.015625, %v2487_v42 }
 0xb23   : > { %6100 = vrsqrt.f32 %v2494_v48 }
 0xb24   : > { %v2495_v60 = vadd.f32 1e-05, %v2491_v50 }
 0xb26   : > { %6102 = vrsqrt.f32 %v2495_v60 }
 0xb2b   : > { %v6097_v51 = vpop.eup %6096 }
 0xb2c   : > { %v2500_v47 = vmul.f32 %v6097_v51, %v2468_v1  ;;  %v5967_v1 = vld [vmem:[%s7626_s14 + $0x20] sm:$0xff]  }
 0xb2d   : > { %5642 = vmatprep.subr.bf16.mxu0 %v5967_v1 }
 0xb2e   : > { %v2510_v36 = vmul.f32 %v5090_v49, %v2500_v47  ;;  %5643 = vmatpush3.bf16.msra.mxu0 %v5967_v1 }
 0xb2f   : > { %v6099_v52 = vpop.eup %6098  ;;  %5644 = vmatprep.subr.bf16.mxu0 %v5968_v32 }
 0xb30   : > { %v6101_v53 = vpop.eup %6100  ;;  %v2501_v54 = vmul.f32 %v6099_v52, %v2469_v28  ;;  %v2520_v38 = vadd.f32 %v5091_v35, %v2510_v36 }
 0xb31   : > { %v2502_v55 = vmul.f32 %v6101_v53, %v2470_v12 }
 0xb32   : > { %v2511_v58 = vmul.f32 %v5090_v49, %v2501_v54  ;;  %5645 = vmatpush3.bf16.msra.mxu0 %v5968_v32 }
 0xb33   : > { %v6103_v45 = vpop.eup %6102  ;;  %v2512_v37 = vmul.f32 %v5090_v49, %v2502_v55  ;;  %5646 = vmatprep.subr.bf16.mxu0 %v5969_v10 }
 0xb34   : > { %v2503_v57 = vmul.f32 %v6103_v45, %v2471_v5  ;;  %v2521_v33 = vadd.f32 %v5091_v35, %v2511_v58 }
 0xb35   : > { %v2522_v3 = vadd.f32 %v5091_v35, %v2512_v37 }
 0xb36   : > { %v2513_v2 = vmul.f32 %v5090_v49, %v2503_v57  ;;  %v2524_v62 = vpack.c.bf16 %v2521_v33, %v2520_v38  ;;  %5647 = vmatpush3.bf16.msra.mxu0 %v5969_v10 }
 0xb37   : > { %5648 = vmatprep.subr.bf16.mxu0 %v5970_v13 }
 0xb38   : > { %v2523_v56 = vadd.f32 %v5091_v35, %v2513_v2  ;;  %5632 = vmatprep.mubr.msk.bf16.mxu1 %vm1008_vm0, %v2524_v62 }
 0xb3a   : > { %v2525_v6 = vpack.c.bf16 %v2523_v56, %v2522_v3  ;;  %5649 = vmatpush3.bf16.msra.mxu0 %v5970_v13 }
 0xb3b   : > { %5650 = vmatprep.subr.bf16.mxu0 %v5971_v22 }
 0xb3c   : > { %5633 = vmatmul.mubr.msk.bf16.vlgmr.msra.gmra.mxu1 %vm1008_vm0, %v2525_v6  ;;  %v5099_v6 = vld [vmem:[%s7627_s15] ss:$0 sm:$0xff] }
 0xb3d   : > { %2960 = vmatprep.mubr.bf16.mxu1 %v6274_v43 }
 0xb3e   : > { %5651 = vmatpush3.bf16.msra.mxu0 %v5971_v22 }
 0xbfc   : > { %v5634_v28 = vpop.f32.mrf.mxu1 }
 0xbfd   : > { %v2614_v12 = vadd.f32 %v5634_v28, %v5092_v11 }
 0xbfe   : > { %v2605_v15 = vpop.f32.mrf.mxu1 }
 0xbff   : > { %v2622_v16 = vmul.f32 %v2614_v12, %v2614_v12  ;;  %v2606_v19 = vadd.f32 %v5092_v11, %v2605_v15 }
 0xc00   : > { %v5635_v20 = vpop.f32.mrf.mxu1 }
 0xc01   : > { %v2626_v21 = vmul.f32 %v2622_v16, %v2614_v12  ;;  %v2620_v5 = vmul.f32 %v2606_v19, %v2606_v19  ;;  %v2617_v63 = vadd.f32 %v5635_v20, %v5092_v11 }
 0xc02   : > { %v2608_v23 = vpop.f32.mrf.mxu1 }
 0xc03   : > { %v2630_v25 = vmul.f32 0.044715, %v2626_v21  ;;  %v2624_v26 = vmul.f32 %v2620_v5, %v2606_v19  ;;  %v2623_v30 = vmul.f32 %v2617_v63, %v2617_v63  ;;  %v2609_v39 = vadd.f32 %v5092_v11, %v2608_v23 }
 0xc05   : > { %v2634_v40 = vadd.f32 %v2630_v25, %v2614_v12  ;;  %v2628_v29 = vmul.f32 0.044715, %v2624_v26  ;;  %v2627_v14 = vmul.f32 %v2623_v30, %v2617_v63  ;;  %v2621_v17 = vmul.f32 %v2609_v39, %v2609_v39 }
 0xc07   : > { %v2638_v31 = vmul.f32 0.7978846, %v2634_v40  ;;  %v2632_v24 = vadd.f32 %v2628_v29, %v2606_v19  ;;  %v2631_v34 = vmul.f32 0.044715, %v2627_v14  ;;  %v2625_v46 = vmul.f32 %v2621_v17, %v2609_v39 }
 0xc09   : > { %v2636_v44 = vmul.f32 0.7978846, %v2632_v24  ;;  %v2635_v41 = vadd.f32 %v2631_v34, %v2617_v63  ;;  %v2629_v48 = vmul.f32 0.044715, %v2625_v46  ;;  %6104 = vtanh.f32 %v2638_v31 }
 0xc0b   : > { %6106 = vtanh.f32 %v2636_v44  ;;  %v2639_v42 = vmul.f32 0.7978846, %v2635_v41  ;;  %v2633_v50 = vadd.f32 %v2629_v48, %v2609_v39  ;;  %v5974_v44 = vld [vmem:[%s7688_s25 + $0x74] ss:$8 sps:$4 sm:$0xff]   ;;  %v5972_v41 = vld [vmem:[%s7688_s25 + $0x70] ss:$8 sps:$4 sm:$0xff]  }
 0xc0c   : > { %2936 = vmatprep.subr.bf16.mxu1 %v5974_v44  ;;  %v5977_v48 = vld [vmem:[%s7688_s25 + $0x64] ss:$8 sps:$4 sm:$0xff]  }
 0xc0d   : > { %6108 = vtanh.f32 %v2639_v42  ;;  %v2637_v60 = vmul.f32 0.7978846, %v2633_v50  ;;  %2937 = vmatpush1.bf16.msra.mxu1 %v5972_v41  ;;  %v5975_v42 = vld [vmem:[%s7688_s25 + $0x60] ss:$8 sps:$4 sm:$0xff]   ;;  %v5980_v50 = vld [vmem:[%s7688_s25 + $0x54] ss:$8 sps:$4 sm:$0xff]  }
 0xc0e   : > { %2938 = vmatprep.subr.bf16.mxu1 %v5977_v48 }
 0xc0f   : > { %6110 = vtanh.f32 %v2637_v60  ;;  %v5978_v60 = vld [vmem:[%s7688_s25 + $0x50] ss:$8 sps:$4 sm:$0xff]  }
 0xc11   : > { %2939 = vmatpush1.bf16.msra.mxu1 %v5975_v42 }
 0xc12   : > { %2940 = vmatprep.subr.bf16.mxu1 %v5980_v50 }
 0xc15   : > { %2941 = vmatpush1.bf16.msra.mxu1 %v5978_v60 }
 0xc16   : > { %v6105_v51 = vpop.eup %6104 }
 0xc17   : > { %v2646_v53 = vadd.f32 1.0, %v6105_v51  ;;  %v5983_v51 = vld [vmem:[%s7688_s25 + $0x44] ss:$8 sps:$4 sm:$0xff]  }
 0xc18   : > { %v6107_v47 = vpop.eup %6106  ;;  %2942 = vmatprep.subr.bf16.mxu1 %v5983_v51 }
 0xc19   : > { %v2644_v49 = vadd.f32 1.0, %v6107_v47  ;;  %v2650_v45 = vmul.f32 0.5, %v2646_v53  ;;  %v5981_v47 = vld [vmem:[%s7688_s25 + $0x40] ss:$8 sps:$4 sm:$0xff]  }
 0xc1a   : > { %v6109_v52 = vpop.eup %6108  ;;  %2943 = vmatpush1.bf16.msra.mxu1 %v5981_v47 }
 0xc1b   : > { %v2647_v54 = vadd.f32 1.0, %v6109_v52  ;;  %v2648_v58 = vmul.f32 0.5, %v2644_v49  ;;  %v2654_v2 = vmul.f32 %v2650_v45, %v2614_v12 }
 0xc1c   : > { %v6111_v36 = vpop.eup %6110 }
 0xc1d   : > { %v2651_v55 = vmul.f32 0.5, %v2647_v54  ;;  %v2645_v35 = vadd.f32 1.0, %v6111_v36  ;;  %v2652_v38 = vmul.f32 %v2648_v58, %v2606_v19 }
 0xc1f   : > { %v2649_v57 = vmul.f32 0.5, %v2645_v35  ;;  %v2655_v37 = vmul.f32 %v2651_v55, %v2617_v63 }
 0xc21   : > { %v2653_v33 = vmul.f32 %v2649_v57, %v2609_v39  ;;  %v2657_v3 = vpack.c.bf16 %v2655_v37, %v2654_v2 }
 0xc23   : > { %v2656_v62 = vpack.c.bf16 %v2653_v33, %v2652_v38 }
 0xc25   : > { %5652 = vmatprep.mubr.bf16.mxu0 %v2656_v62  ;;  %v5110_v62 = vld [vmem:[%s7690_s5 + $0x1] ss:$0 sm:$0xff]  ;;  %s6282_s5 = smov [#allocation2]  }
 0xc26   : > { %5653 = vmatmul.mubr.bf16.vlgmr.msra.gmra.mxu0 %v2657_v3 }
 0xce6   : > { %v5654_v56 = vpop.f32.mrf.mxu0 }
 0xce7   : > { %v2772_v7 = vadd.f32 %v5654_v56, %v5099_v6 }
 0xce8   : > { %v2763_v9 = vpop.f32.mrf.mxu0 }
 0xce9   : > { %v2764_v8 = vadd.f32 %v5099_v6, %v2763_v9  ;;  %v7037_v13 = vadd.f32 %v2772_v7, %v6958_v61  ;;  %v5111_v7 = vld [vmem:[%s7691_s1 + $0x1] ss:$0 sm:$0xff] }
 0xcea   : > { %v5655_v1 = vpop.f32.mrf.mxu0 }
 0xceb   : > { %v7034_v32 = vadd.f32 %v2764_v8, %v6955_v59  ;;  %v2775_v22 = vadd.f32 %v5655_v1, %v5099_v6  ;;  %v2792_v16 = vsel %vm1008_vm0, %v7037_v13, 0.0 }
 0xcec   : > { %v2766_v10 = vpop.f32.mrf.mxu0 }
 0xced   : > { %v2767_v11 = vadd.f32 %v5099_v6, %v2766_v10  ;;  %v2786_v28 = vsel %vm1008_vm0, %v7034_v32, 0.0  ;;  %v7045_v15 = vadd.f32 %v2775_v22, %v6966_v4 }
 0xcee   : > { %2787 = vadd.xlane.f32.xlu0 %v2786_v28 }
 0xcef   : > { %v7042_v12 = vadd.f32 %v2767_v11, %v6963_v0  ;;  %v2795_v61 = vsel %vm1008_vm0, %v7045_v15, 0.0 }
 0xcf1   : > { %v2789_v59 = vsel %vm1008_vm0, %v7042_v12, 0.0 }
 0xcf2   : > { %2790 = vadd.xlane.f32.xlu1 %v2789_v59  ;;  %2793 = vadd.xlane.f32.xlu0 %v2792_v16 }
 0xcf6   : > { %2796 = vadd.xlane.f32.xlu1 %v2795_v61 }
 0xd77   : > { %v2788_v19 = vpop.xlane.xlu0 %2787 }
 0xd78   : > { %v2798_v20 = vmul.f32 0.015625, %v2788_v19 }
 0xd7a   : > { %v2802_v0 = vsub.f32 %v7034_v32, %v2798_v20 }
 0xd7b   : > { %v2791_v21 = vpop.xlane.xlu1 %2790  ;;  %v2794_v5 = vpop.xlane.xlu0 %2793 }
 0xd7c   : > { %v2799_v4 = vmul.f32 0.015625, %v2791_v21  ;;  %v2800_v63 = vmul.f32 0.015625, %v2794_v5  ;;  %v2806_v23 = vmul.f32 %v2802_v0, %v2802_v0  ;;  %v5120_v21 = vld [vmem:[%s7692_s7 + $0x2] sm:$0x3]  ;;  %s6216_s7 = sshll.u32 %s6282_s5, 4  ;;  %s6217_s7 = int_to_ptr.vmem [resolvable:$false] %s6216_s7 }
 0xd7d   : > { %v2875_v5 = vrot.slane %v5120_v21, %v6610_v18  ;;  %s6218_s4 = scalar_lea.vmem %s6217_s7, 256 }
 0xd7e   : > { %v2803_v25 = vsub.f32 %v7042_v12, %v2799_v4  ;;  %v2804_v26 = vsub.f32 %v7037_v13, %v2800_v63  ;;  %v2810_v30 = vsel %vm1008_vm0, %v2806_v23, 0.0 }
 0xd7f   : > { %v2797_v39 = vpop.xlane.xlu1 %2796  ;;  %2811 = vadd.xlane.f32.xlu0 %v2810_v30 }
 0xd80   : > { %v2801_v40 = vmul.f32 0.015625, %v2797_v39  ;;  %v2807_v29 = vmul.f32 %v2803_v25, %v2803_v25  ;;  %v2808_v14 = vmul.f32 %v2804_v26, %v2804_v26 }
 0xd82   : > { %v2805_v17 = vsub.f32 %v7045_v15, %v2801_v40  ;;  %v2813_v31 = vsel %vm1008_vm0, %v2807_v29, 0.0  ;;  %v2816_v24 = vsel %vm1008_vm0, %v2808_v14, 0.0  ;;  %v2879_v14 = vrot.slane %v5120_v21, %v6620_v27 }
 0xd83   : > { %2814 = vadd.xlane.f32.xlu1 %v2813_v31  ;;  %2817 = vadd.xlane.f32.xlu0 %v2816_v24 }
 0xd84   : > { %v2809_v34 = vmul.f32 %v2805_v17, %v2805_v17 }
 0xd86   : > { %v2819_v46 = vsel %vm1008_vm0, %v2809_v34, 0.0 }
 0xd87   : > { %2820 = vadd.xlane.f32.xlu1 %v2819_v46 }
 0xe08   : > { %v2812_v49 = vpop.xlane.xlu0 %2811 }
 0xe09   : > { %v2822_v52 = vmul.f32 0.015625, %v2812_v49 }
 0xe0b   : > { %v2826_v53 = vadd.f32 1e-05, %v2822_v52 }
 0xe0c   : > { %v2815_v54 = vpop.xlane.xlu1 %2814  ;;  %v2818_v36 = vpop.xlane.xlu0 %2817 }
 0xe0d   : > { %6112 = vrsqrt.f32 %v2826_v53  ;;  %v2823_v55 = vmul.f32 0.015625, %v2815_v54  ;;  %v2824_v35 = vmul.f32 0.015625, %v2818_v36 }
 0xe0f   : > { %v2827_v58 = vadd.f32 1e-05, %v2823_v55  ;;  %v2828_v45 = vadd.f32 1e-05, %v2824_v35 }
 0xe10   : > { %v2821_v57 = vpop.xlane.xlu1 %2820 }
 0xe11   : > { %6114 = vrsqrt.f32 %v2827_v58  ;;  %v2825_v37 = vmul.f32 0.015625, %v2821_v57 }
 0xe12   : > { %6116 = vrsqrt.f32 %v2828_v45 }
 0xe13   : > { %v2829_v38 = vadd.f32 1e-05, %v2825_v37 }
 0xe15   : > { %6118 = vrsqrt.f32 %v2829_v38 }
 0xe1a   : > { %v6113_v33 = vpop.eup %6112 }
 0xe1b   : > { %v2834_v2 = vmul.f32 %v6113_v33, %v2802_v0 }
 0xe1d   : > { %v2844_v6 = vmul.f32 %v5110_v62, %v2834_v2 }
 0xe1e   : > { %v6115_v3 = vpop.eup %6114 }
 0xe1f   : > { %v2835_v56 = vmul.f32 %v6115_v3, %v2803_v25  ;;  %v6117_v9 = vpop.eup %6116  ;;  %v2854_v10 = vadd.f32 %v5111_v7, %v2844_v6 }
 0xe20   : > { %v2836_v11 = vmul.f32 %v6117_v9, %v2804_v26 }
 0xe21   : > { %v2845_v8 = vmul.f32 %v5110_v62, %v2835_v56 }
 0xe22   : > { %v6119_v1 = vpop.eup %6118  ;;  %v2846_v61 = vmul.f32 %v5110_v62, %v2836_v11 }
 0xe23   : > { %v2855_v22 = vadd.f32 %v5111_v7, %v2845_v8  ;;  %v2837_v28 = vmul.f32 %v6119_v1, %v2805_v17 }
 0xe24   : > { %v2856_v20 = vadd.f32 %v5111_v7, %v2846_v61 }
 0xe25   : > { %v2858_v59 = vpack.c.bf16 %v2855_v22, %v2854_v10  ;;  %v2847_v16 = vmul.f32 %v5110_v62, %v2837_v28 }
 0xe27   : > { %5129 = vmatmul.mubr.msk.bf16.vlgmr.msra.gmra.mxu1 %vm1008_vm0, %v2858_v59  ;;  %v2857_v19 = vadd.f32 %v5111_v7, %v2847_v16 }
 0xe28   : > { %2970 = vmatprep.mubr.bf16.mxu1 %v6274_v43 }
 0xe29   : > { %v2859_v0 = vpack.c.bf16 %v2857_v19, %v2856_v20 }
 0xe2f   : > { %5130 = vmatmul.mubr.msk.bf16.gmra.mxu1 %vm1008_vm0, %v2859_v0 }
 0xee7   : > { %v2962_v4 = vpop.f32.mrf.mxu1 }
 0xee8   : > { %v7098_v63 = vadd.f32 %v2962_v4, %v2875_v5 }
 0xee9   : > { %v2964_v23 = vpop.f32.mrf.mxu1 }
 0xeea   : > { %5664 = vmatprep.mubr.msk.f32.mxu1 %vm1215_vm1, %v7098_v63  ;;  %v7129_v41 = vadd.f32 %v2964_v23, %v2879_v14 }
 0xeeb   : > { %v2966_v25 = vpop.f32.mrf.mxu1 }
 0xeec   : > { %v7107_v17 = vadd.f32 %v2966_v25, %v2875_v5 }
 0xeed   : > { %v2968_v26 = vpop.f32.mrf.mxu1 }
 0xeee   : > { %v7121_v44 = vadd.f32 %v2968_v26, %v2879_v14 }
 0xeef   : > { %v2972_v30 = vpop.f32.mrf.mxu1 }
 0xef0   : > { %v7102_v39 = vadd.f32 %v2972_v30, %v2875_v5 }
 0xef1   : > { %v2974_v40 = vpop.f32.mrf.mxu1 }
 0xef2   : > { %2989 = vrot.lane.b32.xlu1 %v7102_v39, %s7693_s24  ;;  %v7117_v46 = vadd.f32 %v2974_v40, %v2879_v14 }
 0xef3   : > { %v2976_v29 = vpop.f32.mrf.mxu1 }
 0xef4   : > { %v7109_v31 = vadd.f32 %v2976_v29, %v2875_v5 }
 0xef5   : > { %v2978_v24 = vpop.f32.mrf.mxu1 }
 0xef6   : > { %v7111_v34 = vadd.f32 %v2978_v24, %v2879_v14  ;;  %2991 = vrot.lane.b32.xlu0 %v7109_v31, %s7693_s24  ;;  %2987 = vrot.lane.b32.xlu1 %v7107_v17, %s7693_s24 }
 0xef8   : > { %5670 = vmatprep.subr.mxu0 %v7111_v34 }
 0xef9   : > { %5671 = vmatpush3.msra.mxu0 %v7111_v34 }
 0xefa   : > { %3253 = vrot.lane.b32.xlu0 %v7109_v31, %s7694_s0  ;;  %5672 = vmatprep.subr.mxu0 %v7117_v46 }
 0xefb   : > { %2985 = vrot.lane.b32.xlu1 %v7098_v63, %s7693_s24  ;;  %5673 = vmatpush3.msra.mxu0 %v7117_v46  ;;  %s676_s24 = scalar_lea.vmem [#allocation2], %s4996_s26 }
 0xefc   : > { %5674 = vmatprep.subr.mxu0 %v7121_v44 }
 0xefd   : > { %5675 = vmatpush3.msra.mxu0 %v7121_v44 }
 0xefe   : > { %3249 = vrot.lane.b32.xlu0 %v7107_v17, %s7694_s0  ;;  %5676 = vmatprep.subr.mxu0 %v7129_v41 }
 0xeff   : > { %3251 = vrot.lane.b32.xlu1 %v7102_v39, %s7694_s0  ;;  %5677 = vmatpush3.msra.mxu0 %v7129_v41 }
 0xf02   : > { %3239 = vrot.lane.b32.xlu0 %v7098_v63, %s7695_s29 }
 0xf03   : > { %3247 = vrot.lane.b32.xlu1 %v7098_v63, %s7694_s0 }
 0xf06   : > { %3243 = vrot.lane.b32.xlu0 %v7102_v39, %s7695_s29 }
 0xf07   : > { %3241 = vrot.lane.b32.xlu1 %v7107_v17, %s7695_s29 }
 0xf0b   : > { %3245 = vrot.lane.b32.xlu1 %v7109_v31, %s7695_s29 }
 0xf64   : > { %v2990_v48 = vpop.permute.xlu1 %2989 }
 0xf68   : > { %v2992_v42 = vpop.permute.xlu0 %2991  ;;  %v2988_v50 = vpop.permute.xlu1 %2987 }
 0xf69   : > { %5656 = vmatprep.subr.msk.mxu1 %vm1215_vm1, %v2992_v42 }
 0xf6a   : > { %5657 = vmatpush3.xpose.msk.msra.mxu1 %vm1215_vm1, %v2992_v42 }
 0xf6b   : > { %5658 = vmatprep.subr.msk.mxu1 %vm1215_vm1, %v2990_v48 }
 0xf6c   : > { %v3254_v60 = vpop.permute.xlu0 %3253 }
 0xf6d   : > { %v2986_v51 = vpop.permute.xlu1 %2985 }
 0xf6e   : > { %5659 = vmatpush3.xpose.msk.msra.mxu1 %vm1215_vm1, %v2990_v48 }
 0xf6f   : > { %5660 = vmatprep.subr.msk.mxu1 %vm1215_vm1, %v2988_v50 }
 0xf70   : > { %v3250_v47 = vpop.permute.xlu0 %3249 }
 0xf71   : > { %v3252_v49 = vpop.permute.xlu1 %3251 }
 0xf72   : > { %5661 = vmatpush3.xpose.msk.msra.mxu1 %vm1215_vm1, %v2988_v50 }
 0xf73   : > { %5662 = vmatprep.subr.msk.mxu1 %vm1215_vm1, %v2986_v51 }
 0xf74   : > { %v3240_v52 = vpop.permute.xlu0 %3239 }
 0xf75   : > { %v3248_v53 = vpop.permute.xlu1 %3247 }
 0xf76   : > { %5663 = vmatpush3.xpose.msk.msra.mxu1 %vm1215_vm1, %v2986_v51 }
 0xf77   : > { %5684 = vmatprep.subr.msk.mxu1 %vm1215_vm1, %v3254_v60 }
 0xf78   : > { %v3244_v36 = vpop.permute.xlu0 %3243 }
 0xf79   : > { %5665 = vmatmul.mubr.msk.f32.vlgmr.msra.gmra.mxu1 %vm1215_vm1, %v7107_v17  ;;  %v3242_v54 = vpop.permute.xlu1 %3241 }
 0xf7a   : > { %5667 = vmatprep.mubr.msk.f32.mxu1 %vm1215_vm1, %v7102_v39  ;;  %5685 = vmatpush3.xpose.msk.msra.mxu1 %vm1215_vm1, %v3254_v60 }
 0xf7b   : > { %5686 = vmatprep.subr.msk.mxu1 %vm1215_vm1, %v3252_v49 }
 0xf7d   : > { %5668 = vmatmul.mubr.msk.f32.gmra.mxu1 %vm1215_vm1, %v7109_v31  ;;  %v3246_v55 = vpop.permute.xlu1 %3245 }
 0xf7e   : > { %5687 = vmatpush3.xpose.msk.msra.mxu1 %vm1215_vm1, %v3252_v49  ;;  %5692 = vmatprep.mubr.msk.f32.mxu1 %vm1215_vm1, %v3240_v52 }
 0xf7f   : > { %5688 = vmatprep.subr.msk.mxu1 %vm1215_vm1, %v3250_v47 }
 0xf82   : > { %5689 = vmatpush3.xpose.msk.msra.mxu1 %vm1215_vm1, %v3250_v47 }
 0xf83   : > { %5690 = vmatprep.subr.msk.mxu1 %vm1215_vm1, %v3248_v53 }
 0xf86   : > { %5691 = vmatpush3.xpose.msk.msra.mxu1 %vm1215_vm1, %v3248_v53 }
 0xf89   : > { %5693 = vmatmul.mubr.msk.f32.vlgmr.msra.gmra.mxu1 %vm1215_vm1, %v3242_v54 }
 0xf8a   : > { %5695 = vmatprep.mubr.msk.f32.mxu1 %vm1215_vm1, %v3244_v36 }
 0xf8d   : > { %5696 = vmatmul.mubr.msk.f32.gmra.mxu1 %vm1215_vm1, %v3246_v55 }
0x1039   : > { %v5666_v35 = vpop.f32.mrf.mxu1 }
0x103a   : > { %v3095_v58 = vmul.f32 0.25, %v5666_v35 }
0x103b   : > { %v3075_v45 = vpop.f32.mrf.mxu1 }
0x103c   : > { %v3094_v57 = vmul.f32 0.25, %v3075_v45  ;;  %v3101_v37 = vsel %vm1321_vm2, %v3095_v58, -inf }
0x103d   : > { %3102 = vmax.xlane.f32.xlu1 %v3101_v37  ;;  %v5669_v38 = vpop.f32.mrf.mxu1 }
0x103e   : > { %v3097_v33 = vmul.f32 0.25, %v5669_v38  ;;  %v3098_v2 = vsel %vm1321_vm2, %v3094_v57, -inf }
0x103f   : > { %3099 = vmax.xlane.f32.xlu0 %v3098_v2  ;;  %v3085_v62 = vpop.f32.mrf.mxu1 }
0x1040   : > { %v3096_v3 = vmul.f32 0.25, %v3085_v62  ;;  %v3107_v56 = vsel %vm1321_vm2, %v3097_v33, -inf }
0x1042   : > { %v3104_v6 = vsel %vm1321_vm2, %v3096_v3, -inf }
0x1043   : > { %3108 = vmax.xlane.f32.xlu0 %v3107_v56 }
0x1047   : > { %3105 = vmax.xlane.f32.xlu0 %v3104_v6 }
0x1049   : > { %v5694_v9 = vpop.f32.mrf.mxu1 }
0x104a   : > { %v3357_v7 = vmul.f32 0.25, %v5694_v9 }
0x104b   : > { %v3337_v8 = vpop.f32.mrf.mxu1 }
0x104c   : > { %v3356_v1 = vmul.f32 0.25, %v3337_v8  ;;  %v3363_v10 = vsel %vm1321_vm2, %v3357_v7, -inf }
0x104d   : > { %3364 = vmax.xlane.f32.xlu1 %v3363_v10  ;;  %v5697_v22 = vpop.f32.mrf.mxu1 }
0x104e   : > { %v7180_v11 = vmul.f32 0.25, %v5697_v22  ;;  %v3360_v28 = vsel %vm1321_vm2, %v3356_v1, -inf }
0x104f   : > { %3361 = vmax.xlane.f32.xlu0 %v3360_v28  ;;  %v3347_v59 = vpop.f32.mrf.mxu1 }
0x1050   : > { %v3358_v16 = vmul.f32 0.25, %v3347_v59  ;;  %v3369_v61 = vsel %vm1321_vm2, %v7180_v11, -inf }
0x1051   : > { %3370 = vmax.xlane.f32.xlu1 %v3369_v61 }
0x1052   : > { %v3366_v19 = vsel %vm1321_vm2, %v3358_v16, -inf }
0x1053   : > { %3367 = vmax.xlane.f32.xlu0 %v3366_v19 }
0x1062   : > { %3412 = vrot.lane.b32.xlu1 %v7117_v46, %s7695_s29 }
0x1066   : > { %3410 = vrot.lane.b32.xlu1 %v7121_v44, %s7695_s29 }
0x1069   : > { %3414 = vrot.lane.b32.xlu0 %v7111_v34, %s7695_s29 }
0x106a   : > { %3408 = vrot.lane.b32.xlu1 %v7129_v41, %s7695_s29  ;;  %s4933_s29 = sshll.u32 %s676_s24, 4  ;;  %s4934_s29 = int_to_ptr.vmem [resolvable:$true] %s4933_s29 }
0x106b   : > { %s6212_s1 = scalar_lea.vmem %s4934_s29, 128  ;;  %p6219_p0 = scmp.lt.s32.totalorder %s4934_s29, %s6217_s7 }
0x106c   : > { %p6213_p11 = scmp.ne.s32.totalorder %s4934_s29, %s6212_s1  ;;  %p6220_p1 = scmp.lt.s32.totalorder %s6218_s4, %s6212_s1 }
0x106e   : > { %p6214_p12 = pnand %p6213_p11, %p6436_p5  ;;  %p6221_p2 = por %p6220_p1, %p6219_p0 }
0x1070   : > { %p6215_p13 = pneg %p6214_p12 }
0x1072   : > { %p6222_p3 = pnand %p6221_p2, %p6215_p13 }
0x10c6   : > { %v3103_v20 = vpop.xlane.xlu1 %3102 }
0x10c7   : > { %v3111_v0 = vsub.f32 %v3095_v58, %v3103_v20 }
0x10c8   : > { %v3100_v21 = vpop.xlane.xlu0 %3099 }
0x10c9   : > { %v3116_v5 = vmul.f32 1.442695, %v3111_v0  ;;  %v3110_v4 = vsub.f32 %v3094_v57, %v3100_v21 }
0x10cb   : > { %6120 = vpow2.f32 %v3116_v5  ;;  %v3114_v23 = vmul.f32 1.442695, %v3110_v4 }
0x10cc   : > { %v3109_v25 = vpop.xlane.xlu0 %3108 }
0x10cd   : > { %6122 = vpow2.f32 %v3114_v23  ;;  %v3113_v26 = vsub.f32 %v3097_v33, %v3109_v25 }
0x10cf   : > { %v3120_v30 = vmul.f32 1.442695, %v3113_v26 }
0x10d0   : > { %v3106_v40 = vpop.xlane.xlu0 %3105 }
0x10d1   : > { %6124 = vpow2.f32 %v3120_v30  ;;  %v3112_v29 = vsub.f32 %v3096_v3, %v3106_v40 }
0x10d3   : > { %v3118_v14 = vmul.f32 1.442695, %v3112_v29 }
0x10d5   : > { %6126 = vpow2.f32 %v3118_v14 }
0x10d6   : > { %v3365_v24 = vpop.xlane.xlu1 %3364 }
0x10d7   : > { %v3373_v48 = vsub.f32 %v3357_v7, %v3365_v24 }
0x10d8   : > { %v7194_v42 = vpop.eup %6120  ;;  %v3362_v50 = vpop.xlane.xlu0 %3361 }
0x10d9   : > { %v3378_v60 = vmul.f32 1.442695, %v3373_v48  ;;  %v3372_v51 = vsub.f32 %v3356_v1, %v3362_v50  ;;  %v3125_v47 = vsel %vm1321_vm2, %v7194_v42, 0.0 }
0x10da   : > { %v6123_v49 = vpop.eup %6122  ;;  %3126 = vadd.xlane.f32.xlu1 %v3125_v47  ;;  %v3371_v2 = vpop.xlane.xlu1 %3370 }
0x10db   : > { %6128 = vpow2.f32 %v3378_v60  ;;  %v3376_v52 = vmul.f32 1.442695, %v3372_v51  ;;  %v3122_v53 = vsel %vm1321_vm2, %v6123_v49, 0.0  ;;  %v3375_v62 = vsub.f32 %v7180_v11, %v3371_v2 }
0x10dc   : > { %3123 = vadd.xlane.f32.xlu0 %v3122_v53  ;;  %v3368_v54 = vpop.xlane.xlu0 %3367 }
0x10dd   : > { %6130 = vpow2.f32 %v3376_v52  ;;  %v3374_v3 = vsub.f32 %v3358_v16, %v3368_v54  ;;  %v3382_v56 = vmul.f32 1.442695, %v3375_v62 }
0x10de   : > { %v7199_v36 = vpop.eup %6124  ;;  %v3413_v10 = vpop.permute.xlu1 %3412 }
0x10df   : > { %v3131_v55 = vsel %vm1321_vm2, %v7199_v36, 0.0  ;;  %v3380_v6 = vmul.f32 1.442695, %v3374_v3  ;;  %6132 = vpow2.f32 %v3382_v56 }
0x10e0   : > { %v3415_v35 = vpop.permute.xlu0 %3414  ;;  %3132 = vadd.xlane.f32.xlu1 %v3131_v55 }
0x10e1   : > { %5698 = vmatprep.subr.mxu0 %v3415_v35  ;;  %6134 = vpow2.f32 %v3380_v6 }
0x10e2   : > { %v6127_v58 = vpop.eup %6126  ;;  %v3411_v22 = vpop.permute.xlu1 %3410 }
0x10e3   : > { %v3128_v45 = vsel %vm1321_vm2, %v6127_v58, 0.0 }
0x10e4   : > { %3129 = vadd.xlane.f32.xlu0 %v3128_v45 }
0x10e6   : > { %v3409_v11 = vpop.permute.xlu1 %3408 }
0x10e8   : > { %v7204_v57 = vpop.eup %6128 }
0x10e9   : > { %v3387_v37 = vsel %vm1321_vm2, %v7204_v57, 0.0 }
0x10ea   : > { %v7208_v38 = vpop.eup %6130  ;;  %3388 = vadd.xlane.f32.xlu1 %v3387_v37 }
0x10eb   : > { %v3384_v33 = vsel %vm1321_vm2, %v7208_v38, 0.0 }
0x10ec   : > { %3385 = vadd.xlane.f32.xlu0 %v3384_v33  ;;  %v7217_v9 = vpop.eup %6132 }
0x10ed   : > { %v3393_v8 = vsel %vm1321_vm2, %v7217_v9, 0.0 }
0x10ee   : > { %v7219_v7 = vpop.eup %6134 }
0x10ef   : > { %v3390_v1 = vsel %vm1321_vm2, %v7219_v7, 0.0 }
0x10fb   : > { %3529 = vrot.lane.b32.xlu1 %v7102_v39, %s7696_s30 }
0x1102   : > { %3531 = vrot.lane.b32.xlu0 %v7109_v31, %s7696_s30 }
0x111f   : > { %3394 = vadd.xlane.f32.xlu1 %v3393_v8 }
0x1121   : > { %3391 = vadd.xlane.f32.xlu0 %v3390_v1 }
0x1130   : > { %3525 = vrot.lane.b32.xlu1 %v7098_v63, %s7696_s30 }
0x1134   : > { %3519 = vrot.lane.b32.xlu1 %v7107_v17, %s7697_s27 }
0x1137   : > { %3527 = vrot.lane.b32.xlu0 %v7107_v17, %s7696_s30 }
0x1138   : > { %3523 = vrot.lane.b32.xlu1 %v7109_v31, %s7697_s27 }
0x113b   : > { %3517 = vrot.lane.b32.xlu0 %v7098_v63, %s7697_s27 }
0x113f   : > { %3521 = vrot.lane.b32.xlu0 %v7102_v39, %s7697_s27 }
0x1163   : > { %v3127_v28 = vpop.xlane.xlu1 %3126 }
0x1164   : > { %6136 = vrcp.f32 %v3127_v28 }
0x1165   : > { %v3124_v59 = vpop.xlane.xlu0 %3123 }
0x1166   : > { %6138 = vrcp.f32 %v3124_v59 }
0x1169   : > { %v3133_v16 = vpop.xlane.xlu1 %3132 }
0x116a   : > { %6140 = vrcp.f32 %v3133_v16 }
0x116d   : > { %v3130_v61 = vpop.xlane.xlu0 %3129 }
0x116e   : > { %6142 = vrcp.f32 %v3130_v61 }
0x1171   : > { %v6137_v19 = vpop.eup %6136 }
0x1172   : > { %v3139_v4 = vmul.f32 %v6137_v19, %v7194_v42 }
0x1173   : > { %v6139_v20 = vpop.eup %6138  ;;  %v3389_v0 = vpop.xlane.xlu1 %3388 }
0x1174   : > { %v3138_v21 = vmul.f32 %v6139_v20, %v6123_v49  ;;  %6144 = vrcp.f32 %v3389_v0 }
0x1175   : > { %v3386_v5 = vpop.xlane.xlu0 %3385 }
0x1176   : > { %6146 = vrcp.f32 %v3386_v5  ;;  %5678 = vmatprep.mubr.msk.f32.mxu0 %vm1321_vm2, %v3138_v21 }
0x1177   : > { %5679 = vmatmul.mubr.msk.f32.vlgmr.msra.gmra.mxu0 %vm1321_vm2, %v3139_v4  ;;  %v6141_v23 = vpop.eup %6140  ;;  %v3530_v42 = vpop.permute.xlu1 %3529 }
0x1178   : > { %5699 = vmatpush3.msra.mxu0 %v3415_v35  ;;  %v3141_v30 = vmul.f32 %v6141_v23, %v7199_v36 }
0x1179   : > { %5700 = vmatprep.subr.mxu0 %v3413_v10  ;;  %v3532_v40 = vpop.permute.xlu0 %3531 }
0x117a   : > { %5701 = vmatpush3.msra.mxu0 %v3413_v10 }
0x117b   : > { %v6143_v25 = vpop.eup %6142  ;;  %5702 = vmatprep.subr.mxu0 %v3411_v22 }
0x117c   : > { %5703 = vmatpush3.msra.mxu0 %v3411_v22  ;;  %v3140_v26 = vmul.f32 %v6143_v25, %v6127_v58 }
0x117d   : > { %5704 = vmatprep.subr.mxu0 %v3409_v11 }
0x117e   : > { %5705 = vmatpush3.msra.mxu0 %v3409_v11  ;;  %5681 = vmatprep.mubr.msk.f32.mxu0 %vm1321_vm2, %v3140_v26 }
0x117f   : > { %5712 = vmatprep.subr.msk.mxu0 %vm1215_vm1, %v3532_v40  ;;  %5682 = vmatmul.mubr.msk.f32.gmra.mxu0 %vm1321_vm2, %v3141_v30 }
0x1181   : > { %v6145_v29 = vpop.eup %6144 }
0x1182   : > { %v3401_v48 = vmul.f32 %v6145_v29, %v7204_v57 }
0x1183   : > { %v6147_v14 = vpop.eup %6146 }
0x1184   : > { %v3400_v24 = vmul.f32 %v6147_v14, %v7208_v38 }
0x1186   : > { %5706 = vmatprep.mubr.msk.f32.mxu0 %vm1321_vm2, %v3400_v24 }
0x1187   : > { %5707 = vmatmul.mubr.msk.f32.vlgmr.msra.gmra.mxu0 %vm1321_vm2, %v3401_v48 }
0x1188   : > { %5713 = vmatpush3.xpose.msk.msra.mxu0 %vm1215_vm1, %v3532_v40 }
0x1189   : > { %5714 = vmatprep.subr.msk.mxu0 %vm1215_vm1, %v3530_v42 }
0x118c   : > { %5715 = vmatpush3.xpose.msk.msra.mxu0 %vm1215_vm1, %v3530_v42 }
0x11a8   : > { %v3395_v50 = vpop.xlane.xlu1 %3394 }
0x11a9   : > { %6148 = vrcp.f32 %v3395_v50 }
0x11aa   : > { %v3392_v60 = vpop.xlane.xlu0 %3391 }
0x11ab   : > { %6150 = vrcp.f32 %v3392_v60 }
0x11ac   : > { %v3526_v47 = vpop.permute.xlu1 %3525 }
0x11ae   : > { %v3528_v51 = vpop.permute.xlu0 %3527 }
0x11af   : > { %5716 = vmatprep.subr.msk.mxu0 %vm1215_vm1, %v3528_v51 }
0x11b0   : > { %5717 = vmatpush3.xpose.msk.msra.mxu0 %vm1215_vm1, %v3528_v51  ;;  %v3520_v55 = vpop.permute.xlu1 %3519 }
0x11b1   : > { %5718 = vmatprep.subr.msk.mxu0 %vm1215_vm1, %v3526_v47 }
0x11b2   : > { %v3518_v54 = vpop.permute.xlu0 %3517 }
0x11b4   : > { %5719 = vmatpush3.xpose.msk.msra.mxu0 %vm1215_vm1, %v3526_v47  ;;  %v3524_v58 = vpop.permute.xlu1 %3523 }
0x11b6   : > { %v6149_v49 = vpop.eup %6148  ;;  %v3522_v35 = vpop.permute.xlu0 %3521 }
0x11b7   : > { %v3403_v36 = vmul.f32 %v6149_v49, %v7217_v9 }
0x11b8   : > { %v6151_v52 = vpop.eup %6150 }
0x11b9   : > { %v3402_v53 = vmul.f32 %v6151_v52, %v7219_v7 }
0x11bb   : > { %5709 = vmatprep.mubr.msk.f32.mxu0 %vm1321_vm2, %v3402_v53 }
0x11bc   : > { %5710 = vmatmul.mubr.msk.f32.gmra.mxu0 %vm1321_vm2, %v3403_v36 }
0x11bd   : > { %5720 = vmatprep.mubr.msk.f32.mxu0 %vm1215_vm1, %v3518_v54 }
0x11c0   : > { %5721 = vmatmul.mubr.msk.f32.vlgmr.msra.gmra.mxu0 %vm1215_vm1, %v3520_v55 }
0x11c1   : > { %5723 = vmatprep.mubr.msk.f32.mxu0 %vm1215_vm1, %v3522_v35 }
0x11c4   : > { %5724 = vmatmul.mubr.msk.f32.gmra.mxu0 %vm1215_vm1, %v3524_v58 }
0x1237   : > { %v7263_v45 = vpop.f32.mrf.mxu0 }
0x1239   : > { %v7265_v57 = vpop.f32.mrf.mxu0 }
0x123f   : > { %v7267_v37 = vpop.f32.mrf.mxu0 }
0x1241   : > { %v7269_v38 = vpop.f32.mrf.mxu0 }
0x1247   : > { %v7271_v33 = vpop.f32.mrf.mxu0 }
0x1249   : > { %v7273_v2 = vpop.f32.mrf.mxu0 }
0x124a   : > { %v5890_v62 = vpack.i.bf16 %v7271_v33, %v7273_v2 }
0x127c   : > { %v7277_v3 = vpop.f32.mrf.mxu0 }
0x127e   : > { %v7279_v56 = vpop.f32.mrf.mxu0 }
0x127f   : > { %v5895_v6 = vpack.i.bf16 %v7277_v3, %v7279_v56 }
0x1280   : > { %v5722_v9 = vpop.f32.mrf.mxu0 }
0x1281   : > { %v3635_v7 = vmul.f32 0.25, %v5722_v9 }
0x1282   : > { %v3615_v8 = vpop.f32.mrf.mxu0 }
0x1283   : > { %v3634_v1 = vmul.f32 0.25, %v3615_v8  ;;  %v3641_v10 = vsel %vm1321_vm2, %v3635_v7, -inf }
0x1284   : > { %3642 = vmax.xlane.f32.xlu1 %v3641_v10  ;;  %v5725_v22 = vpop.f32.mrf.mxu0 }
0x1285   : > { %v3637_v11 = vmul.f32 0.25, %v5725_v22  ;;  %v3638_v28 = vsel %vm1321_vm2, %v3634_v1, -inf }
0x1286   : > { %3639 = vmax.xlane.f32.xlu0 %v3638_v28  ;;  %v3625_v59 = vpop.f32.mrf.mxu0 }
0x1287   : > { %v3636_v16 = vmul.f32 0.25, %v3625_v59  ;;  %v3647_v61 = vsel %vm1321_vm2, %v3637_v11, -inf }
0x1289   : > { %v3644_v19 = vsel %vm1321_vm2, %v3636_v16, -inf }
0x128a   : > { %3648 = vmax.xlane.f32.xlu0 %v3647_v61 }
0x128e   : > { %3645 = vmax.xlane.f32.xlu0 %v3644_v19 }
0x1295   : > { %3686 = vrot.lane.b32.xlu1 %v7117_v46, %s7697_s27 }
0x1299   : > { %3684 = vrot.lane.b32.xlu1 %v7121_v44, %s7697_s27 }
0x129d   : > { %3682 = vrot.lane.b32.xlu1 %v7129_v41, %s7697_s27 }
0x12a4   : > { %3688 = vrot.lane.b32.xlu0 %v7111_v34, %s7697_s27 }
0x130d   : > { %v3643_v20 = vpop.xlane.xlu1 %3642 }
0x130e   : > { %v3651_v0 = vsub.f32 %v3635_v7, %v3643_v20 }
0x130f   : > { %v3640_v21 = vpop.xlane.xlu0 %3639 }
0x1310   : > { %v3656_v5 = vmul.f32 1.442695, %v3651_v0  ;;  %v3650_v4 = vsub.f32 %v3634_v1, %v3640_v21 }
0x1311   : > { %v3687_v26 = vpop.permute.xlu1 %3686 }
0x1312   : > { %6152 = vpow2.f32 %v3656_v5  ;;  %v3654_v23 = vmul.f32 1.442695, %v3650_v4 }
0x1313   : > { %v3649_v25 = vpop.xlane.xlu0 %3648 }
0x1314   : > { %6154 = vpow2.f32 %v3654_v23  ;;  %v3653_v60 = vsub.f32 %v3637_v11, %v3649_v25 }
0x1315   : > { %v3685_v40 = vpop.permute.xlu1 %3684 }
0x1316   : > { %v3660_v47 = vmul.f32 1.442695, %v3653_v60 }
0x1317   : > { %v3646_v30 = vpop.xlane.xlu0 %3645 }
0x1318   : > { %v3652_v51 = vsub.f32 %v3636_v16, %v3646_v30  ;;  %6156 = vpow2.f32 %v3660_v47 }
0x1319   : > { %v3683_v42 = vpop.permute.xlu1 %3682 }
0x131a   : > { %v3658_v49 = vmul.f32 1.442695, %v3652_v51 }
0x131b   : > { %v3689_v29 = vpop.permute.xlu0 %3688 }
0x131c   : > { %5726 = vmatprep.subr.mxu1 %v3689_v29  ;;  %6158 = vpow2.f32 %v3658_v49 }
0x131d   : > { %5727 = vmatpush3.msra.mxu1 %v3689_v29 }
0x131e   : > { %5728 = vmatprep.subr.mxu1 %v3687_v26 }
0x131f   : > { %v6153_v14 = vpop.eup %6152  ;;  %5729 = vmatpush3.msra.mxu1 %v3687_v26 }
0x1320   : > { %5730 = vmatprep.subr.mxu1 %v3685_v40  ;;  %v3665_v24 = vsel %vm1321_vm2, %v6153_v14, 0.0 }
0x1321   : > { %v6155_v48 = vpop.eup %6154  ;;  %3666 = vadd.xlane.f32.xlu1 %v3665_v24  ;;  %5731 = vmatpush3.msra.mxu1 %v3685_v40 }
0x1322   : > { %5732 = vmatprep.subr.mxu1 %v3683_v42  ;;  %v3662_v50 = vsel %vm1321_vm2, %v6155_v48, 0.0 }
0x1323   : > { %3663 = vadd.xlane.f32.xlu0 %v3662_v50  ;;  %5733 = vmatpush3.msra.mxu1 %v3683_v42 }
0x1325   : > { %v6157_v52 = vpop.eup %6156 }
0x1326   : > { %v3671_v54 = vsel %vm1321_vm2, %v6157_v52, 0.0 }
0x1329   : > { %v6159_v53 = vpop.eup %6158 }
0x132a   : > { %v3668_v36 = vsel %vm1321_vm2, %v6159_v53, 0.0 }
0x1332   : > { %3803 = vrot.lane.b32.xlu1 %v7102_v39, %s7698_s23 }
0x1339   : > { %3805 = vrot.lane.b32.xlu0 %v7109_v31, %s7698_s23 }
0x1356   : > { %3672 = vadd.xlane.f32.xlu1 %v3671_v54 }
0x1358   : > { %3669 = vadd.xlane.f32.xlu0 %v3668_v36 }
0x1367   : > { %3799 = vrot.lane.b32.xlu1 %v7098_v63, %s7698_s23 }
0x136b   : > { %3793 = vrot.lane.b32.xlu1 %v7107_v17, %s7699_s2 }
0x136e   : > { %3801 = vrot.lane.b32.xlu0 %v7107_v17, %s7698_s23 }
0x136f   : > { %3797 = vrot.lane.b32.xlu1 %v7109_v31, %s7699_s2 }
0x1372   : > { %3791 = vrot.lane.b32.xlu0 %v7098_v63, %s7699_s2 }
0x1376   : > { %3795 = vrot.lane.b32.xlu0 %v7102_v39, %s7699_s2 }
0x13aa   : > { %v3667_v55 = vpop.xlane.xlu1 %3666 }
0x13ab   : > { %6160 = vrcp.f32 %v3667_v55 }
0x13ac   : > { %v3664_v35 = vpop.xlane.xlu0 %3663 }
0x13ad   : > { %6162 = vrcp.f32 %v3664_v35 }
0x13ae   : > { %v3804_v31 = vpop.permute.xlu1 %3803 }
0x13b0   : > { %v3806_v58 = vpop.permute.xlu0 %3805 }
0x13b1   : > { %5740 = vmatprep.subr.msk.mxu1 %vm1215_vm1, %v3806_v58 }
0x13b8   : > { %v6161_v9 = vpop.eup %6160 }
0x13b9   : > { %v3679_v17 = vmul.f32 %v6161_v9, %v6153_v14 }
0x13ba   : > { %v6163_v7 = vpop.eup %6162 }
0x13bb   : > { %v3678_v8 = vmul.f32 %v6163_v7, %v6155_v48 }
0x13bd   : > { %5734 = vmatprep.mubr.msk.f32.mxu1 %vm1321_vm2, %v3678_v8 }
0x13be   : > { %5735 = vmatmul.mubr.msk.f32.vlgmr.msra.gmra.mxu1 %vm1321_vm2, %v3679_v17 }
0x13bf   : > { %5741 = vmatpush3.xpose.msk.msra.mxu1 %vm1215_vm1, %v3806_v58 }
0x13c0   : > { %5742 = vmatprep.subr.msk.mxu1 %vm1215_vm1, %v3804_v31 }
0x13c3   : > { %5743 = vmatpush3.xpose.msk.msra.mxu1 %vm1215_vm1, %v3804_v31 }
0x13df   : > { %v3673_v63 = vpop.xlane.xlu1 %3672 }
0x13e0   : > { %6164 = vrcp.f32 %v3673_v63 }
0x13e1   : > { %v3670_v39 = vpop.xlane.xlu0 %3669 }
0x13e2   : > { %6166 = vrcp.f32 %v3670_v39 }
0x13e3   : > { %v3800_v10 = vpop.permute.xlu1 %3799 }
0x13e5   : > { %v3802_v1 = vpop.permute.xlu0 %3801 }
0x13e6   : > { %5744 = vmatprep.subr.msk.mxu1 %vm1215_vm1, %v3802_v1 }
0x13e7   : > { %5745 = vmatpush3.xpose.msk.msra.mxu1 %vm1215_vm1, %v3802_v1  ;;  %v3794_v61 = vpop.permute.xlu1 %3793 }
0x13e8   : > { %5746 = vmatprep.subr.msk.mxu1 %vm1215_vm1, %v3800_v10 }
0x13e9   : > { %v3792_v59 = vpop.permute.xlu0 %3791 }
0x13eb   : > { %5747 = vmatpush3.xpose.msk.msra.mxu1 %vm1215_vm1, %v3800_v10  ;;  %v3798_v20 = vpop.permute.xlu1 %3797 }
0x13ed   : > { %v6165_v22 = vpop.eup %6164  ;;  %v3796_v19 = vpop.permute.xlu0 %3795 }
0x13ee   : > { %v3681_v16 = vmul.f32 %v6165_v22, %v6157_v52 }
0x13ef   : > { %v6167_v11 = vpop.eup %6166 }
0x13f0   : > { %v3680_v28 = vmul.f32 %v6167_v11, %v6159_v53 }
0x13f2   : > { %5737 = vmatprep.mubr.msk.f32.mxu1 %vm1321_vm2, %v3680_v28 }
0x13f3   : > { %5738 = vmatmul.mubr.msk.f32.gmra.mxu1 %vm1321_vm2, %v3681_v16 }
0x13f4   : > { %5748 = vmatprep.mubr.msk.f32.mxu1 %vm1215_vm1, %v3792_v59 }
0x13f7   : > { %5749 = vmatmul.mubr.msk.f32.vlgmr.msra.gmra.mxu1 %vm1215_vm1, %v3794_v61 }
0x13f8   : > { %5751 = vmatprep.mubr.msk.f32.mxu1 %vm1215_vm1, %v3796_v19 }
0x13fb   : > { %5752 = vmatmul.mubr.msk.f32.gmra.mxu1 %vm1215_vm1, %v3798_v20 }
0x147e   : > { %v5736_v0 = vpop.f32.mrf.mxu1 }
0x1480   : > { %v3772_v21 = vpop.f32.mrf.mxu1 }
0x1481   : > { %v5900_v5 = vpack.i.bf16 %v5736_v0, %v3772_v21  ;;  %v5984_v21 = vld [vmem:[%s7620_s8 + $0x38] sm:$0xff]  }
0x14b3   : > { %v5739_v4 = vpop.f32.mrf.mxu1 }
0x14b5   : > { %v3782_v23 = vpop.f32.mrf.mxu1 }
0x14b6   : > { %v5905_v25 = vpack.i.bf16 %v5739_v4, %v3782_v23  ;;  %v5986_v4 = vld [vmem:[%s7620_s8 + $0x28] sm:$0xff]   ;;  %v5987_v23 = vld [vmem:[%s7620_s8 + $0x20] sm:$0xff]  }
0x14b7   : > { %v5750_v26 = vpop.f32.mrf.mxu1 }
0x14b8   : > { %v3909_v30 = vmul.f32 0.25, %v5750_v26 }
0x14b9   : > { %v3889_v40 = vpop.f32.mrf.mxu1 }
0x14ba   : > { %v3908_v29 = vmul.f32 0.25, %v3889_v40  ;;  %v3915_v14 = vsel %vm1321_vm2, %v3909_v30, -inf }
0x14bb   : > { %3916 = vmax.xlane.f32.xlu1 %v3915_v14  ;;  %v5753_v24 = vpop.f32.mrf.mxu1 }
0x14bc   : > { %v3912_v48 = vsel %vm1321_vm2, %v3908_v29, -inf  ;;  %v3911_v60 = vmul.f32 0.25, %v5753_v24 }
0x14bd   : > { %3913 = vmax.xlane.f32.xlu0 %v3912_v48  ;;  %v3899_v42 = vpop.f32.mrf.mxu1 }
0x14be   : > { %v3910_v50 = vmul.f32 0.25, %v3899_v42  ;;  %v3921_v47 = vsel %vm1321_vm2, %v3911_v60, -inf }
0x14c0   : > { %v3918_v51 = vsel %vm1321_vm2, %v3910_v50, -inf }
0x14c1   : > { %3919 = vmax.xlane.f32.xlu0 %v3918_v51 }
0x14c5   : > { %3922 = vmax.xlane.f32.xlu0 %v3921_v47 }
0x1544   : > { %v3917_v49 = vpop.xlane.xlu1 %3916 }
0x1545   : > { %v3925_v52 = vsub.f32 %v3909_v30, %v3917_v49 }
0x1546   : > { %v3914_v53 = vpop.xlane.xlu0 %3913 }
0x1547   : > { %v3930_v54 = vmul.f32 1.442695, %v3925_v52  ;;  %v3924_v36 = vsub.f32 %v3908_v29, %v3914_v53 }
0x1549   : > { %6168 = vpow2.f32 %v3930_v54  ;;  %v3928_v55 = vmul.f32 1.442695, %v3924_v36 }
0x154a   : > { %v3920_v35 = vpop.xlane.xlu0 %3919 }
0x154b   : > { %6170 = vpow2.f32 %v3928_v55  ;;  %v3926_v58 = vsub.f32 %v3910_v50, %v3920_v35 }
0x154d   : > { %v3932_v9 = vmul.f32 1.442695, %v3926_v58 }
0x154e   : > { %v3923_v7 = vpop.xlane.xlu0 %3922 }
0x154f   : > { %6172 = vpow2.f32 %v3932_v9  ;;  %v3927_v8 = vsub.f32 %v3911_v60, %v3923_v7 }
0x1551   : > { %v3934_v17 = vmul.f32 1.442695, %v3927_v8 }
0x1553   : > { %6174 = vpow2.f32 %v3934_v17 }
0x1556   : > { %v6169_v31 = vpop.eup %6168 }
0x1557   : > { %v3939_v63 = vsel %vm1321_vm2, %v6169_v31, 0.0 }
0x1558   : > { %v6171_v39 = vpop.eup %6170  ;;  %3940 = vadd.xlane.f32.xlu1 %v3939_v63 }
0x1559   : > { %v3936_v1 = vsel %vm1321_vm2, %v6171_v39, 0.0 }
0x155a   : > { %3937 = vadd.xlane.f32.xlu0 %v3936_v1 }
0x155c   : > { %v6173_v10 = vpop.eup %6172 }
0x155d   : > { %v3942_v22 = vsel %vm1321_vm2, %v6173_v10, 0.0 }
0x155e   : > { %3943 = vadd.xlane.f32.xlu0 %v3942_v22 }
0x1560   : > { %v6175_v11 = vpop.eup %6174 }
0x1561   : > { %v3945_v28 = vsel %vm1321_vm2, %v6175_v11, 0.0 }
0x1562   : > { %3946 = vadd.xlane.f32.xlu1 %v3945_v28 }
0x1573   : > { %3960 = vrot.lane.b32.xlu1 %v7117_v46, %s7699_s2 }
0x1574   : > { %3962 = vrot.lane.b32.xlu0 %v7111_v34, %s7699_s2 }
0x1577   : > { %3958 = vrot.lane.b32.xlu1 %v7121_v44, %s7699_s2 }
0x1578   : > { %5891 = vrot.lane.b32.xlu0 %v5890_v62, %s7698_s23 }
0x157b   : > { %3956 = vrot.lane.b32.xlu1 %v7129_v41, %s7699_s2  ;;  %s4920_s2 = scalar_lea.sflag [#allocation3], %s674_s22 }
0x157c   : > { %5901 = vrot.lane.b32.xlu0 %v5900_v5, %s7696_s30  ;;  %v5985_v5 = vld [vmem:[%s7620_s8 + $0x30] sm:$0xff]  }
0x157f   : > { %5896 = vrot.lane.b32.xlu1 %v5895_v6, %s7698_s23  ;;  %s7700_s23 = sld [smem:[#allocation19_spill]] }
0x1583   : > { %5906 = vrot.lane.b32.xlu1 %v5905_v25, %s7696_s30 }
0x15e1   : > { %v3941_v46 = vpop.xlane.xlu1 %3940 }
0x15e3   : > { %v3938_v34 = vpop.xlane.xlu0 %3937 }
0x15e4   : > { %6176 = vrcp.f32 %v3938_v34 }
0x15e5   : > { %6178 = vrcp.f32 %v3941_v46 }
0x15e7   : > { %v3944_v44 = vpop.xlane.xlu0 %3943 }
0x15e8   : > { %6180 = vrcp.f32 %v3944_v44 }
0x15eb   : > { %v3963_v33 = vpop.permute.xlu0 %3962  ;;  %v3947_v2 = vpop.xlane.xlu1 %3946 }
0x15ec   : > { %6182 = vrcp.f32 %v3947_v2  ;;  %5754 = vmatprep.subr.mxu0 %v3963_v33 }
0x15ed   : > { %5755 = vmatpush3.msra.mxu0 %v3963_v33 }
0x15ef   : > { %v3961_v41 = vpop.permute.xlu1 %3960  ;;  %v5892_v24 = vpop.permute.xlu0 %5891 }
0x15f0   : > { %5756 = vmatprep.subr.mxu0 %v3961_v41  ;;  %v5894_v50 = vunpack.i.h.bf16 %v5892_v24  ;;  %v5893_v60 = vunpack.i.l.bf16 %v5892_v24 }
0x15f1   : > { %v6177_v62 = vpop.eup %6176  ;;  %5757 = vmatpush3.msra.mxu0 %v3961_v41 }
0x15f2   : > { %v3952_v59 = vmul.f32 %v6177_v62, %v6171_v39  ;;  %v6179_v56 = vpop.eup %6178  ;;  %v4114_v52 = vsel %vm1215_vm1, %v7263_v45, %v5894_v50  ;;  %v4113_v53 = vsel %vm1215_vm1, %v7265_v57, %v5893_v60 }
0x15f3   : > { %v3959_v3 = vpop.permute.xlu1 %3958  ;;  %v3953_v61 = vmul.f32 %v6179_v56, %v6169_v31  ;;  %v5902_v42 = vpop.permute.xlu0 %5901 }
0x15f4   : > { %5758 = vmatprep.subr.mxu0 %v3959_v3  ;;  %5762 = vmatprep.mubr.msk.f32.mxu0 %vm1321_vm2, %v3952_v59  ;;  %v5904_v51 = vunpack.i.h.bf16 %v5902_v42  ;;  %v5903_v47 = vunpack.i.l.bf16 %v5902_v42 }
0x15f5   : > { %5759 = vmatpush3.msra.mxu0 %v3959_v3  ;;  %v6181_v6 = vpop.eup %6180 }
0x15f6   : > { %v3954_v20 = vmul.f32 %v6181_v6, %v6173_v10  ;;  %v4117_v9 = vsel %vm1321_vm2, %v4113_v53, %v5903_v47  ;;  %v4118_v7 = vsel %vm1321_vm2, %v4114_v52, %v5904_v51  ;;  %v5988_v52 = vld [vmem:[%s7624_s12 + $0x38] sm:$0xff]   ;;  %v5989_v53 = vld [vmem:[%s7624_s12 + $0x30] sm:$0xff]  }
0x15f7   : > { %v3957_v16 = vpop.permute.xlu1 %3956  ;;  %5780 = vmatprep.subr.bf16.mxu1 %v5988_v52 }
0x15f8   : > { %5760 = vmatprep.subr.mxu0 %v3957_v16  ;;  %5781 = vmatpush3.bf16.msra.mxu1 %v5988_v52 }
0x15f9   : > { %v6183_v19 = vpop.eup %6182  ;;  %5761 = vmatpush3.msra.mxu0 %v3957_v16  ;;  %5782 = vmatprep.subr.bf16.mxu1 %v5989_v53 }
0x15fa   : > { %5763 = vmatmul.mubr.msk.f32.vlgmr.msra.gmra.mxu0 %vm1321_vm2, %v3953_v61  ;;  %v3955_v0 = vmul.f32 %v6183_v19, %v6175_v11  ;;  %5768 = vmatprep.subr.bf16.mxu0 %v5984_v21 }
0x15fb   : > { %5765 = vmatprep.mubr.msk.f32.mxu0 %vm1321_vm2, %v3954_v20  ;;  %5769 = vmatpush3.bf16.msra.mxu0 %v5984_v21  ;;  %v5897_v48 = vpop.permute.xlu1 %5896 }
0x15fc   : > { %5770 = vmatprep.subr.bf16.mxu0 %v5985_v5  ;;  %v5899_v36 = vunpack.i.h.bf16 %v5897_v48  ;;  %v5898_v55 = vunpack.i.l.bf16 %v5897_v48  ;;  %5783 = vmatpush3.bf16.msra.mxu1 %v5989_v53 }
0x15fe   : > { %5766 = vmatmul.mubr.msk.f32.gmra.mxu0 %vm1321_vm2, %v3955_v0  ;;  %v4116_v57 = vsel %vm1215_vm1, %v7267_v37, %v5899_v36  ;;  %v4115_v1 = vsel %vm1215_vm1, %v7269_v38, %v5898_v55  ;;  %v5188_v37 = vld [vmem:[%s7621_s9 + $0x1] ss:$0 sm:$0xff] }
0x15ff   : > { %5771 = vmatpush3.bf16.msra.mxu0 %v5985_v5  ;;  %v5907_v49 = vpop.permute.xlu1 %5906  ;;  %v5991_v36 = vld [vmem:[%s7624_s12 + $0x20] sm:$0xff]  }
0x1600   : > { %5772 = vmatprep.subr.bf16.mxu0 %v5986_v4  ;;  %v5909_v8 = vunpack.i.h.bf16 %v5907_v49  ;;  %v5908_v17 = vunpack.i.l.bf16 %v5907_v49 }
0x1602   : > { %v4119_v11 = vsel %vm1321_vm2, %v4115_v1, %v5908_v17  ;;  %v4120_v28 = vsel %vm1321_vm2, %v4116_v57, %v5909_v8 }
0x1603   : > { %5773 = vmatpush3.bf16.msra.mxu0 %v5986_v4 }
0x1604   : > { %5774 = vmatprep.subr.bf16.mxu0 %v5987_v23 }
0x1607   : > { %5775 = vmatpush3.bf16.msra.mxu0 %v5987_v23 }
0x16ba   : > { %v5764_v25 = vpop.f32.mrf.mxu0 }
0x16bc   : > { %v4046_v26 = vpop.f32.mrf.mxu0 }
0x16bd   : > { %v5910_v30 = vpack.i.bf16 %v5764_v25, %v4046_v26 }
0x16be   : > { %v5767_v40 = vpop.f32.mrf.mxu0 }
0x16bf   : > { %5911 = vrot.lane.b32.xlu0 %v5910_v30, %s7694_s0 }
0x16c0   : > { %v4056_v29 = vpop.f32.mrf.mxu0 }
0x16c1   : > { %v5915_v14 = vpack.i.bf16 %v5767_v40, %v4056_v29 }
0x16c3   : > { %5916 = vrot.lane.b32.xlu1 %v5915_v14, %s7694_s0  ;;  %s4931_s0 = scalar_lea.hbm %s7700_s23, %s5267_s3 }
0x1731   : > { %v5912_v54 = vpop.permute.xlu0 %5911 }
0x1732   : > { %v5914_v35 = vunpack.i.h.bf16 %v5912_v54  ;;  %v5913_v58 = vunpack.i.l.bf16 %v5912_v54  ;;  %v5990_v54 = vld [vmem:[%s7624_s12 + $0x28] sm:$0xff]  }
0x1733   : > { %5784 = vmatprep.subr.bf16.mxu1 %v5990_v54 }
0x1734   : > { %v4122_v31 = vsel %vm2345_vm3, %v4118_v7, %v5914_v35  ;;  %v4121_v63 = vsel %vm2345_vm3, %v4117_v9, %v5913_v58  ;;  %5785 = vmatpush3.bf16.msra.mxu1 %v5990_v54 }
0x1735   : > { %v4125_v39 = vpack.c.bf16 %v4122_v31, %v4121_v63  ;;  %v5917_v45 = vpop.permute.xlu1 %5916  ;;  %5786 = vmatprep.subr.bf16.mxu1 %v5991_v36 }
0x1736   : > { %v5919_v10 = vunpack.i.h.bf16 %v5917_v45  ;;  %v5918_v22 = vunpack.i.l.bf16 %v5917_v45 }
0x1737   : > { %5776 = vmatprep.mubr.msk.bf16.mxu0 %vm1008_vm0, %v4125_v39 }
0x1738   : > { %v4123_v34 = vsel %vm2345_vm3, %v4119_v11, %v5918_v22  ;;  %v4124_v46 = vsel %vm2345_vm3, %v4120_v28, %v5919_v10  ;;  %5787 = vmatpush3.bf16.msra.mxu1 %v5991_v36  ;;  %v5197_v22 = vld [vmem:[%s7622_s10 + $0x1] ss:$0 sm:$0xff] }
0x1739   : > { %v4126_v44 = vpack.c.bf16 %v4124_v46, %v4123_v34 }
0x173b   : > { %5777 = vmatmul.mubr.msk.bf16.vlgmr.msra.gmra.mxu0 %vm1008_vm0, %v4126_v44 }
0x17fb   : > { %v5778_v33 = vpop.f32.mrf.mxu0 }
0x17fc   : > { %v4217_v2 = vadd.f32 %v5778_v33, %v5188_v37  ;;  %v5198_v33 = vld [vmem:[%s7623_s11 + $0x1] ss:$0 sm:$0xff] }
0x17fd   : > { %v4208_v38 = vpop.f32.mrf.mxu0 }
0x17fe   : > { %v4209_v41 = vadd.f32 %v5188_v37, %v4208_v38  ;;  %v7400_v56 = vadd.f32 %v4217_v2, %v7037_v13 }
0x17ff   : > { %v5779_v62 = vpop.f32.mrf.mxu0 }
0x1800   : > { %v7397_v59 = vadd.f32 %v4209_v41, %v7034_v32  ;;  %v4220_v6 = vadd.f32 %v5779_v62, %v5188_v37  ;;  %v4237_v0 = vsel %vm1008_vm0, %v7400_v56, 0.0 }
0x1801   : > { %v4211_v3 = vpop.f32.mrf.mxu0 }
0x1802   : > { %v4212_v16 = vadd.f32 %v5188_v37, %v4211_v3  ;;  %v4231_v61 = vsel %vm1008_vm0, %v7397_v59, 0.0  ;;  %v7408_v20 = vadd.f32 %v4220_v6, %v7045_v15 }
0x1803   : > { %4232 = vadd.xlane.f32.xlu0 %v4231_v61 }
0x1804   : > { %v7405_v19 = vadd.f32 %v4212_v16, %v7042_v12  ;;  %v4240_v13 = vsel %vm1008_vm0, %v7408_v20, 0.0 }
0x1806   : > { %v4234_v32 = vsel %vm1008_vm0, %v7405_v19, 0.0 }
0x1807   : > { %4235 = vadd.xlane.f32.xlu1 %v4234_v32  ;;  %4238 = vadd.xlane.f32.xlu0 %v4237_v0 }
0x180b   : > { %4241 = vadd.xlane.f32.xlu0 %v4240_v13  ;;  %v5992_v13 = vld [vmem:[%s7626_s14 + $0x78] sm:$0xff]  }
0x180c   : > { %5792 = vmatprep.subr.bf16.mxu0 %v5992_v13 }
0x180d   : > { %5793 = vmatpush3.bf16.msra.mxu0 %v5992_v13 }
0x188c   : > { %v4233_v21 = vpop.xlane.xlu0 %4232 }
0x188d   : > { %v4243_v5 = vmul.f32 0.015625, %v4233_v21  ;;  %v5993_v21 = vld [vmem:[%s7626_s14 + $0x70] sm:$0xff]  }
0x188e   : > { %5794 = vmatprep.subr.bf16.mxu0 %v5993_v21 }
0x188f   : > { %v4247_v12 = vsub.f32 %v7397_v59, %v4243_v5  ;;  %5795 = vmatpush3.bf16.msra.mxu0 %v5993_v21  ;;  %v5994_v5 = vld [vmem:[%s7626_s14 + $0x68] sm:$0xff]  }
0x1890   : > { %v4236_v4 = vpop.xlane.xlu1 %4235  ;;  %v4239_v23 = vpop.xlane.xlu0 %4238  ;;  %5796 = vmatprep.subr.bf16.mxu0 %v5994_v5 }
0x1891   : > { %v4244_v15 = vmul.f32 0.015625, %v4236_v4  ;;  %v4245_v25 = vmul.f32 0.015625, %v4239_v23  ;;  %v4251_v26 = vmul.f32 %v4247_v12, %v4247_v12  ;;  %v5996_v4 = vld [vmem:[%s7626_s14 + $0x58] sm:$0xff]   ;;  %v5997_v23 = vld [vmem:[%s7626_s14 + $0x50] sm:$0xff]  }
0x1893   : > { %v4248_v30 = vsub.f32 %v7405_v19, %v4244_v15  ;;  %v4249_v40 = vsub.f32 %v7400_v56, %v4245_v25  ;;  %v4255_v29 = vsel %vm1008_vm0, %v4251_v26, 0.0  ;;  %5797 = vmatpush3.bf16.msra.mxu0 %v5994_v5  ;;  %v5998_v15 = vld [vmem:[%s7626_s14 + $0x48] sm:$0xff]   ;;  %v5999_v25 = vld [vmem:[%s7626_s14 + $0x40] sm:$0xff]  }
0x1894   : > { %4256 = vadd.xlane.f32.xlu0 %v4255_v29  ;;  %v4242_v14 = vpop.xlane.xlu0 %4241  ;;  %v5208_v26 = vld [vmem:[%s7625_s13 + $0x1] ss:$0 sm:$0xff] }
0x1895   : > { %v4246_v24 = vmul.f32 0.015625, %v4242_v14  ;;  %v4252_v48 = vmul.f32 %v4248_v30, %v4248_v30  ;;  %v4253_v42 = vmul.f32 %v4249_v40, %v4249_v40 }
0x1897   : > { %v4250_v50 = vsub.f32 %v7408_v20, %v4246_v24  ;;  %v4258_v60 = vsel %vm1008_vm0, %v4252_v48, 0.0  ;;  %v4261_v51 = vsel %vm1008_vm0, %v4253_v42, 0.0 }
0x1898   : > { %4259 = vadd.xlane.f32.xlu1 %v4258_v60  ;;  %4262 = vadd.xlane.f32.xlu0 %v4261_v51 }
0x1899   : > { %v4254_v47 = vmul.f32 %v4250_v50, %v4250_v50 }
0x189b   : > { %v4264_v49 = vsel %vm1008_vm0, %v4254_v47, 0.0 }
0x189c   : > { %4265 = vadd.xlane.f32.xlu1 %v4264_v49 }
0x191d   : > { %v4257_v55 = vpop.xlane.xlu0 %4256 }
0x191e   : > { %v4267_v35 = vmul.f32 0.015625, %v4257_v55 }
0x1920   : > { %v4271_v58 = vadd.f32 1e-05, %v4267_v35 }
0x1921   : > { %v4260_v9 = vpop.xlane.xlu1 %4259  ;;  %v4263_v7 = vpop.xlane.xlu0 %4262 }
0x1922   : > { %6184 = vrsqrt.f32 %v4271_v58  ;;  %v4268_v8 = vmul.f32 0.015625, %v4260_v9  ;;  %v4269_v17 = vmul.f32 0.015625, %v4263_v7 }
0x1924   : > { %v4272_v31 = vadd.f32 1e-05, %v4268_v8  ;;  %v4273_v63 = vadd.f32 1e-05, %v4269_v17 }
0x1925   : > { %v4266_v39 = vpop.xlane.xlu1 %4265 }
0x1926   : > { %6186 = vrsqrt.f32 %v4272_v31  ;;  %v4270_v45 = vmul.f32 0.015625, %v4266_v39 }
0x1927   : > { %6188 = vrsqrt.f32 %v4273_v63 }
0x1928   : > { %v4274_v57 = vadd.f32 1e-05, %v4270_v45 }
0x192a   : > { %6190 = vrsqrt.f32 %v4274_v57 }
0x192f   : > { %v6185_v1 = vpop.eup %6184 }
0x1930   : > { %v4279_v10 = vmul.f32 %v6185_v1, %v4247_v12  ;;  %v5995_v12 = vld [vmem:[%s7626_s14 + $0x60] sm:$0xff]  }
0x1931   : > { %5798 = vmatprep.subr.bf16.mxu0 %v5995_v12 }
0x1932   : > { %v4289_v46 = vmul.f32 %v5197_v22, %v4279_v10  ;;  %5799 = vmatpush3.bf16.msra.mxu0 %v5995_v12 }
0x1933   : > { %v6187_v11 = vpop.eup %6186  ;;  %5800 = vmatprep.subr.bf16.mxu0 %v5996_v4 }
0x1934   : > { %v6189_v28 = vpop.eup %6188  ;;  %v4280_v34 = vmul.f32 %v6187_v11, %v4248_v30  ;;  %v4299_v62 = vadd.f32 %v5198_v33, %v4289_v46 }
0x1935   : > { %v4281_v44 = vmul.f32 %v6189_v28, %v4249_v40 }
0x1936   : > { %v4290_v37 = vmul.f32 %v5197_v22, %v4280_v34  ;;  %5801 = vmatpush3.bf16.msra.mxu0 %v5996_v4 }
0x1937   : > { %v6191_v38 = vpop.eup %6190  ;;  %v4291_v41 = vmul.f32 %v5197_v22, %v4281_v44  ;;  %5802 = vmatprep.subr.bf16.mxu0 %v5997_v23 }
0x1938   : > { %v4282_v2 = vmul.f32 %v6191_v38, %v4250_v50  ;;  %v4300_v3 = vadd.f32 %v5198_v33, %v4290_v37 }
0x1939   : > { %v4301_v61 = vadd.f32 %v5198_v33, %v4291_v41 }
0x193a   : > { %v4292_v6 = vmul.f32 %v5197_v22, %v4282_v2  ;;  %v4303_v16 = vpack.c.bf16 %v4300_v3, %v4299_v62  ;;  %5803 = vmatpush3.bf16.msra.mxu0 %v5997_v23 }
0x193b   : > { %5804 = vmatprep.subr.bf16.mxu0 %v5998_v15 }
0x193c   : > { %v4302_v32 = vadd.f32 %v5198_v33, %v4292_v6  ;;  %5788 = vmatprep.mubr.msk.bf16.mxu1 %vm1008_vm0, %v4303_v16 }
0x193e   : > { %v4304_v0 = vpack.c.bf16 %v4302_v32, %v4301_v61  ;;  %5805 = vmatpush3.bf16.msra.mxu0 %v5998_v15 }
0x193f   : > { %5806 = vmatprep.subr.bf16.mxu0 %v5999_v25 }
0x1940   : > { %5789 = vmatmul.mubr.msk.bf16.vlgmr.msra.gmra.mxu1 %vm1008_vm0, %v4304_v0  ;;  %v5232_v0 = vld [vmem:[%s7627_s15 + $0x1] ss:$0 sm:$0xff] }
0x1941   : > { %4739 = vmatprep.mubr.bf16.mxu1 %v6274_v43 }
0x1942   : > { %5807 = vmatpush3.bf16.msra.mxu0 %v5999_v25 }
0x1a00   : > { %v5790_v30 = vpop.f32.mrf.mxu1 }
0x1a01   : > { %v4395_v40 = vadd.f32 %v5790_v30, %v5208_v26 }
0x1a02   : > { %v4386_v29 = vpop.f32.mrf.mxu1 }
0x1a03   : > { %v4403_v14 = vmul.f32 %v4395_v40, %v4395_v40  ;;  %v4387_v24 = vadd.f32 %v5208_v26, %v4386_v29 }
0x1a04   : > { %v5791_v48 = vpop.f32.mrf.mxu1 }
0x1a05   : > { %v4407_v42 = vmul.f32 %v4403_v14, %v4395_v40  ;;  %v4401_v50 = vmul.f32 %v4387_v24, %v4387_v24  ;;  %v4398_v60 = vadd.f32 %v5791_v48, %v5208_v26 }
0x1a06   : > { %v4389_v51 = vpop.f32.mrf.mxu1 }
0x1a07   : > { %v4411_v47 = vmul.f32 0.044715, %v4407_v42  ;;  %v4405_v49 = vmul.f32 %v4401_v50, %v4387_v24  ;;  %v4404_v52 = vmul.f32 %v4398_v60, %v4398_v60  ;;  %v4390_v53 = vadd.f32 %v5208_v26, %v4389_v51 }
0x1a09   : > { %v4415_v54 = vadd.f32 %v4411_v47, %v4395_v40  ;;  %v4409_v36 = vmul.f32 0.044715, %v4405_v49  ;;  %v4408_v55 = vmul.f32 %v4404_v52, %v4398_v60  ;;  %v4402_v35 = vmul.f32 %v4390_v53, %v4390_v53 }
0x1a0b   : > { %v4419_v58 = vmul.f32 0.7978846, %v4415_v54  ;;  %v4413_v9 = vadd.f32 %v4409_v36, %v4387_v24  ;;  %v4412_v7 = vmul.f32 0.044715, %v4408_v55  ;;  %v4406_v8 = vmul.f32 %v4402_v35, %v4390_v53 }
0x1a0d   : > { %v4417_v17 = vmul.f32 0.7978846, %v4413_v9  ;;  %v4416_v31 = vadd.f32 %v4412_v7, %v4398_v60  ;;  %v4410_v63 = vmul.f32 0.044715, %v4406_v8  ;;  %6192 = vtanh.f32 %v4419_v58 }
0x1a0f   : > { %6194 = vtanh.f32 %v4417_v17  ;;  %v4420_v39 = vmul.f32 0.7978846, %v4416_v31  ;;  %v4414_v45 = vadd.f32 %v4410_v63, %v4390_v53  ;;  %v6002_v17 = vld [vmem:[%s7630_s18 + $0x34] ss:$8 sps:$4 sm:$0xff]   ;;  %v6000_v31 = vld [vmem:[%s7630_s18 + $0x30] ss:$8 sps:$4 sm:$0xff]  }
0x1a10   : > { %4715 = vmatprep.subr.bf16.mxu1 %v6002_v17  ;;  %v6005_v63 = vld [vmem:[%s7630_s18 + $0x24] ss:$8 sps:$4 sm:$0xff]  }
0x1a11   : > { %6196 = vtanh.f32 %v4420_v39  ;;  %v4418_v57 = vmul.f32 0.7978846, %v4414_v45  ;;  %4716 = vmatpush1.bf16.msra.mxu1 %v6000_v31  ;;  %v6003_v39 = vld [vmem:[%s7630_s18 + $0x20] ss:$8 sps:$4 sm:$0xff]   ;;  %v6008_v45 = vld [vmem:[%s7630_s18 + $0x14] ss:$8 sps:$4 sm:$0xff]  }
0x1a12   : > { %4717 = vmatprep.subr.bf16.mxu1 %v6005_v63 }
0x1a13   : > { %6198 = vtanh.f32 %v4418_v57  ;;  %v6006_v57 = vld [vmem:[%s7630_s18 + $0x10] ss:$8 sps:$4 sm:$0xff]  }
0x1a15   : > { %4718 = vmatpush1.bf16.msra.mxu1 %v6003_v39 }
0x1a16   : > { %4719 = vmatprep.subr.bf16.mxu1 %v6008_v45 }
0x1a19   : > { %4720 = vmatpush1.bf16.msra.mxu1 %v6006_v57 }
0x1a1a   : > { %v6193_v1 = vpop.eup %6192 }
0x1a1b   : > { %v4427_v28 = vadd.f32 1.0, %v6193_v1  ;;  %v6011_v1 = vld [vmem:[%s7630_s18 + $0x4] ss:$8 sps:$4 sm:$0xff]  }
0x1a1c   : > { %v6195_v10 = vpop.eup %6194  ;;  %4721 = vmatprep.subr.bf16.mxu1 %v6011_v1 }
0x1a1d   : > { %v4425_v22 = vadd.f32 1.0, %v6195_v10  ;;  %v4431_v38 = vmul.f32 0.5, %v4427_v28  ;;  %v6009_v10 = vld [vmem:[%s7630_s18] ss:$8 sps:$4 sm:$0xff]  }
0x1a1e   : > { %v6197_v11 = vpop.eup %6196  ;;  %4722 = vmatpush1.bf16.msra.mxu1 %v6009_v10 }
0x1a1f   : > { %v4428_v34 = vadd.f32 1.0, %v6197_v11  ;;  %v4429_v37 = vmul.f32 0.5, %v4425_v22  ;;  %v4435_v6 = vmul.f32 %v4431_v38, %v4395_v40  ;;  %4866 = vmatprep.subr.bf16.mxu1 %v6274_v43 }
0x1a20   : > { %v6199_v46 = vpop.eup %6198 }
0x1a21   : > { %v4432_v44 = vmul.f32 0.5, %v4428_v34  ;;  %v4426_v33 = vadd.f32 1.0, %v6199_v46  ;;  %v4433_v62 = vmul.f32 %v4429_v37, %v4387_v24 }
0x1a23   : > { %v4430_v2 = vmul.f32 0.5, %v4426_v33  ;;  %v4436_v41 = vmul.f32 %v4432_v44, %v4398_v60 }
0x1a25   : > { %v4434_v3 = vmul.f32 %v4430_v2, %v4390_v53  ;;  %v4438_v61 = vpack.c.bf16 %v4436_v41, %v4435_v6 }
0x1a27   : > { %v4437_v16 = vpack.c.bf16 %v4434_v3, %v4433_v62 }
0x1a29   : > { %5808 = vmatprep.mubr.bf16.mxu0 %v4437_v16  ;;  %v5241_v16 = vld [vmem:[%s7628_s16] ss:$0 sm:$0xff] }
0x1a2a   : > { %5809 = vmatmul.mubr.bf16.vlgmr.msra.gmra.mxu0 %v4438_v61 }
0x1aea   : > { %v5810_v32 = vpop.f32.mrf.mxu0 }
0x1aeb   : > { %v4555_v21 = vadd.f32 %v5810_v32, %v5232_v0 }
0x1aec   : > { %v4546_v13 = vpop.f32.mrf.mxu0 }
0x1aed   : > { %v4547_v5 = vadd.f32 %v5232_v0, %v4546_v13  ;;  %v4563_v15 = vadd.f32 %v4555_v21, %v7400_v56 }
0x1aee   : > { %v5811_v12 = vpop.f32.mrf.mxu0 }
0x1aef   : > { %v4561_v4 = vadd.f32 %v4547_v5, %v7397_v59  ;;  %v4558_v25 = vadd.f32 %v5811_v12, %v5232_v0  ;;  %v4573_v24 = vsel %vm1008_vm0, %v4563_v15, 0.0  ;;  %v5242_v5 = vld [vmem:[%s7629_s17] ss:$0 sm:$0xff] }
0x1af0   : > { %v4549_v23 = vpop.f32.mrf.mxu0 }
0x1af1   : > { %v4550_v26 = vadd.f32 %v5232_v0, %v4549_v23  ;;  %v4567_v30 = vsel %vm1008_vm0, %v4561_v4, 0.0  ;;  %v4564_v29 = vadd.f32 %v4558_v25, %v7408_v20 }
0x1af2   : > { %4568 = vadd.xlane.f32.xlu0 %v4567_v30 }
0x1af3   : > { %v4562_v40 = vadd.f32 %v4550_v26, %v7405_v19  ;;  %v4576_v59 = vsel %vm1008_vm0, %v4564_v29, 0.0 }
0x1af5   : > { %v4570_v14 = vsel %vm1008_vm0, %v4562_v40, 0.0 }
0x1af6   : > { %4571 = vadd.xlane.f32.xlu1 %v4570_v14  ;;  %4574 = vadd.xlane.f32.xlu0 %v4573_v24 }
0x1afa   : > { %4577 = vadd.xlane.f32.xlu1 %v4576_v59 }
0x1b7b   : > { %v4569_v48 = vpop.xlane.xlu0 %4568 }
0x1b7c   : > { %v4579_v56 = vmul.f32 0.015625, %v4569_v48 }
0x1b7e   : > { %v4583_v42 = vsub.f32 %v4561_v4, %v4579_v56  ;;  %v6012_v56 = vld [vmem:[%s7632_s20 + $0x38] sm:$0xff]  }
0x1b7f   : > { %v4572_v50 = vpop.xlane.xlu1 %4571  ;;  %v4575_v60 = vpop.xlane.xlu0 %4574 }
0x1b80   : > { %v4580_v51 = vmul.f32 0.015625, %v4572_v50  ;;  %v4581_v47 = vmul.f32 0.015625, %v4575_v60  ;;  %v4587_v49 = vmul.f32 %v4583_v42, %v4583_v42  ;;  %v6013_v50 = vld [vmem:[%s7632_s20 + $0x30] sm:$0xff]   ;;  %v6014_v60 = vld [vmem:[%s7632_s20 + $0x28] sm:$0xff]  }
0x1b82   : > { %v4584_v19 = vsub.f32 %v4562_v40, %v4580_v51  ;;  %v4585_v52 = vsub.f32 %v4563_v15, %v4581_v47  ;;  %v4591_v20 = vsel %vm1008_vm0, %v4587_v49, 0.0  ;;  %v6015_v51 = vld [vmem:[%s7632_s20 + $0x20] sm:$0xff]   ;;  %v6016_v47 = vld [vmem:[%s7632_s20 + $0x18] sm:$0xff]   ;;  %v6017_v49 = vld [vmem:[%s7632_s20 + $0x10] sm:$0xff]  }
0x1b83   : > { %v4578_v53 = vpop.xlane.xlu1 %4577  ;;  %4592 = vadd.xlane.f32.xlu0 %v4591_v20  ;;  %v6020_v20 = vld [vmem:[%s7632_s20 + $0x58] sm:$0xff]  }
0x1b84   : > { %v4582_v54 = vmul.f32 0.015625, %v4578_v53  ;;  %v4588_v36 = vmul.f32 %v4584_v19, %v4584_v19  ;;  %v4589_v55 = vmul.f32 %v4585_v52, %v4585_v52  ;;  %v6021_v53 = vld [vmem:[%s7632_s20 + $0x50] sm:$0xff]  }
0x1b86   : > { %v4586_v35 = vsub.f32 %v4564_v29, %v4582_v54  ;;  %v4594_v58 = vsel %vm1008_vm0, %v4588_v36, 0.0  ;;  %v4597_v9 = vsel %vm1008_vm0, %v4589_v55, 0.0  ;;  %v6022_v54 = vld [vmem:[%s7632_s20 + $0x48] sm:$0xff]   ;;  %v6023_v36 = vld [vmem:[%s7632_s20 + $0x40] sm:$0xff]  }
0x1b87   : > { %4595 = vadd.xlane.f32.xlu1 %v4594_v58  ;;  %4598 = vadd.xlane.f32.xlu0 %v4597_v9  ;;  %v4652_v55 = vld [vmem:[%s7631_s19] sm:$0x3] }
0x1b88   : > { %v4590_v7 = vmul.f32 %v4586_v35, %v4586_v35  ;;  %v4661_v58 = vrot.slane %v4652_v55, %v6620_v27  ;;  %v5252_v27 = vld [vmem:[%s7633_s21] ss:$0 sm:$0xff] }
0x1b8a   : > { %v4600_v8 = vsel %vm1008_vm0, %v4590_v7, 0.0 }
0x1b8b   : > { %4601 = vadd.xlane.f32.xlu1 %v4600_v8 }
0x1c0c   : > { %v4593_v22 = vpop.xlane.xlu0 %4592 }
0x1c0d   : > { %v4603_v11 = vmul.f32 0.015625, %v4593_v22 }
0x1c0f   : > { %v4607_v28 = vadd.f32 1e-05, %v4603_v11 }
0x1c10   : > { %v4596_v34 = vpop.xlane.xlu1 %4595  ;;  %v4599_v46 = vpop.xlane.xlu0 %4598 }
0x1c11   : > { %6200 = vrsqrt.f32 %v4607_v28  ;;  %v4604_v44 = vmul.f32 0.015625, %v4596_v34  ;;  %v4605_v33 = vmul.f32 0.015625, %v4599_v46 }
0x1c13   : > { %v4608_v37 = vadd.f32 1e-05, %v4604_v44  ;;  %v4609_v38 = vadd.f32 1e-05, %v4605_v33 }
0x1c14   : > { %v4602_v2 = vpop.xlane.xlu1 %4601 }
0x1c15   : > { %6202 = vrsqrt.f32 %v4608_v37  ;;  %v4606_v41 = vmul.f32 0.015625, %v4602_v2 }
0x1c16   : > { %6204 = vrsqrt.f32 %v4609_v38 }
0x1c17   : > { %v4610_v62 = vadd.f32 1e-05, %v4606_v41 }
0x1c19   : > { %6206 = vrsqrt.f32 %v4610_v62 }
0x1c1e   : > { %v6201_v3 = vpop.eup %6200 }
0x1c1f   : > { %v4615_v6 = vmul.f32 %v6201_v3, %v4583_v42 }
0x1c21   : > { %v4625_v0 = vmul.f32 %v5241_v16, %v4615_v6 }
0x1c22   : > { %v6203_v61 = vpop.eup %6202 }
0x1c23   : > { %v6205_v32 = vpop.eup %6204  ;;  %v4616_v13 = vmul.f32 %v6203_v61, %v4584_v19  ;;  %v4635_v25 = vadd.f32 %v5242_v5, %v4625_v0  ;;  %v6018_v19 = vld [vmem:[%s7632_s20 + $0x8] sm:$0xff]  }
0x1c24   : > { %v4617_v21 = vmul.f32 %v6205_v32, %v4585_v52  ;;  %v6019_v52 = vld [vmem:[%s7632_s20] sm:$0xff]  }
0x1c25   : > { %v4626_v12 = vmul.f32 %v5241_v16, %v4616_v13 }
0x1c26   : > { %v6207_v4 = vpop.eup %6206  ;;  %v4627_v23 = vmul.f32 %v5241_v16, %v4617_v21 }
0x1c27   : > { %v4618_v15 = vmul.f32 %v6207_v4, %v4586_v35  ;;  %v4636_v26 = vadd.f32 %v5242_v5, %v4626_v12  ;;  %v4657_v35 = vrot.slane %v4652_v55, %v6610_v18 }
0x1c28   : > { %v4637_v40 = vadd.f32 %v5242_v5, %v4627_v23 }
0x1c29   : > { %v4628_v30 = vmul.f32 %v5241_v16, %v4618_v15  ;;  %v4639_v29 = vadd.f32 %v4636_v26, %v4635_v25 }
0x1c2b   : > { %v4638_v14 = vadd.f32 %v5242_v5, %v4628_v30  ;;  %v4640_v24 = vadd.f32 %v4639_v29, %v4637_v40 }
0x1c2d   : > { %v4641_v59 = vadd.f32 %v4640_v24, %v4638_v14 }
0x1c2f   : > { %v4642_v48 = vmul.f32 0.25, %v4641_v59 }
0x1c31   : > { %v4643_v42 = vpack.c.bf16 %v4642_v48, %v4642_v48 }
0x1c33   : > { %5251 = vmatmul.mubr.msk.bf16.vlgmr.msra.gmra.mxu1 %vm1008_vm0, %v4643_v42 }
0x1c34   : > { %4867 = vmatpush1.bf16.msra.mxu1 %v6012_v56 }
0x1c35   : > { %4868 = vmatprep.subr.bf16.mxu1 %v6274_v43 }
0x1c38   : > { %4869 = vmatpush1.bf16.msra.mxu1 %v6013_v50 }
0x1c39   : > { %4870 = vmatprep.subr.bf16.mxu1 %v6274_v43 }
0x1c3c   : > { %4871 = vmatpush1.bf16.msra.mxu1 %v6014_v60 }
0x1c3d   : > { %4872 = vmatprep.subr.bf16.mxu1 %v6274_v43 }
0x1c40   : > { %4873 = vmatpush1.bf16.msra.mxu1 %v6015_v51 }
0x1c41   : > { %4874 = vmatprep.subr.bf16.mxu1 %v6274_v43 }
0x1c44   : > { %4875 = vmatpush1.bf16.msra.mxu1 %v6016_v47 }
0x1c45   : > { %4876 = vmatprep.subr.bf16.mxu1 %v6274_v43 }
0x1c48   : > { %4877 = vmatpush1.bf16.msra.mxu1 %v6017_v49 }
0x1c49   : > { %4878 = vmatprep.subr.bf16.mxu1 %v6274_v43 }
0x1c4c   : > { %4879 = vmatpush1.bf16.msra.mxu1 %v6018_v19 }
0x1c4d   : > { %4880 = vmatprep.subr.bf16.mxu1 %v6274_v43 }
0x1c50   : > { %4881 = vmatpush1.bf16.msra.mxu1 %v6019_v52 }
0x1c51   : > { %4890 = vmatprep.subr.bf16.mxu1 %v6274_v43 }
0x1c54   : > { %4891 = vmatpush2.bf16.msra.mxu1 %v6020_v20 }
0x1c55   : > { %4892 = vmatprep.subr.bf16.mxu1 %v6274_v43 }
0x1c58   : > { %4893 = vmatpush2.bf16.msra.mxu1 %v6021_v53 }
0x1c59   : > { %4894 = vmatprep.subr.bf16.mxu1 %v6274_v43 }
0x1c5c   : > { %4895 = vmatpush2.bf16.msra.mxu1 %v6022_v54 }
0x1c5d   : > { %4896 = vmatprep.subr.bf16.mxu1 %v6274_v43 }
0x1c60   : > { %4897 = vmatpush2.bf16.msra.mxu1 %v6023_v36 }
0x1cf3   : > { %v4741_v9 = vpop.f32.mrf.mxu1 }
0x1cf4   : > { %v4742_v7 = vadd.f32 %v4741_v9, %v4657_v35 }
0x1cf5   : > { %v4743_v8 = vpop.f32.mrf.mxu1 }
0x1cf6   : > { %v4748_v17 = vadd.f32 3.0, %v4742_v7  ;;  %v4744_v31 = vadd.f32 %v4743_v8, %v4661_v58 }
0x1cf7   : > { %v4745_v63 = vpop.f32.mrf.mxu1 }
0x1cf8   : > { %v4750_v43 = vmax.f32 %v4748_v17, 0.0  ;;  %v4749_v39 = vadd.f32 3.0, %v4744_v31 }
0x1cf9   : > { %v4746_v45 = vpop.f32.mrf.mxu1 }
0x1cfa   : > { %v4752_v57 = vmin.f32 %v4750_v43, 6.0  ;;  %v4751_v1 = vmax.f32 %v4749_v39, 0.0 }
0x1cfc   : > { %v4754_v10 = vmul.f32 %v4752_v57, %v4742_v7  ;;  %v4753_v22 = vmin.f32 %v4751_v1, 6.0 }
0x1cfe   : > { %v4755_v11 = vmul.f32 %v4753_v22, %v4744_v31  ;;  %v4756_v28 = vmul.f32 0.16666667, %v4754_v10 }
0x1d00   : > { %v4757_v34 = vmul.f32 0.16666667, %v4755_v11  ;;  %v4758_v18 = vpack.c.bf16 %v4756_v28, %v4756_v28 }
0x1d02   : > { %v4759_v46 = vpack.c.bf16 %v4757_v34, %v4757_v34 }
0x1d04   : > { %5265 = vmatprep.mubr.msk.bf16.mxu1 %vm1008_vm0, %v4759_v46 }
0x1d05   : > { %4899 = vmatmul.mubr.bf16.vlgmr.msra.gmra.mxu1 %v4758_v18 }
0x1dc5   : > { %v4900_v44 = vpop.f32.mrf.mxu1 }
0x1dc6   : > { %v4901_v33 = vadd.f32 %v5252_v27, %v4900_v44 }
0x1dc7   : > { %v4902_v37 = vpop.f32.mrf.mxu1 }
0x1dc8   : > { %v4907_v38 = vsel %vm4906_vm4, %v4901_v33, -inf }
0x1dc9   : > { %v4903_v2 = vpop.f32.mrf.mxu1  ;;  %4908 = vmax.xlane.f32.xlu0 %v4907_v38 }
0x1dcb   : > { %v4904_v41 = vpop.f32.mrf.mxu1 }
0x1e52   : > { %v4909_v62 = vpop.xlane.xlu0 %4908 }
0x1e53   : > { %v4910_v3 = vsub.f32 %v4901_v33, %v4909_v62 }
0x1e55   : > { %v4911_v6 = vmul.f32 1.442695, %v4910_v3 }
0x1e57   : > { %6208 = vpow2.f32 %v4911_v6 }
0x1e64   : > { %v6209_v16 = vpop.eup %6208 }
0x1e65   : > { %v4913_v61 = vsel %vm4906_vm4, %v6209_v16, 0.0 }
0x1e66   : > { %4914 = vadd.xlane.f32.xlu1 %v4913_v61 }
0x1eef   : > { %v4915_v32 = vpop.xlane.xlu1 %4914 }
0x1ef0   : > { %6210 = vrcp.f32 %v4915_v32 }
0x1efd   : > { %v6211_v0 = vpop.eup %6210 }
0x1efe   : > { %v4917_v13 = vmul.f32 %v6211_v0, %v6209_v16 }
0x1f00   : > { %4918 = vst.msk [vmem:[%s676_s24] sm:$0xff] %vm4906_vm4, %v4917_v13 }
0x1f01   : > { %6225 = shalt.err (!%p6222_p3)
}
0x1f02   : > { %s6226_s26 = scalar_lea.hbm %s4931_s0, 128  ;;  %s6230_s24 = scalar_lea.hbm %s7700_s23, 256 }
0x1f03   : > { %p6227_p4 = scmp.ne.s32.totalorder %s4931_s0, %s6226_s26  ;;  %p6231_p9 = scmp.lt.s32.totalorder %s4931_s0, %s7700_s23 }
0x1f04   : > { %p6232_p10 = scmp.lt.s32.totalorder %s6230_s24, %s6226_s26 }
0x1f05   : > { %p6228_p7 = pnand %p6227_p4, %p6436_p5 }
0x1f06   : > { %p6233_p11 = por %p6232_p10, %p6231_p9 }
0x1f07   : > { %p6229_p8 = pneg %p6228_p7 }
0x1f09   : > { %p6234_p12 = pnand %p6233_p11, %p6229_p8 }
0x1f0b   : > { %6237 = shalt.err (!%p6234_p12)
}
0x1f0c   : > { %5813 = dma.vmem_to_hbm [thread:$0]  (%p6436_p5), %s4934_s29, 128, %s4931_s0, %s4920_s2  }
0x1f0d PF: > { %s7701_s7 = sld [smem:[#allocation7_spill]] }
0x1f0e   : > { %s7702_s5 = sld [smem:[#allocation5_spill]] }
0x1f13   : > { %p5819_p13 = scmp.ge.s32.totalorder %s7701_s7, 2 }
0x1f14   : > { %s4945_s4 = sand.u32 1, %s7702_s5  }
0x1f15   : > { %p5816_p0 = pnand %p5819_p13, %p6440_p6  ;;  %s4946_s22 = scalar_lea.sflag [#allocation3], %s4945_s4 }
0x1f17   : > { %p5817_p1 = pneg %p5816_p0 }
0x1f19   : > { %6255 = dma.done.wait (%p5817_p1), %s4946_s22, 128  }
0x1f1a   : > { %6257 = vsyncadd (%p5817_p1), %s4946_s22, 4294967168  ;;  %s7704_s30 = sld [smem:[#allocation8_spill]]  ;;  %s7707_s3 = smov %s6264_s28 }
0x1f1b   : > { %s7705_s26 = sld [smem:[#allocation6_spill]] }
0x1f1c   : > { %s7706_s29 = sld [smem:[#allocation9_spill]] }
0x1f20   : > { %p32_p2 = scmp.ge.s32.totalorder %s7704_s30, 4  }
0x1f21   : > { %s7708_s28 = smov %s7705_s26 }
0x1f22   :  { %34 = sbr.rel (!%p32_p2) target bundleno = 13 (0xd), region = 155 }
0x1f27   :  { %4951 = vsyncpa [#allocation3], 1 }
0x1f28   :  { %4953 = vsyncpa [#allocation3 + $0x1], 1 }

</bundles_post_ra>
